<compile_context>
chip_gen: v6e
topology: v6e:2x2x1
jax: 0.10.0
libtpu: 0.0.40
codegen_flags: <defaults>
</compile_context>

<pallas_src>
import functools

import jax
import jax.numpy as jnp
from jax import lax
from jax.experimental import pallas as pl
from jax.experimental.pallas import tpu as pltpu


# Live taps of the 7x7 mask-'A' kernel (mask zeroes kh==3,kw>=3 and all kh>=4).
_CONV1_TAPS = tuple((kh, kw) for kh in range(3) for kw in range(7)) + \
              tuple((3, kw) for kw in range(3))          # 24 taps


# ----------------------------------------------------------------------------
# Fused Pallas kernel (one grid step per batch element)
# ----------------------------------------------------------------------------
def _scramble_row(h, W, hd):
    """PixelRNN's channel-major flatten + (W, hd) re-view of one row.

    Given h (W, hd) channels-last, returns s == h.T.reshape(W, hd), built from a
    2D transpose + static sublane slices + concatenation only (ops with robust
    Mosaic lowering; avoids minor-dim-changing reshapes).
    """
    assert hd % W == 0, "scramble helper assumes hidden_dims % width == 0"
    # TODO(synk): general hd/W scramble (needs lane-offset stitching); the config
    # used here (hd=16, W=8) satisfies hd % W == 0.
    r = hd // W
    h_t = jnp.transpose(h)                                   # (hd, W)
    blocks = []
    for a in range(r):
        rows = [h_t[wv * r + a: wv * r + a + 1, :] for wv in range(W)]
        blocks.append(jnp.concatenate(rows, axis=0))          # (W, W)
    return jnp.concatenate(blocks, axis=1)                    # (W, hd)


def _pixelrnn_kernel(H, W, hd, num_layers,
                     xcols_ref, w1_ref, b1_ref, wcat_ref, bcat_ref,
                     w2_ref, b2_ref, w3_ref, b3_ref,
                     o_ref, act_ref):
    # ---- conv1: masked 7x7 as one im2col matmul over the 24 live taps ----
    feat = jnp.dot(xcols_ref[0], w1_ref[...],
                   preferred_element_type=jnp.float32) + b1_ref[...]
    act_ref[...] = feat.reshape(H, W, hd)                     # channels-last rows

    zrow = jnp.zeros((1, hd), jnp.float32)                    # hoisted broadcast

    # ---- RowLSTM stack (row recurrence over H, all in VMEM) ----
    for l in range(num_layers):
        wcat = wcat_ref[l]                                    # (5*hd, 4*hd)
        bcat = bcat_ref[l]                                    # (1, 4*hd) = bi + bs
        h = jnp.zeros((W, hd), jnp.float32)
        c = jnp.zeros((W, hd), jnp.float32)
        for s in range(H):
            x_row = act_ref[s]                                # (W, hd)
            x_dn = jnp.concatenate([zrow, x_row[:W - 1]], axis=0)   # wi tap 0
            h_dn = jnp.concatenate([zrow, h[:W - 1]], axis=0)       # ws tap 0
            h_up = jnp.concatenate([h[1:], zrow], axis=0)           # ws tap 2
            # one matmul for all gates: K = 5*hd (masked wi tap 2 dropped)
            lhs = jnp.concatenate([x_dn, x_row, h_dn, h, h_up], axis=1)
            g = jax.nn.sigmoid(
                jnp.dot(lhs, wcat, preferred_element_type=jnp.float32) + bcat)
            gi = g[:, 0:hd]
            gg = g[:, hd:2 * hd]
            gf = g[:, 2 * hd:3 * hd]
            go = g[:, 3 * hd:4 * hd]
            c = gf * c + gi * gg
            h = go * jnp.tanh(c)
            # store in the layout the next layer / head consumes
            act_ref[s] = _scramble_row(h, W, hd)

    # ---- head: 1x1 conv -> relu -> 1x1 conv -> sigmoid ----
    a = act_ref[...].reshape(H * W, hd)
    y = jnp.maximum(
        jnp.dot(a, w2_ref[...], preferred_element_type=jnp.float32) + b2_ref[...],
        0.0)
    z = jax.nn.sigmoid(
        jnp.dot(y, w3_ref[...], preferred_element_type=jnp.float32) + b3_ref[...])
    o_ref[0] = z                                              # (H*W, Cout)


# ----------------------------------------------------------------------------
# Wrapper: one-time layout prep + single pallas_call
# ----------------------------------------------------------------------------
def _im2col_conv1(x_nchw):
    B, Cin, H, W = x_nchw.shape
    xp = jnp.pad(jnp.transpose(x_nchw, (0, 2, 3, 1)),
                 ((0, 0), (3, 3), (3, 3), (0, 0)))            # (B, H+6, W+6, Cin)
    cols = jnp.concatenate(
        [xp[:, kh:kh + H, kw:kw + W, :] for (kh, kw) in _CONV1_TAPS], axis=-1)
    return cols.reshape(B, H * W, len(_CONV1_TAPS) * Cin)     # (B, H*W, 24*Cin)


def _prep_weights(params, num_layers, hd):
    w1m = params['conv1_w'] * params['conv1_mask']            # (hd, Cin, 7, 7)
    w1_k = jnp.concatenate(
        [jnp.transpose(w1m[:, :, kh, kw]) for (kh, kw) in _CONV1_TAPS], axis=0)
    b1_k = params['conv1_b'].reshape(1, hd)
    wcat, bcat = [], []
    m = params['mask1d']
    for l in range(num_layers):
        wi = params[f'lstm{l}_wi'] * m[None, None, :]         # (4hd, hd, 3)
        ws = params[f'lstm{l}_ws']
        wcat.append(jnp.concatenate(
            [jnp.transpose(wi[:, :, 0]), jnp.transpose(wi[:, :, 1]),
             jnp.transpose(ws[:, :, 0]), jnp.transpose(ws[:, :, 1]),
             jnp.transpose(ws[:, :, 2])], axis=0))            # (5hd, 4hd)
        bcat.append((params[f'lstm{l}_bi'] + params[f'lstm{l}_bs']).reshape(1, 4 * hd))
    w2_k = jnp.transpose(params['conv2_w'][:, :, 0, 0])       # (hd, 32)
    b2_k = params['conv2_b'].reshape(1, -1)
    w3_k = jnp.transpose(params['conv_last_w'][:, :, 0, 0])   # (32, 32)
    b3_k = params['conv_last_b'].reshape(1, -1)
    return (w1_k, b1_k, jnp.stack(wcat, 0), jnp.stack(bcat, 0),
            w2_k, b2_k, w3_k, b3_k)


@functools.partial(jax.jit, static_argnums=(2, 3))
def pixelrnn_forward(params, x, num_layers, hidden_dims):
    hd = hidden_dims
    B, Cin, H, W = x.shape
    C2 = params['conv2_w'].shape[0]
    Cout = params['conv_last_w'].shape[0]

    xcols = _im2col_conv1(x)
    (w1_k, b1_k, wcat, bcat, w2_k, b2_k, w3_k, b3_k) = \
        _prep_weights(params, num_layers, hd)
    K1 = xcols.shape[-1]

    out = pl.pallas_call(
        functools.partial(_pixelrnn_kernel, H, W, hd, num_layers),
        out_shape=jax.ShapeDtypeStruct((B, H * W, Cout), jnp.float32),
        grid_spec=pltpu.PrefetchScalarGridSpec(
            num_scalar_prefetch=0,
            grid=(B,),
            in_specs=[
                pl.BlockSpec((1, H * W, K1), lambda b: (b, 0, 0)),
                pl.BlockSpec((K1, hd), lambda b: (0, 0)),
                pl.BlockSpec((1, hd), lambda b: (0, 0)),
                pl.BlockSpec((num_layers, 5 * hd, 4 * hd), lambda b: (0, 0, 0)),
                pl.BlockSpec((num_layers, 1, 4 * hd), lambda b: (0, 0, 0)),
                pl.BlockSpec((hd, C2), lambda b: (0, 0)),
                pl.BlockSpec((1, C2), lambda b: (0, 0)),
                pl.BlockSpec((C2, Cout), lambda b: (0, 0)),
                pl.BlockSpec((1, Cout), lambda b: (0, 0)),
            ],
            out_specs=pl.BlockSpec((1, H * W, Cout), lambda b: (b, 0, 0)),
            scratch_shapes=[pltpu.VMEM((H, W, hd), jnp.float32)]),
        compiler_params=pltpu.CompilerParams(
            dimension_semantics=("parallel",)),   # 2x on v7x megacore; serial elsewhere
    )(xcols, w1_k, b1_k, wcat, bcat, w2_k, b2_k, w3_k, b3_k)

    return jnp.transpose(out.reshape(B, H, W, Cout), (0, 3, 1, 2))   # NCHW


# ----------------------------------------------------------------------------
# Deterministic parameter init (shapes from PixelRNN.__init__)
# ----------------------------------------------------------------------------
def init_params(key, num_layers, hidden_dims):
    hd = hidden_dims
    ks = iter(jax.random.split(key, 6 + 4 * num_layers))
    p = {}
    p['conv1_w'] = jax.random.normal(next(ks), (hd, 32, 7, 7), jnp.float32) / jnp.sqrt(32.0 * 49.0)
    p['conv1_b'] = jax.random.normal(next(ks), (hd,), jnp.float32) * 0.01
    mask2d = jnp.ones((hd, 32, 7, 7), jnp.float32)                # mask 'A'
    mask2d = mask2d.at[:, :, 3, 3:].set(0.0)
    mask2d = mask2d.at[:, :, 4:, :].set(0.0)
    p['conv1_mask'] = mask2d
    p['mask1d'] = jnp.array([1.0, 1.0, 0.0], jnp.float32)         # MaskedConv1d 'B', k=3
    for l in range(num_layers):
        p[f'lstm{l}_wi'] = jax.random.normal(next(ks), (4 * hd, hd, 3), jnp.float32) / jnp.sqrt(hd * 3.0)
        p[f'lstm{l}_bi'] = jax.random.normal(next(ks), (4 * hd,), jnp.float32) * 0.01
        p[f'lstm{l}_ws'] = jax.random.normal(next(ks), (4 * hd, hd, 3), jnp.float32) / jnp.sqrt(hd * 3.0)
        p[f'lstm{l}_bs'] = jax.random.normal(next(ks), (4 * hd,), jnp.float32) * 0.01
    p['conv2_w'] = jax.random.normal(next(ks), (32, hd, 1, 1), jnp.float32) / jnp.sqrt(float(hd))
    p['conv2_b'] = jax.random.normal(next(ks), (32,), jnp.float32) * 0.01
    p['conv_last_w'] = jax.random.normal(next(ks), (32, 32, 1, 1), jnp.float32) / jnp.sqrt(32.0)
    p['conv_last_b'] = jax.random.normal(next(ks), (32,), jnp.float32) * 0.01
    return p


# ----------------------------------------------------------------------------
# Pure-JAX reference (mirrors the PyTorch forward exactly) for self-check
# ----------------------------------------------------------------------------
def _conv1d_ref(x, w, b):                                        # x (B,Cin,W), pad=1
    y = lax.conv_general_dilated(x[:, :, None, :], w[:, :, None, :], (1, 1),
                                 [(0, 0), (1, 1)],
                                 dimension_numbers=('NCHW', 'OIHW', 'NCHW'))
    return y[:, :, 0, :] + b[None, :, None]


def _ref_row_lstm(x, wi, bi, ws, bs, hd):
    B, C, H, W = x.shape
    c = jnp.zeros((B, hd * W), jnp.float32)
    h = jnp.zeros((B, hd * W), jnp.float32)
    steps = []
    for s in range(H):
        inp = x[:, :, s, :]
        h_prev = h.reshape(B, hd, W)
        s_s = _conv1d_ref(h_prev, ws, bs).reshape(B, 4 * hd * W)
        i_s = _conv1d_ref(inp, wi, bi).reshape(B, 4 * hd * W)
        g = jax.nn.sigmoid(s_s + i_s)
        gi, gg, gf, go = jnp.split(g, 4, axis=1)
        c = gf * c + gi * gg
        h = go * jnp.tanh(c)
        steps.append(h)
    out = jnp.stack(steps, axis=1)                               # (B, H, hd*W)
    return jnp.transpose(out.reshape(B, H, W, hd), (0, 3, 1, 2))


def ref_forward(params, x, num_layers, hidden_dims):
    hd = hidden_dims
    w1 = params['conv1_w'] * params['conv1_mask']
    y = lax.conv_general_dilated(x, w1, (1, 1), [(3, 3), (3, 3)],
                                 dimension_numbers=('NCHW', 'OIHW', 'NCHW'))
    y = y + params['conv1_b'][None, :, None, None]
    for l in range(num_layers):
        wi = params[f'lstm{l}_wi'] * params['mask1d'][None, None, :]
        y = _ref_row_lstm(y, wi, params[f'lstm{l}_bi'],
                          params[f'lstm{l}_ws'], params[f'lstm{l}_bs'], hd)
    y = lax.conv_general_dilated(y, params['conv2_w'], (1, 1), [(0, 0), (0, 0)],
                                 dimension_numbers=('NCHW', 'OIHW', 'NCHW'))
    y = jnp.maximum(y + params['conv2_b'][None, :, None, None], 0.0)
    y = lax.conv_general_dilated(y, params['conv_last_w'], (1, 1), [(0, 0), (0, 0)],
                                 dimension_numbers=('NCHW', 'OIHW', 'NCHW'))
    return jax.nn.sigmoid(y + params['conv_last_b'][None, :, None, None])


# ----------------------------------------------------------------------------
if __name__ == "__main__":
    num_layers = 2
    hidden_dims = 16
    input_size = 8
    batch = 2

    key = jax.random.PRNGKey(0)
    kp, kx = jax.random.split(key)
    params = init_params(kp, num_layers, hidden_dims)
    # PixelRNN.conv1 expects 32 input channels.
    x = jax.random.normal(kx, (batch, 32, input_size, input_size), jnp.float32)

    out = jax.block_until_ready(pixelrnn_forward(params, x, num_layers, hidden_dims))
    assert out.shape == (batch, 32, input_size, input_size)

    ref = jax.block_until_ready(ref_forward(params, x, num_layers, hidden_dims))
    err = float(jnp.max(jnp.abs(out - ref)))
    assert err < 2e-2, f"mismatch vs pure-JAX reference: {err}"

    print("KERNEL_OK")
</pallas_src>

<mosaic_0001>
module attributes {stable_mosaic.version = 11 : i64} {
  func.func @_pixelrnn_kernel(%arg0: i32, %arg1: memref<1x64x768xf32, #tpu.memory_space<vmem>>, %arg2: memref<768x16xf32, #tpu.memory_space<vmem>>, %arg3: memref<1x16xf32, #tpu.memory_space<vmem>>, %arg4: memref<2x80x64xf32, #tpu.memory_space<vmem>>, %arg5: memref<2x1x64xf32, #tpu.memory_space<vmem>>, %arg6: memref<16x32xf32, #tpu.memory_space<vmem>>, %arg7: memref<1x32xf32, #tpu.memory_space<vmem>>, %arg8: memref<32x32xf32, #tpu.memory_space<vmem>>, %arg9: memref<1x32xf32, #tpu.memory_space<vmem>>, %arg10: memref<1x64x32xf32, #tpu.memory_space<vmem>>, %arg11: memref<8x8x16xf32, #tpu.memory_space<vmem>>) attributes {dimension_semantics = [#tpu.dimension_semantics<parallel>], iteration_bounds = array<i64: 2>, scalar_prefetch = 0 : i64, scratch_operands = 1 : i64, tpu.core_type = #tpu.core_type<tc>, window_params = [{transform_indices = @transform_0, window_bounds = array<i64: 1, 64, 768>}, {pipeline_mode = #tpu.pipeline_mode<synchronous>, transform_indices = @transform_1, window_bounds = array<i64: 768, 16>}, {pipeline_mode = #tpu.pipeline_mode<synchronous>, transform_indices = @transform_2, window_bounds = array<i64: 1, 16>}, {pipeline_mode = #tpu.pipeline_mode<synchronous>, transform_indices = @transform_3, window_bounds = array<i64: 2, 80, 64>}, {pipeline_mode = #tpu.pipeline_mode<synchronous>, transform_indices = @transform_4, window_bounds = array<i64: 2, 1, 64>}, {pipeline_mode = #tpu.pipeline_mode<synchronous>, transform_indices = @transform_5, window_bounds = array<i64: 16, 32>}, {pipeline_mode = #tpu.pipeline_mode<synchronous>, transform_indices = @transform_6, window_bounds = array<i64: 1, 32>}, {pipeline_mode = #tpu.pipeline_mode<synchronous>, transform_indices = @transform_7, window_bounds = array<i64: 32, 32>}, {pipeline_mode = #tpu.pipeline_mode<synchronous>, transform_indices = @transform_8, window_bounds = array<i64: 1, 32>}, {transform_indices = @transform_9, window_bounds = array<i64: 1, 64, 32>}]} {
    %c0 = arith.constant 0 : index
    %c0_0 = arith.constant 0 : index
    %c0_1 = arith.constant 0 : index
    %0 = vector.load %arg1[%c0, %c0_0, %c0_1] : memref<1x64x768xf32, #tpu.memory_space<vmem>>, vector<1x64x768xf32>
    %1 = vector.shape_cast %0 : vector<1x64x768xf32> to vector<64x768xf32>
    %c0_2 = arith.constant 0 : index
    %c0_3 = arith.constant 0 : index
    %2 = vector.load %arg2[%c0_2, %c0_3] : memref<768x16xf32, #tpu.memory_space<vmem>>, vector<768x16xf32>
    %cst = arith.constant dense<0.000000e+00> : vector<64x16xf32>
    %3 = tpu.matmul %1, %2, %cst {dimension_numbers = #tpu.dot_dimension_numbers<[1], [0], [0], [1], [0, 0, 1, 1], [], []>} : vector<64x768xf32>, vector<768x16xf32>, vector<64x16xf32> -> vector<64x16xf32>
    %c0_4 = arith.constant 0 : index
    %c0_5 = arith.constant 0 : index
    %4 = vector.load %arg3[%c0_4, %c0_5] : memref<1x16xf32, #tpu.memory_space<vmem>>, vector<1x16xf32>
    %5 = vector.broadcast %4 : vector<1x16xf32> to vector<64x16xf32>
    %6 = arith.addf %3, %5 : vector<64x16xf32>
    %7 = vector.shape_cast %6 : vector<64x16xf32> to vector<8x8x16xf32>
    %c0_6 = arith.constant 0 : index
    %c0_7 = arith.constant 0 : index
    %c0_8 = arith.constant 0 : index
    %8 = vector.load %arg11[%c0_6, %c0_7, %c0_8] : memref<8x8x16xf32, #tpu.memory_space<vmem>>, vector<8x8x16xf32>
    tpu.vector_store %arg11[%c0_6, %c0_7, %c0_8], %7 {strides = array<i32>} : memref<8x8x16xf32, #tpu.memory_space<vmem>>, vector<8x8x16xf32>,
    %cst_9 = arith.constant 0.000000e+00 : f32
    %9 = vector.broadcast %cst_9 : f32 to vector<1x16xf32>
    %c0_10 = arith.constant 0 : index
    %c0_11 = arith.constant 0 : index
    %c0_12 = arith.constant 0 : index
    %10 = vector.load %arg4[%c0_10, %c0_11, %c0_12] : memref<2x80x64xf32, #tpu.memory_space<vmem>>, vector<1x80x64xf32>
    %11 = vector.shape_cast %10 : vector<1x80x64xf32> to vector<80x64xf32>
    %c0_13 = arith.constant 0 : index
    %c0_14 = arith.constant 0 : index
    %c0_15 = arith.constant 0 : index
    %12 = vector.load %arg5[%c0_13, %c0_14, %c0_15] : memref<2x1x64xf32, #tpu.memory_space<vmem>>, vector<1x1x64xf32>
    %13 = vector.shape_cast %12 : vector<1x1x64xf32> to vector<1x64xf32>
    %cst_16 = arith.constant 0.000000e+00 : f32
    %14 = vector.broadcast %cst_16 : f32 to vector<8x16xf32>
    %cst_17 = arith.constant 0.000000e+00 : f32
    %15 = vector.broadcast %cst_17 : f32 to vector<8x16xf32>
    %c0_18 = arith.constant 0 : index
    %c0_19 = arith.constant 0 : index
    %c0_20 = arith.constant 0 : index
    %16 = vector.load %arg11[%c0_18, %c0_19, %c0_20] : memref<8x8x16xf32, #tpu.memory_space<vmem>>, vector<1x8x16xf32>
    %17 = vector.shape_cast %16 : vector<1x8x16xf32> to vector<8x16xf32>
    %18 = vector.extract_strided_slice %17 {offsets = [0, 0], sizes = [7, 16], strides = [1, 1]} : vector<8x16xf32> to vector<7x16xf32>
    %19 = tpu.concatenate %9, %18 in 0 : vector<1x16xf32>, vector<7x16xf32> -> vector<8x16xf32>
    %20 = vector.extract_strided_slice %14 {offsets = [0, 0], sizes = [7, 16], strides = [1, 1]} : vector<8x16xf32> to vector<7x16xf32>
    %21 = tpu.concatenate %9, %20 in 0 : vector<1x16xf32>, vector<7x16xf32> -> vector<8x16xf32>
    %22 = vector.extract_strided_slice %14 {offsets = [1, 0], sizes = [7, 16], strides = [1, 1]} : vector<8x16xf32> to vector<7x16xf32>
    %23 = tpu.concatenate %22, %9 in 0 : vector<7x16xf32>, vector<1x16xf32> -> vector<8x16xf32>
    %24 = tpu.concatenate %19, %17, %21, %14, %23 in 1 : vector<8x16xf32>, vector<8x16xf32>, vector<8x16xf32>, vector<8x16xf32>, vector<8x16xf32> -> vector<8x80xf32>
    %cst_21 = arith.constant dense<0.000000e+00> : vector<8x64xf32>
    %25 = tpu.matmul %24, %11, %cst_21 {dimension_numbers = #tpu.dot_dimension_numbers<[1], [0], [0], [1], [0, 0, 1, 1], [], []>} : vector<8x80xf32>, vector<80x64xf32>, vector<8x64xf32> -> vector<8x64xf32>
    %26 = vector.broadcast %13 : vector<1x64xf32> to vector<8x64xf32>
    %27 = arith.addf %25, %26 : vector<8x64xf32>
    %28 = arith.negf %27 : vector<8x64xf32>
    %29 = math.exp %28 : vector<8x64xf32>
    %cst_22 = arith.constant 1.000000e+00 : f32
    %30 = vector.broadcast %cst_22 : f32 to vector<8x64xf32>
    %31 = arith.addf %30, %29 : vector<8x64xf32>
    %32 = arith.divf %30, %31 : vector<8x64xf32>
    %33 = vector.extract_strided_slice %32 {offsets = [0, 0], sizes = [8, 16], strides = [1, 1]} : vector<8x64xf32> to vector<8x16xf32>
    %34 = vector.extract_strided_slice %32 {offsets = [0, 16], sizes = [8, 16], strides = [1, 1]} : vector<8x64xf32> to vector<8x16xf32>
    %35 = vector.extract_strided_slice %32 {offsets = [0, 32], sizes = [8, 16], strides = [1, 1]} : vector<8x64xf32> to vector<8x16xf32>
    %36 = vector.extract_strided_slice %32 {offsets = [0, 48], sizes = [8, 16], strides = [1, 1]} : vector<8x64xf32> to vector<8x16xf32>
    %37 = arith.mulf %35, %15 : vector<8x16xf32>
    %38 = arith.mulf %33, %34 : vector<8x16xf32>
    %39 = arith.addf %37, %38 : vector<8x16xf32>
    %40 = math.tanh %39 : vector<8x16xf32>
    %41 = arith.mulf %36, %40 : vector<8x16xf32>
    %42 = tpu.transpose %41, [1, 0] : vector<8x16xf32> -> vector<16x8xf32>
    %43 = vector.extract_strided_slice %42 {offsets = [0, 0], sizes = [1, 8], strides = [1, 1]} : vector<16x8xf32> to vector<1x8xf32>
    %44 = vector.extract_strided_slice %42 {offsets = [2, 0], sizes = [1, 8], strides = [1, 1]} : vector<16x8xf32> to vector<1x8xf32>
    %45 = vector.extract_strided_slice %42 {offsets = [4, 0], sizes = [1, 8], strides = [1, 1]} : vector<16x8xf32> to vector<1x8xf32>
    %46 = vector.extract_strided_slice %42 {offsets = [6, 0], sizes = [1, 8], strides = [1, 1]} : vector<16x8xf32> to vector<1x8xf32>
    %47 = vector.extract_strided_slice %42 {offsets = [8, 0], sizes = [1, 8], strides = [1, 1]} : vector<16x8xf32> to vector<1x8xf32>
    %48 = vector.extract_strided_slice %42 {offsets = [10, 0], sizes = [1, 8], strides = [1, 1]} : vector<16x8xf32> to vector<1x8xf32>
    %49 = vector.extract_strided_slice %42 {offsets = [12, 0], sizes = [1, 8], strides = [1, 1]} : vector<16x8xf32> to vector<1x8xf32>
    %50 = vector.extract_strided_slice %42 {offsets = [14, 0], sizes = [1, 8], strides = [1, 1]} : vector<16x8xf32> to vector<1x8xf32>
    %51 = tpu.concatenate %43, %44, %45, %46, %47, %48, %49, %50 in 0 : vector<1x8xf32>, vector<1x8xf32>, vector<1x8xf32>, vector<1x8xf32>, vector<1x8xf32>, vector<1x8xf32>, vector<1x8xf32>, vector<1x8xf32> -> vector<8x8xf32>
    %52 = vector.extract_strided_slice %42 {offsets = [1, 0], sizes = [1, 8], strides = [1, 1]} : vector<16x8xf32> to vector<1x8xf32>
    %53 = vector.extract_strided_slice %42 {offsets = [3, 0], sizes = [1, 8], strides = [1, 1]} : vector<16x8xf32> to vector<1x8xf32>
    %54 = vector.extract_strided_slice %42 {offsets = [5, 0], sizes = [1, 8], strides = [1, 1]} : vector<16x8xf32> to vector<1x8xf32>
    %55 = vector.extract_strided_slice %42 {offsets = [7, 0], sizes = [1, 8], strides = [1, 1]} : vector<16x8xf32> to vector<1x8xf32>
    %56 = vector.extract_strided_slice %42 {offsets = [9, 0], sizes = [1, 8], strides = [1, 1]} : vector<16x8xf32> to vector<1x8xf32>
    %57 = vector.extract_strided_slice %42 {offsets = [11, 0], sizes = [1, 8], strides = [1, 1]} : vector<16x8xf32> to vector<1x8xf32>
    %58 = vector.extract_strided_slice %42 {offsets = [13, 0], sizes = [1, 8], strides = [1, 1]} : vector<16x8xf32> to vector<1x8xf32>
    %59 = vector.extract_strided_slice %42 {offsets = [15, 0], sizes = [1, 8], strides = [1, 1]} : vector<16x8xf32> to vector<1x8xf32>
    %60 = tpu.concatenate %52, %53, %54, %55, %56, %57, %58, %59 in 0 : vector<1x8xf32>, vector<1x8xf32>, vector<1x8xf32>, vector<1x8xf32>, vector<1x8xf32>, vector<1x8xf32>, vector<1x8xf32>, vector<1x8xf32> -> vector<8x8xf32>
    %61 = tpu.concatenate %51, %60 in 1 : vector<8x8xf32>, vector<8x8xf32> -> vector<8x16xf32>
    %c0_23 = arith.constant 0 : index
    %c0_24 = arith.constant 0 : index
    %c0_25 = arith.constant 0 : index
    %62 = vector.load %arg11[%c0_23, %c0_24, %c0_25] : memref<8x8x16xf32, #tpu.memory_space<vmem>>, vector<1x8x16xf32>
    %63 = vector.shape_cast %62 : vector<1x8x16xf32> to vector<8x16xf32>
    %64 = vector.shape_cast %61 : vector<8x16xf32> to vector<1x8x16xf32>
    tpu.vector_store %arg11[%c0_23, %c0_24, %c0_25], %64 {strides = array<i32>} : memref<8x8x16xf32, #tpu.memory_space<vmem>>, vector<1x8x16xf32>,
    %c1 = arith.constant 1 : index
    %c0_26 = arith.constant 0 : index
    %c0_27 = arith.constant 0 : index
    %65 = vector.load %arg11[%c1, %c0_26, %c0_27] : memref<8x8x16xf32, #tpu.memory_space<vmem>>, vector<1x8x16xf32>
    %66 = vector.shape_cast %65 : vector<1x8x16xf32> to vector<8x16xf32>
    %67 = vector.extract_strided_slice %66 {offsets = [0, 0], sizes = [7, 16], strides = [1, 1]} : vector<8x16xf32> to vector<7x16xf32>
    %68 = tpu.concatenate %9, %67 in 0 : vector<1x16xf32>, vector<7x16xf32> -> vector<8x16xf32>
    %69 = vector.extract_strided_slice %41 {offsets = [0, 0], sizes = [7, 16], strides = [1, 1]} : vector<8x16xf32> to vector<7x16xf32>
    %70 = tpu.concatenate %9, %69 in 0 : vector<1x16xf32>, vector<7x16xf32> -> vector<8x16xf32>
    %71 = vector.extract_strided_slice %41 {offsets = [1, 0], sizes = [7, 16], strides = [1, 1]} : vector<8x16xf32> to vector<7x16xf32>
    %72 = tpu.concatenate %71, %9 in 0 : vector<7x16xf32>, vector<1x16xf32> -> vector<8x16xf32>
    %73 = tpu.concatenate %68, %66, %70, %41, %72 in 1 : vector<8x16xf32>, vector<8x16xf32>, vector<8x16xf32>, vector<8x16xf32>, vector<8x16xf32> -> vector<8x80xf32>
    %cst_28 = arith.constant dense<0.000000e+00> : vector<8x64xf32>
    %74 = tpu.matmul %73, %11, %cst_28 {dimension_numbers = #tpu.dot_dimension_numbers<[1], [0], [0], [1], [0, 0, 1, 1], [], []>} : vector<8x80xf32>, vector<80x64xf32>, vector<8x64xf32> -> vector<8x64xf32>
    %75 = vector.broadcast %13 : vector<1x64xf32> to vector<8x64xf32>
    %76 = arith.addf %74, %75 : vector<8x64xf32>
    %77 = arith.negf %76 : vector<8x64xf32>
    %78 = math.exp %77 : vector<8x64xf32>
    %cst_29 = arith.constant 1.000000e+00 : f32
    %79 = vector.broadcast %cst_29 : f32 to vector<8x64xf32>
    %80 = arith.addf %79, %78 : vector<8x64xf32>
    %81 = arith.divf %79, %80 : vector<8x64xf32>
    %82 = vector.extract_strided_slice %81 {offsets = [0, 0], sizes = [8, 16], strides = [1, 1]} : vector<8x64xf32> to vector<8x16xf32>
    %83 = vector.extract_strided_slice %81 {offsets = [0, 16], sizes = [8, 16], strides = [1, 1]} : vector<8x64xf32> to vector<8x16xf32>
    %84 = vector.extract_strided_slice %81 {offsets = [0, 32], sizes = [8, 16], strides = [1, 1]} : vector<8x64xf32> to vector<8x16xf32>
    %85 = vector.extract_strided_slice %81 {offsets = [0, 48], sizes = [8, 16], strides = [1, 1]} : vector<8x64xf32> to vector<8x16xf32>
    %86 = arith.mulf %84, %39 : vector<8x16xf32>
    %87 = arith.mulf %82, %83 : vector<8x16xf32>
    %88 = arith.addf %86, %87 : vector<8x16xf32>
    %89 = math.tanh %88 : vector<8x16xf32>
    %90 = arith.mulf %85, %89 : vector<8x16xf32>
    %91 = tpu.transpose %90, [1, 0] : vector<8x16xf32> -> vector<16x8xf32>
    %92 = vector.extract_strided_slice %91 {offsets = [0, 0], sizes = [1, 8], strides = [1, 1]} : vector<16x8xf32> to vector<1x8xf32>
    %93 = vector.extract_strided_slice %91 {offsets = [2, 0], sizes = [1, 8], strides = [1, 1]} : vector<16x8xf32> to vector<1x8xf32>
    %94 = vector.extract_strided_slice %91 {offsets = [4, 0], sizes = [1, 8], strides = [1, 1]} : vector<16x8xf32> to vector<1x8xf32>
    %95 = vector.extract_strided_slice %91 {offsets = [6, 0], sizes = [1, 8], strides = [1, 1]} : vector<16x8xf32> to vector<1x8xf32>
    %96 = vector.extract_strided_slice %91 {offsets = [8, 0], sizes = [1, 8], strides = [1, 1]} : vector<16x8xf32> to vector<1x8xf32>
    %97 = vector.extract_strided_slice %91 {offsets = [10, 0], sizes = [1, 8], strides = [1, 1]} : vector<16x8xf32> to vector<1x8xf32>
    %98 = vector.extract_strided_slice %91 {offsets = [12, 0], sizes = [1, 8], strides = [1, 1]} : vector<16x8xf32> to vector<1x8xf32>
    %99 = vector.extract_strided_slice %91 {offsets = [14, 0], sizes = [1, 8], strides = [1, 1]} : vector<16x8xf32> to vector<1x8xf32>
    %100 = tpu.concatenate %92, %93, %94, %95, %96, %97, %98, %99 in 0 : vector<1x8xf32>, vector<1x8xf32>, vector<1x8xf32>, vector<1x8xf32>, vector<1x8xf32>, vector<1x8xf32>, vector<1x8xf32>, vector<1x8xf32> -> vector<8x8xf32>
    %101 = vector.extract_strided_slice %91 {offsets = [1, 0], sizes = [1, 8], strides = [1, 1]} : vector<16x8xf32> to vector<1x8xf32>
    %102 = vector.extract_strided_slice %91 {offsets = [3, 0], sizes = [1, 8], strides = [1, 1]} : vector<16x8xf32> to vector<1x8xf32>
    %103 = vector.extract_strided_slice %91 {offsets = [5, 0], sizes = [1, 8], strides = [1, 1]} : vector<16x8xf32> to vector<1x8xf32>
    %104 = vector.extract_strided_slice %91 {offsets = [7, 0], sizes = [1, 8], strides = [1, 1]} : vector<16x8xf32> to vector<1x8xf32>
    %105 = vector.extract_strided_slice %91 {offsets = [9, 0], sizes = [1, 8], strides = [1, 1]} : vector<16x8xf32> to vector<1x8xf32>
    %106 = vector.extract_strided_slice %91 {offsets = [11, 0], sizes = [1, 8], strides = [1, 1]} : vector<16x8xf32> to vector<1x8xf32>
    %107 = vector.extract_strided_slice %91 {offsets = [13, 0], sizes = [1, 8], strides = [1, 1]} : vector<16x8xf32> to vector<1x8xf32>
    %108 = vector.extract_strided_slice %91 {offsets = [15, 0], sizes = [1, 8], strides = [1, 1]} : vector<16x8xf32> to vector<1x8xf32>
    %109 = tpu.concatenate %101, %102, %103, %104, %105, %106, %107, %108 in 0 : vector<1x8xf32>, vector<1x8xf32>, vector<1x8xf32>, vector<1x8xf32>, vector<1x8xf32>, vector<1x8xf32>, vector<1x8xf32>, vector<1x8xf32> -> vector<8x8xf32>
    %110 = tpu.concatenate %100, %109 in 1 : vector<8x8xf32>, vector<8x8xf32> -> vector<8x16xf32>
    %c1_30 = arith.constant 1 : index
    %c0_31 = arith.constant 0 : index
    %c0_32 = arith.constant 0 : index
    %111 = vector.load %arg11[%c1_30, %c0_31, %c0_32] : memref<8x8x16xf32, #tpu.memory_space<vmem>>, vector<1x8x16xf32>
    %112 = vector.shape_cast %111 : vector<1x8x16xf32> to vector<8x16xf32>
    %113 = vector.shape_cast %110 : vector<8x16xf32> to vector<1x8x16xf32>
    tpu.vector_store %arg11[%c1_30, %c0_31, %c0_32], %113 {strides = array<i32>} : memref<8x8x16xf32, #tpu.memory_space<vmem>>, vector<1x8x16xf32>,
    %c2 = arith.constant 2 : index
    %c0_33 = arith.constant 0 : index
    %c0_34 = arith.constant 0 : index
    %114 = vector.load %arg11[%c2, %c0_33, %c0_34] : memref<8x8x16xf32, #tpu.memory_space<vmem>>, vector<1x8x16xf32>
    %115 = vector.shape_cast %114 : vector<1x8x16xf32> to vector<8x16xf32>
    %116 = vector.extract_strided_slice %115 {offsets = [0, 0], sizes = [7, 16], strides = [1, 1]} : vector<8x16xf32> to vector<7x16xf32>
    %117 = tpu.concatenate %9, %116 in 0 : vector<1x16xf32>, vector<7x16xf32> -> vector<8x16xf32>
    %118 = vector.extract_strided_slice %90 {offsets = [0, 0], sizes = [7, 16], strides = [1, 1]} : vector<8x16xf32> to vector<7x16xf32>
    %119 = tpu.concatenate %9, %118 in 0 : vector<1x16xf32>, vector<7x16xf32> -> vector<8x16xf32>
    %120 = vector.extract_strided_slice %90 {offsets = [1, 0], sizes = [7, 16], strides = [1, 1]} : vector<8x16xf32> to vector<7x16xf32>
    %121 = tpu.concatenate %120, %9 in 0 : vector<7x16xf32>, vector<1x16xf32> -> vector<8x16xf32>
    %122 = tpu.concatenate %117, %115, %119, %90, %121 in 1 : vector<8x16xf32>, vector<8x16xf32>, vector<8x16xf32>, vector<8x16xf32>, vector<8x16xf32> -> vector<8x80xf32>
    %cst_35 = arith.constant dense<0.000000e+00> : vector<8x64xf32>
    %123 = tpu.matmul %122, %11, %cst_35 {dimension_numbers = #tpu.dot_dimension_numbers<[1], [0], [0], [1], [0, 0, 1, 1], [], []>} : vector<8x80xf32>, vector<80x64xf32>, vector<8x64xf32> -> vector<8x64xf32>
    %124 = vector.broadcast %13 : vector<1x64xf32> to vector<8x64xf32>
    %125 = arith.addf %123, %124 : vector<8x64xf32>
    %126 = arith.negf %125 : vector<8x64xf32>
    %127 = math.exp %126 : vector<8x64xf32>
    %cst_36 = arith.constant 1.000000e+00 : f32
    %128 = vector.broadcast %cst_36 : f32 to vector<8x64xf32>
    %129 = arith.addf %128, %127 : vector<8x64xf32>
    %130 = arith.divf %128, %129 : vector<8x64xf32>
    %131 = vector.extract_strided_slice %130 {offsets = [0, 0], sizes = [8, 16], strides = [1, 1]} : vector<8x64xf32> to vector<8x16xf32>
    %132 = vector.extract_strided_slice %130 {offsets = [0, 16], sizes = [8, 16], strides = [1, 1]} : vector<8x64xf32> to vector<8x16xf32>
    %133 = vector.extract_strided_slice %130 {offsets = [0, 32], sizes = [8, 16], strides = [1, 1]} : vector<8x64xf32> to vector<8x16xf32>
    %134 = vector.extract_strided_slice %130 {offsets = [0, 48], sizes = [8, 16], strides = [1, 1]} : vector<8x64xf32> to vector<8x16xf32>
    %135 = arith.mulf %133, %88 : vector<8x16xf32>
    %136 = arith.mulf %131, %132 : vector<8x16xf32>
    %137 = arith.addf %135, %136 : vector<8x16xf32>
    %138 = math.tanh %137 : vector<8x16xf32>
    %139 = arith.mulf %134, %138 : vector<8x16xf32>
    %140 = tpu.transpose %139, [1, 0] : vector<8x16xf32> -> vector<16x8xf32>
    %141 = vector.extract_strided_slice %140 {offsets = [0, 0], sizes = [1, 8], strides = [1, 1]} : vector<16x8xf32> to vector<1x8xf32>
    %142 = vector.extract_strided_slice %140 {offsets = [2, 0], sizes = [1, 8], strides = [1, 1]} : vector<16x8xf32> to vector<1x8xf32>
    %143 = vector.extract_strided_slice %140 {offsets = [4, 0], sizes = [1, 8], strides = [1, 1]} : vector<16x8xf32> to vector<1x8xf32>
    %144 = vector.extract_strided_slice %140 {offsets = [6, 0], sizes = [1, 8], strides = [1, 1]} : vector<16x8xf32> to vector<1x8xf32>
    %145 = vector.extract_strided_slice %140 {offsets = [8, 0], sizes = [1, 8], strides = [1, 1]} : vector<16x8xf32> to vector<1x8xf32>
    %146 = vector.extract_strided_slice %140 {offsets = [10, 0], sizes = [1, 8], strides = [1, 1]} : vector<16x8xf32> to vector<1x8xf32>
    %147 = vector.extract_strided_slice %140 {offsets = [12, 0], sizes = [1, 8], strides = [1, 1]} : vector<16x8xf32> to vector<1x8xf32>
    %148 = vector.extract_strided_slice %140 {offsets = [14, 0], sizes = [1, 8], strides = [1, 1]} : vector<16x8xf32> to vector<1x8xf32>
    %149 = tpu.concatenate %141, %142, %143, %144, %145, %146, %147, %148 in 0 : vector<1x8xf32>, vector<1x8xf32>, vector<1x8xf32>, vector<1x8xf32>, vector<1x8xf32>, vector<1x8xf32>, vector<1x8xf32>, vector<1x8xf32> -> vector<8x8xf32>
    %150 = vector.extract_strided_slice %140 {offsets = [1, 0], sizes = [1, 8], strides = [1, 1]} : vector<16x8xf32> to vector<1x8xf32>
    %151 = vector.extract_strided_slice %140 {offsets = [3, 0], sizes = [1, 8], strides = [1, 1]} : vector<16x8xf32> to vector<1x8xf32>
    %152 = vector.extract_strided_slice %140 {offsets = [5, 0], sizes = [1, 8], strides = [1, 1]} : vector<16x8xf32> to vector<1x8xf32>
    %153 = vector.extract_strided_slice %140 {offsets = [7, 0], sizes = [1, 8], strides = [1, 1]} : vector<16x8xf32> to vector<1x8xf32>
    %154 = vector.extract_strided_slice %140 {offsets = [9, 0], sizes = [1, 8], strides = [1, 1]} : vector<16x8xf32> to vector<1x8xf32>
    %155 = vector.extract_strided_slice %140 {offsets = [11, 0], sizes = [1, 8], strides = [1, 1]} : vector<16x8xf32> to vector<1x8xf32>
    %156 = vector.extract_strided_slice %140 {offsets = [13, 0], sizes = [1, 8], strides = [1, 1]} : vector<16x8xf32> to vector<1x8xf32>
    %157 = vector.extract_strided_slice %140 {offsets = [15, 0], sizes = [1, 8], strides = [1, 1]} : vector<16x8xf32> to vector<1x8xf32>
    %158 = tpu.concatenate %150, %151, %152, %153, %154, %155, %156, %157 in 0 : vector<1x8xf32>, vector<1x8xf32>, vector<1x8xf32>, vector<1x8xf32>, vector<1x8xf32>, vector<1x8xf32>, vector<1x8xf32>, vector<1x8xf32> -> vector<8x8xf32>
    %159 = tpu.concatenate %149, %158 in 1 : vector<8x8xf32>, vector<8x8xf32> -> vector<8x16xf32>
    %c2_37 = arith.constant 2 : index
    %c0_38 = arith.constant 0 : index
    %c0_39 = arith.constant 0 : index
    %160 = vector.load %arg11[%c2_37, %c0_38, %c0_39] : memref<8x8x16xf32, #tpu.memory_space<vmem>>, vector<1x8x16xf32>
    %161 = vector.shape_cast %160 : vector<1x8x16xf32> to vector<8x16xf32>
    %162 = vector.shape_cast %159 : vector<8x16xf32> to vector<1x8x16xf32>
    tpu.vector_store %arg11[%c2_37, %c0_38, %c0_39], %162 {strides = array<i32>} : memref<8x8x16xf32, #tpu.memory_space<vmem>>, vector<1x8x16xf32>,
    %c3 = arith.constant 3 : index
    %c0_40 = arith.constant 0 : index
    %c0_41 = arith.constant 0 : index
    %163 = vector.load %arg11[%c3, %c0_40, %c0_41] : memref<8x8x16xf32, #tpu.memory_space<vmem>>, vector<1x8x16xf32>
    %164 = vector.shape_cast %163 : vector<1x8x16xf32> to vector<8x16xf32>
    %165 = vector.extract_strided_slice %164 {offsets = [0, 0], sizes = [7, 16], strides = [1, 1]} : vector<8x16xf32> to vector<7x16xf32>
    %166 = tpu.concatenate %9, %165 in 0 : vector<1x16xf32>, vector<7x16xf32> -> vector<8x16xf32>
    %167 = vector.extract_strided_slice %139 {offsets = [0, 0], sizes = [7, 16], strides = [1, 1]} : vector<8x16xf32> to vector<7x16xf32>
    %168 = tpu.concatenate %9, %167 in 0 : vector<1x16xf32>, vector<7x16xf32> -> vector<8x16xf32>
    %169 = vector.extract_strided_slice %139 {offsets = [1, 0], sizes = [7, 16], strides = [1, 1]} : vector<8x16xf32> to vector<7x16xf32>
    %170 = tpu.concatenate %169, %9 in 0 : vector<7x16xf32>, vector<1x16xf32> -> vector<8x16xf32>
    %171 = tpu.concatenate %166, %164, %168, %139, %170 in 1 : vector<8x16xf32>, vector<8x16xf32>, vector<8x16xf32>, vector<8x16xf32>, vector<8x16xf32> -> vector<8x80xf32>
    %cst_42 = arith.constant dense<0.000000e+00> : vector<8x64xf32>
    %172 = tpu.matmul %171, %11, %cst_42 {dimension_numbers = #tpu.dot_dimension_numbers<[1], [0], [0], [1], [0, 0, 1, 1], [], []>} : vector<8x80xf32>, vector<80x64xf32>, vector<8x64xf32> -> vector<8x64xf32>
    %173 = vector.broadcast %13 : vector<1x64xf32> to vector<8x64xf32>
    %174 = arith.addf %172, %173 : vector<8x64xf32>
    %175 = arith.negf %174 : vector<8x64xf32>
    %176 = math.exp %175 : vector<8x64xf32>
    %cst_43 = arith.constant 1.000000e+00 : f32
    %177 = vector.broadcast %cst_43 : f32 to vector<8x64xf32>
    %178 = arith.addf %177, %176 : vector<8x64xf32>
    %179 = arith.divf %177, %178 : vector<8x64xf32>
    %180 = vector.extract_strided_slice %179 {offsets = [0, 0], sizes = [8, 16], strides = [1, 1]} : vector<8x64xf32> to vector<8x16xf32>
    %181 = vector.extract_strided_slice %179 {offsets = [0, 16], sizes = [8, 16], strides = [1, 1]} : vector<8x64xf32> to vector<8x16xf32>
    %182 = vector.extract_strided_slice %179 {offsets = [0, 32], sizes = [8, 16], strides = [1, 1]} : vector<8x64xf32> to vector<8x16xf32>
    %183 = vector.extract_strided_slice %179 {offsets = [0, 48], sizes = [8, 16], strides = [1, 1]} : vector<8x64xf32> to vector<8x16xf32>
    %184 = arith.mulf %182, %137 : vector<8x16xf32>
    %185 = arith.mulf %180, %181 : vector<8x16xf32>
    %186 = arith.addf %184, %185 : vector<8x16xf32>
    %187 = math.tanh %186 : vector<8x16xf32>
    %188 = arith.mulf %183, %187 : vector<8x16xf32>
    %189 = tpu.transpose %188, [1, 0] : vector<8x16xf32> -> vector<16x8xf32>
    %190 = vector.extract_strided_slice %189 {offsets = [0, 0], sizes = [1, 8], strides = [1, 1]} : vector<16x8xf32> to vector<1x8xf32>
    %191 = vector.extract_strided_slice %189 {offsets = [2, 0], sizes = [1, 8], strides = [1, 1]} : vector<16x8xf32> to vector<1x8xf32>
    %192 = vector.extract_strided_slice %189 {offsets = [4, 0], sizes = [1, 8], strides = [1, 1]} : vector<16x8xf32> to vector<1x8xf32>
    %193 = vector.extract_strided_slice %189 {offsets = [6, 0], sizes = [1, 8], strides = [1, 1]} : vector<16x8xf32> to vector<1x8xf32>
    %194 = vector.extract_strided_slice %189 {offsets = [8, 0], sizes = [1, 8], strides = [1, 1]} : vector<16x8xf32> to vector<1x8xf32>
    %195 = vector.extract_strided_slice %189 {offsets = [10, 0], sizes = [1, 8], strides = [1, 1]} : vector<16x8xf32> to vector<1x8xf32>
    %196 = vector.extract_strided_slice %189 {offsets = [12, 0], sizes = [1, 8], strides = [1, 1]} : vector<16x8xf32> to vector<1x8xf32>
    %197 = vector.extract_strided_slice %189 {offsets = [14, 0], sizes = [1, 8], strides = [1, 1]} : vector<16x8xf32> to vector<1x8xf32>
    %198 = tpu.concatenate %190, %191, %192, %193, %194, %195, %196, %197 in 0 : vector<1x8xf32>, vector<1x8xf32>, vector<1x8xf32>, vector<1x8xf32>, vector<1x8xf32>, vector<1x8xf32>, vector<1x8xf32>, vector<1x8xf32> -> vector<8x8xf32>
    %199 = vector.extract_strided_slice %189 {offsets = [1, 0], sizes = [1, 8], strides = [1, 1]} : vector<16x8xf32> to vector<1x8xf32>
    %200 = vector.extract_strided_slice %189 {offsets = [3, 0], sizes = [1, 8], strides = [1, 1]} : vector<16x8xf32> to vector<1x8xf32>
    %201 = vector.extract_strided_slice %189 {offsets = [5, 0], sizes = [1, 8], strides = [1, 1]} : vector<16x8xf32> to vector<1x8xf32>
    %202 = vector.extract_strided_slice %189 {offsets = [7, 0], sizes = [1, 8], strides = [1, 1]} : vector<16x8xf32> to vector<1x8xf32>
    %203 = vector.extract_strided_slice %189 {offsets = [9, 0], sizes = [1, 8], strides = [1, 1]} : vector<16x8xf32> to vector<1x8xf32>
    %204 = vector.extract_strided_slice %189 {offsets = [11, 0], sizes = [1, 8], strides = [1, 1]} : vector<16x8xf32> to vector<1x8xf32>
    %205 = vector.extract_strided_slice %189 {offsets = [13, 0], sizes = [1, 8], strides = [1, 1]} : vector<16x8xf32> to vector<1x8xf32>
    %206 = vector.extract_strided_slice %189 {offsets = [15, 0], sizes = [1, 8], strides = [1, 1]} : vector<16x8xf32> to vector<1x8xf32>
    %207 = tpu.concatenate %199, %200, %201, %202, %203, %204, %205, %206 in 0 : vector<1x8xf32>, vector<1x8xf32>, vector<1x8xf32>, vector<1x8xf32>, vector<1x8xf32>, vector<1x8xf32>, vector<1x8xf32>, vector<1x8xf32> -> vector<8x8xf32>
    %208 = tpu.concatenate %198, %207 in 1 : vector<8x8xf32>, vector<8x8xf32> -> vector<8x16xf32>
    %c3_44 = arith.constant 3 : index
    %c0_45 = arith.constant 0 : index
    %c0_46 = arith.constant 0 : index
    %209 = vector.load %arg11[%c3_44, %c0_45, %c0_46] : memref<8x8x16xf32, #tpu.memory_space<vmem>>, vector<1x8x16xf32>
    %210 = vector.shape_cast %209 : vector<1x8x16xf32> to vector<8x16xf32>
    %211 = vector.shape_cast %208 : vector<8x16xf32> to vector<1x8x16xf32>
    tpu.vector_store %arg11[%c3_44, %c0_45, %c0_46], %211 {strides = array<i32>} : memref<8x8x16xf32, #tpu.memory_space<vmem>>, vector<1x8x16xf32>,
    %c4 = arith.constant 4 : index
    %c0_47 = arith.constant 0 : index
    %c0_48 = arith.constant 0 : index
    %212 = vector.load %arg11[%c4, %c0_47, %c0_48] : memref<8x8x16xf32, #tpu.memory_space<vmem>>, vector<1x8x16xf32>
    %213 = vector.shape_cast %212 : vector<1x8x16xf32> to vector<8x16xf32>
    %214 = vector.extract_strided_slice %213 {offsets = [0, 0], sizes = [7, 16], strides = [1, 1]} : vector<8x16xf32> to vector<7x16xf32>
    %215 = tpu.concatenate %9, %214 in 0 : vector<1x16xf32>, vector<7x16xf32> -> vector<8x16xf32>
    %216 = vector.extract_strided_slice %188 {offsets = [0, 0], sizes = [7, 16], strides = [1, 1]} : vector<8x16xf32> to vector<7x16xf32>
    %217 = tpu.concatenate %9, %216 in 0 : vector<1x16xf32>, vector<7x16xf32> -> vector<8x16xf32>
    %218 = vector.extract_strided_slice %188 {offsets = [1, 0], sizes = [7, 16], strides = [1, 1]} : vector<8x16xf32> to vector<7x16xf32>
    %219 = tpu.concatenate %218, %9 in 0 : vector<7x16xf32>, vector<1x16xf32> -> vector<8x16xf32>
    %220 = tpu.concatenate %215, %213, %217, %188, %219 in 1 : vector<8x16xf32>, vector<8x16xf32>, vector<8x16xf32>, vector<8x16xf32>, vector<8x16xf32> -> vector<8x80xf32>
    %cst_49 = arith.constant dense<0.000000e+00> : vector<8x64xf32>
    %221 = tpu.matmul %220, %11, %cst_49 {dimension_numbers = #tpu.dot_dimension_numbers<[1], [0], [0], [1], [0, 0, 1, 1], [], []>} : vector<8x80xf32>, vector<80x64xf32>, vector<8x64xf32> -> vector<8x64xf32>
    %222 = vector.broadcast %13 : vector<1x64xf32> to vector<8x64xf32>
    %223 = arith.addf %221, %222 : vector<8x64xf32>
    %224 = arith.negf %223 : vector<8x64xf32>
    %225 = math.exp %224 : vector<8x64xf32>
    %cst_50 = arith.constant 1.000000e+00 : f32
    %226 = vector.broadcast %cst_50 : f32 to vector<8x64xf32>
    %227 = arith.addf %226, %225 : vector<8x64xf32>
    %228 = arith.divf %226, %227 : vector<8x64xf32>
    %229 = vector.extract_strided_slice %228 {offsets = [0, 0], sizes = [8, 16], strides = [1, 1]} : vector<8x64xf32> to vector<8x16xf32>
    %230 = vector.extract_strided_slice %228 {offsets = [0, 16], sizes = [8, 16], strides = [1, 1]} : vector<8x64xf32> to vector<8x16xf32>
    %231 = vector.extract_strided_slice %228 {offsets = [0, 32], sizes = [8, 16], strides = [1, 1]} : vector<8x64xf32> to vector<8x16xf32>
    %232 = vector.extract_strided_slice %228 {offsets = [0, 48], sizes = [8, 16], strides = [1, 1]} : vector<8x64xf32> to vector<8x16xf32>
    %233 = arith.mulf %231, %186 : vector<8x16xf32>
    %234 = arith.mulf %229, %230 : vector<8x16xf32>
    %235 = arith.addf %233, %234 : vector<8x16xf32>
    %236 = math.tanh %235 : vector<8x16xf32>
    %237 = arith.mulf %232, %236 : vector<8x16xf32>
    %238 = tpu.transpose %237, [1, 0] : vector<8x16xf32> -> vector<16x8xf32>
    %239 = vector.extract_strided_slice %238 {offsets = [0, 0], sizes = [1, 8], strides = [1, 1]} : vector<16x8xf32> to vector<1x8xf32>
    %240 = vector.extract_strided_slice %238 {offsets = [2, 0], sizes = [1, 8], strides = [1, 1]} : vector<16x8xf32> to vector<1x8xf32>
    %241 = vector.extract_strided_slice %238 {offsets = [4, 0], sizes = [1, 8], strides = [1, 1]} : vector<16x8xf32> to vector<1x8xf32>
    %242 = vector.extract_strided_slice %238 {offsets = [6, 0], sizes = [1, 8], strides = [1, 1]} : vector<16x8xf32> to vector<1x8xf32>
    %243 = vector.extract_strided_slice %238 {offsets = [8, 0], sizes = [1, 8], strides = [1, 1]} : vector<16x8xf32> to vector<1x8xf32>
    %244 = vector.extract_strided_slice %238 {offsets = [10, 0], sizes = [1, 8], strides = [1, 1]} : vector<16x8xf32> to vector<1x8xf32>
    %245 = vector.extract_strided_slice %238 {offsets = [12, 0], sizes = [1, 8], strides = [1, 1]} : vector<16x8xf32> to vector<1x8xf32>
    %246 = vector.extract_strided_slice %238 {offsets = [14, 0], sizes = [1, 8], strides = [1, 1]} : vector<16x8xf32> to vector<1x8xf32>
    %247 = tpu.concatenate %239, %240, %241, %242, %243, %244, %245, %246 in 0 : vector<1x8xf32>, vector<1x8xf32>, vector<1x8xf32>, vector<1x8xf32>, vector<1x8xf32>, vector<1x8xf32>, vector<1x8xf32>, vector<1x8xf32> -> vector<8x8xf32>
    %248 = vector.extract_strided_slice %238 {offsets = [1, 0], sizes = [1, 8], strides = [1, 1]} : vector<16x8xf32> to vector<1x8xf32>
    %249 = vector.extract_strided_slice %238 {offsets = [3, 0], sizes = [1, 8], strides = [1, 1]} : vector<16x8xf32> to vector<1x8xf32>
    %250 = vector.extract_strided_slice %238 {offsets = [5, 0], sizes = [1, 8], strides = [1, 1]} : vector<16x8xf32> to vector<1x8xf32>
    %251 = vector.extract_strided_slice %238 {offsets = [7, 0], sizes = [1, 8], strides = [1, 1]} : vector<16x8xf32> to vector<1x8xf32>
    %252 = vector.extract_strided_slice %238 {offsets = [9, 0], sizes = [1, 8], strides = [1, 1]} : vector<16x8xf32> to vector<1x8xf32>
    %253 = vector.extract_strided_slice %238 {offsets = [11, 0], sizes = [1, 8], strides = [1, 1]} : vector<16x8xf32> to vector<1x8xf32>
    %254 = vector.extract_strided_slice %238 {offsets = [13, 0], sizes = [1, 8], strides = [1, 1]} : vector<16x8xf32> to vector<1x8xf32>
    %255 = vector.extract_strided_slice %238 {offsets = [15, 0], sizes = [1, 8], strides = [1, 1]} : vector<16x8xf32> to vector<1x8xf32>
    %256 = tpu.concatenate %248, %249, %250, %251, %252, %253, %254, %255 in 0 : vector<1x8xf32>, vector<1x8xf32>, vector<1x8xf32>, vector<1x8xf32>, vector<1x8xf32>, vector<1x8xf32>, vector<1x8xf32>, vector<1x8xf32> -> vector<8x8xf32>
    %257 = tpu.concatenate %247, %256 in 1 : vector<8x8xf32>, vector<8x8xf32> -> vector<8x16xf32>
    %c4_51 = arith.constant 4 : index
    %c0_52 = arith.constant 0 : index
    %c0_53 = arith.constant 0 : index
    %258 = vector.load %arg11[%c4_51, %c0_52, %c0_53] : memref<8x8x16xf32, #tpu.memory_space<vmem>>, vector<1x8x16xf32>
    %259 = vector.shape_cast %258 : vector<1x8x16xf32> to vector<8x16xf32>
    %260 = vector.shape_cast %257 : vector<8x16xf32> to vector<1x8x16xf32>
    tpu.vector_store %arg11[%c4_51, %c0_52, %c0_53], %260 {strides = array<i32>} : memref<8x8x16xf32, #tpu.memory_space<vmem>>, vector<1x8x16xf32>,
    %c5 = arith.constant 5 : index
    %c0_54 = arith.constant 0 : index
    %c0_55 = arith.constant 0 : index
    %261 = vector.load %arg11[%c5, %c0_54, %c0_55] : memref<8x8x16xf32, #tpu.memory_space<vmem>>, vector<1x8x16xf32>
    %262 = vector.shape_cast %261 : vector<1x8x16xf32> to vector<8x16xf32>
    %263 = vector.extract_strided_slice %262 {offsets = [0, 0], sizes = [7, 16], strides = [1, 1]} : vector<8x16xf32> to vector<7x16xf32>
    %264 = tpu.concatenate %9, %263 in 0 : vector<1x16xf32>, vector<7x16xf32> -> vector<8x16xf32>
    %265 = vector.extract_strided_slice %237 {offsets = [0, 0], sizes = [7, 16], strides = [1, 1]} : vector<8x16xf32> to vector<7x16xf32>
    %266 = tpu.concatenate %9, %265 in 0 : vector<1x16xf32>, vector<7x16xf32> -> vector<8x16xf32>
    %267 = vector.extract_strided_slice %237 {offsets = [1, 0], sizes = [7, 16], strides = [1, 1]} : vector<8x16xf32> to vector<7x16xf32>
    %268 = tpu.concatenate %267, %9 in 0 : vector<7x16xf32>, vector<1x16xf32> -> vector<8x16xf32>
    %269 = tpu.concatenate %264, %262, %266, %237, %268 in 1 : vector<8x16xf32>, vector<8x16xf32>, vector<8x16xf32>, vector<8x16xf32>, vector<8x16xf32> -> vector<8x80xf32>
    %cst_56 = arith.constant dense<0.000000e+00> : vector<8x64xf32>
    %270 = tpu.matmul %269, %11, %cst_56 {dimension_numbers = #tpu.dot_dimension_numbers<[1], [0], [0], [1], [0, 0, 1, 1], [], []>} : vector<8x80xf32>, vector<80x64xf32>, vector<8x64xf32> -> vector<8x64xf32>
    %271 = vector.broadcast %13 : vector<1x64xf32> to vector<8x64xf32>
    %272 = arith.addf %270, %271 : vector<8x64xf32>
    %273 = arith.negf %272 : vector<8x64xf32>
    %274 = math.exp %273 : vector<8x64xf32>
    %cst_57 = arith.constant 1.000000e+00 : f32
    %275 = vector.broadcast %cst_57 : f32 to vector<8x64xf32>
    %276 = arith.addf %275, %274 : vector<8x64xf32>
    %277 = arith.divf %275, %276 : vector<8x64xf32>
    %278 = vector.extract_strided_slice %277 {offsets = [0, 0], sizes = [8, 16], strides = [1, 1]} : vector<8x64xf32> to vector<8x16xf32>
    %279 = vector.extract_strided_slice %277 {offsets = [0, 16], sizes = [8, 16], strides = [1, 1]} : vector<8x64xf32> to vector<8x16xf32>
    %280 = vector.extract_strided_slice %277 {offsets = [0, 32], sizes = [8, 16], strides = [1, 1]} : vector<8x64xf32> to vector<8x16xf32>
    %281 = vector.extract_strided_slice %277 {offsets = [0, 48], sizes = [8, 16], strides = [1, 1]} : vector<8x64xf32> to vector<8x16xf32>
    %282 = arith.mulf %280, %235 : vector<8x16xf32>
    %283 = arith.mulf %278, %279 : vector<8x16xf32>
    %284 = arith.addf %282, %283 : vector<8x16xf32>
    %285 = math.tanh %284 : vector<8x16xf32>
    %286 = arith.mulf %281, %285 : vector<8x16xf32>
    %287 = tpu.transpose %286, [1, 0] : vector<8x16xf32> -> vector<16x8xf32>
    %288 = vector.extract_strided_slice %287 {offsets = [0, 0], sizes = [1, 8], strides = [1, 1]} : vector<16x8xf32> to vector<1x8xf32>
    %289 = vector.extract_strided_slice %287 {offsets = [2, 0], sizes = [1, 8], strides = [1, 1]} : vector<16x8xf32> to vector<1x8xf32>
    %290 = vector.extract_strided_slice %287 {offsets = [4, 0], sizes = [1, 8], strides = [1, 1]} : vector<16x8xf32> to vector<1x8xf32>
    %291 = vector.extract_strided_slice %287 {offsets = [6, 0], sizes = [1, 8], strides = [1, 1]} : vector<16x8xf32> to vector<1x8xf32>
    %292 = vector.extract_strided_slice %287 {offsets = [8, 0], sizes = [1, 8], strides = [1, 1]} : vector<16x8xf32> to vector<1x8xf32>
    %293 = vector.extract_strided_slice %287 {offsets = [10, 0], sizes = [1, 8], strides = [1, 1]} : vector<16x8xf32> to vector<1x8xf32>
    %294 = vector.extract_strided_slice %287 {offsets = [12, 0], sizes = [1, 8], strides = [1, 1]} : vector<16x8xf32> to vector<1x8xf32>
    %295 = vector.extract_strided_slice %287 {offsets = [14, 0], sizes = [1, 8], strides = [1, 1]} : vector<16x8xf32> to vector<1x8xf32>
    %296 = tpu.concatenate %288, %289, %290, %291, %292, %293, %294, %295 in 0 : vector<1x8xf32>, vector<1x8xf32>, vector<1x8xf32>, vector<1x8xf32>, vector<1x8xf32>, vector<1x8xf32>, vector<1x8xf32>, vector<1x8xf32> -> vector<8x8xf32>
    %297 = vector.extract_strided_slice %287 {offsets = [1, 0], sizes = [1, 8], strides = [1, 1]} : vector<16x8xf32> to vector<1x8xf32>
    %298 = vector.extract_strided_slice %287 {offsets = [3, 0], sizes = [1, 8], strides = [1, 1]} : vector<16x8xf32> to vector<1x8xf32>
    %299 = vector.extract_strided_slice %287 {offsets = [5, 0], sizes = [1, 8], strides = [1, 1]} : vector<16x8xf32> to vector<1x8xf32>
    %300 = vector.extract_strided_slice %287 {offsets = [7, 0], sizes = [1, 8], strides = [1, 1]} : vector<16x8xf32> to vector<1x8xf32>
    %301 = vector.extract_strided_slice %287 {offsets = [9, 0], sizes = [1, 8], strides = [1, 1]} : vector<16x8xf32> to vector<1x8xf32>
    %302 = vector.extract_strided_slice %287 {offsets = [11, 0], sizes = [1, 8], strides = [1, 1]} : vector<16x8xf32> to vector<1x8xf32>
    %303 = vector.extract_strided_slice %287 {offsets = [13, 0], sizes = [1, 8], strides = [1, 1]} : vector<16x8xf32> to vector<1x8xf32>
    %304 = vector.extract_strided_slice %287 {offsets = [15, 0], sizes = [1, 8], strides = [1, 1]} : vector<16x8xf32> to vector<1x8xf32>
    %305 = tpu.concatenate %297, %298, %299, %300, %301, %302, %303, %304 in 0 : vector<1x8xf32>, vector<1x8xf32>, vector<1x8xf32>, vector<1x8xf32>, vector<1x8xf32>, vector<1x8xf32>, vector<1x8xf32>, vector<1x8xf32> -> vector<8x8xf32>
    %306 = tpu.concatenate %296, %305 in 1 : vector<8x8xf32>, vector<8x8xf32> -> vector<8x16xf32>
    %c5_58 = arith.constant 5 : index
    %c0_59 = arith.constant 0 : index
    %c0_60 = arith.constant 0 : index
    %307 = vector.load %arg11[%c5_58, %c0_59, %c0_60] : memref<8x8x16xf32, #tpu.memory_space<vmem>>, vector<1x8x16xf32>
    %308 = vector.shape_cast %307 : vector<1x8x16xf32> to vector<8x16xf32>
    %309 = vector.shape_cast %306 : vector<8x16xf32> to vector<1x8x16xf32>
    tpu.vector_store %arg11[%c5_58, %c0_59, %c0_60], %309 {strides = array<i32>} : memref<8x8x16xf32, #tpu.memory_space<vmem>>, vector<1x8x16xf32>,
    %c6 = arith.constant 6 : index
    %c0_61 = arith.constant 0 : index
    %c0_62 = arith.constant 0 : index
    %310 = vector.load %arg11[%c6, %c0_61, %c0_62] : memref<8x8x16xf32, #tpu.memory_space<vmem>>, vector<1x8x16xf32>
    %311 = vector.shape_cast %310 : vector<1x8x16xf32> to vector<8x16xf32>
    %312 = vector.extract_strided_slice %311 {offsets = [0, 0], sizes = [7, 16], strides = [1, 1]} : vector<8x16xf32> to vector<7x16xf32>
    %313 = tpu.concatenate %9, %312 in 0 : vector<1x16xf32>, vector<7x16xf32> -> vector<8x16xf32>
    %314 = vector.extract_strided_slice %286 {offsets = [0, 0], sizes = [7, 16], strides = [1, 1]} : vector<8x16xf32> to vector<7x16xf32>
    %315 = tpu.concatenate %9, %314 in 0 : vector<1x16xf32>, vector<7x16xf32> -> vector<8x16xf32>
    %316 = vector.extract_strided_slice %286 {offsets = [1, 0], sizes = [7, 16], strides = [1, 1]} : vector<8x16xf32> to vector<7x16xf32>
    %317 = tpu.concatenate %316, %9 in 0 : vector<7x16xf32>, vector<1x16xf32> -> vector<8x16xf32>
    %318 = tpu.concatenate %313, %311, %315, %286, %317 in 1 : vector<8x16xf32>, vector<8x16xf32>, vector<8x16xf32>, vector<8x16xf32>, vector<8x16xf32> -> vector<8x80xf32>
    %cst_63 = arith.constant dense<0.000000e+00> : vector<8x64xf32>
    %319 = tpu.matmul %318, %11, %cst_63 {dimension_numbers = #tpu.dot_dimension_numbers<[1], [0], [0], [1], [0, 0, 1, 1], [], []>} : vector<8x80xf32>, vector<80x64xf32>, vector<8x64xf32> -> vector<8x64xf32>
    %320 = vector.broadcast %13 : vector<1x64xf32> to vector<8x64xf32>
    %321 = arith.addf %319, %320 : vector<8x64xf32>
    %322 = arith.negf %321 : vector<8x64xf32>
    %323 = math.exp %322 : vector<8x64xf32>
    %cst_64 = arith.constant 1.000000e+00 : f32
    %324 = vector.broadcast %cst_64 : f32 to vector<8x64xf32>
    %325 = arith.addf %324, %323 : vector<8x64xf32>
    %326 = arith.divf %324, %325 : vector<8x64xf32>
    %327 = vector.extract_strided_slice %326 {offsets = [0, 0], sizes = [8, 16], strides = [1, 1]} : vector<8x64xf32> to vector<8x16xf32>
    %328 = vector.extract_strided_slice %326 {offsets = [0, 16], sizes = [8, 16], strides = [1, 1]} : vector<8x64xf32> to vector<8x16xf32>
    %329 = vector.extract_strided_slice %326 {offsets = [0, 32], sizes = [8, 16], strides = [1, 1]} : vector<8x64xf32> to vector<8x16xf32>
    %330 = vector.extract_strided_slice %326 {offsets = [0, 48], sizes = [8, 16], strides = [1, 1]} : vector<8x64xf32> to vector<8x16xf32>
    %331 = arith.mulf %329, %284 : vector<8x16xf32>
    %332 = arith.mulf %327, %328 : vector<8x16xf32>
    %333 = arith.addf %331, %332 : vector<8x16xf32>
    %334 = math.tanh %333 : vector<8x16xf32>
    %335 = arith.mulf %330, %334 : vector<8x16xf32>
    %336 = tpu.transpose %335, [1, 0] : vector<8x16xf32> -> vector<16x8xf32>
    %337 = vector.extract_strided_slice %336 {offsets = [0, 0], sizes = [1, 8], strides = [1, 1]} : vector<16x8xf32> to vector<1x8xf32>
    %338 = vector.extract_strided_slice %336 {offsets = [2, 0], sizes = [1, 8], strides = [1, 1]} : vector<16x8xf32> to vector<1x8xf32>
    %339 = vector.extract_strided_slice %336 {offsets = [4, 0], sizes = [1, 8], strides = [1, 1]} : vector<16x8xf32> to vector<1x8xf32>
    %340 = vector.extract_strided_slice %336 {offsets = [6, 0], sizes = [1, 8], strides = [1, 1]} : vector<16x8xf32> to vector<1x8xf32>
    %341 = vector.extract_strided_slice %336 {offsets = [8, 0], sizes = [1, 8], strides = [1, 1]} : vector<16x8xf32> to vector<1x8xf32>
    %342 = vector.extract_strided_slice %336 {offsets = [10, 0], sizes = [1, 8], strides = [1, 1]} : vector<16x8xf32> to vector<1x8xf32>
    %343 = vector.extract_strided_slice %336 {offsets = [12, 0], sizes = [1, 8], strides = [1, 1]} : vector<16x8xf32> to vector<1x8xf32>
    %344 = vector.extract_strided_slice %336 {offsets = [14, 0], sizes = [1, 8], strides = [1, 1]} : vector<16x8xf32> to vector<1x8xf32>
    %345 = tpu.concatenate %337, %338, %339, %340, %341, %342, %343, %344 in 0 : vector<1x8xf32>, vector<1x8xf32>, vector<1x8xf32>, vector<1x8xf32>, vector<1x8xf32>, vector<1x8xf32>, vector<1x8xf32>, vector<1x8xf32> -> vector<8x8xf32>
    %346 = vector.extract_strided_slice %336 {offsets = [1, 0], sizes = [1, 8], strides = [1, 1]} : vector<16x8xf32> to vector<1x8xf32>
    %347 = vector.extract_strided_slice %336 {offsets = [3, 0], sizes = [1, 8], strides = [1, 1]} : vector<16x8xf32> to vector<1x8xf32>
    %348 = vector.extract_strided_slice %336 {offsets = [5, 0], sizes = [1, 8], strides = [1, 1]} : vector<16x8xf32> to vector<1x8xf32>
    %349 = vector.extract_strided_slice %336 {offsets = [7, 0], sizes = [1, 8], strides = [1, 1]} : vector<16x8xf32> to vector<1x8xf32>
    %350 = vector.extract_strided_slice %336 {offsets = [9, 0], sizes = [1, 8], strides = [1, 1]} : vector<16x8xf32> to vector<1x8xf32>
    %351 = vector.extract_strided_slice %336 {offsets = [11, 0], sizes = [1, 8], strides = [1, 1]} : vector<16x8xf32> to vector<1x8xf32>
    %352 = vector.extract_strided_slice %336 {offsets = [13, 0], sizes = [1, 8], strides = [1, 1]} : vector<16x8xf32> to vector<1x8xf32>
    %353 = vector.extract_strided_slice %336 {offsets = [15, 0], sizes = [1, 8], strides = [1, 1]} : vector<16x8xf32> to vector<1x8xf32>
    %354 = tpu.concatenate %346, %347, %348, %349, %350, %351, %352, %353 in 0 : vector<1x8xf32>, vector<1x8xf32>, vector<1x8xf32>, vector<1x8xf32>, vector<1x8xf32>, vector<1x8xf32>, vector<1x8xf32>, vector<1x8xf32> -> vector<8x8xf32>
    %355 = tpu.concatenate %345, %354 in 1 : vector<8x8xf32>, vector<8x8xf32> -> vector<8x16xf32>
    %c6_65 = arith.constant 6 : index
    %c0_66 = arith.constant 0 : index
    %c0_67 = arith.constant 0 : index
    %356 = vector.load %arg11[%c6_65, %c0_66, %c0_67] : memref<8x8x16xf32, #tpu.memory_space<vmem>>, vector<1x8x16xf32>
    %357 = vector.shape_cast %356 : vector<1x8x16xf32> to vector<8x16xf32>
    %358 = vector.shape_cast %355 : vector<8x16xf32> to vector<1x8x16xf32>
    tpu.vector_store %arg11[%c6_65, %c0_66, %c0_67], %358 {strides = array<i32>} : memref<8x8x16xf32, #tpu.memory_space<vmem>>, vector<1x8x16xf32>,
    %c7 = arith.constant 7 : index
    %c0_68 = arith.constant 0 : index
    %c0_69 = arith.constant 0 : index
    %359 = vector.load %arg11[%c7, %c0_68, %c0_69] : memref<8x8x16xf32, #tpu.memory_space<vmem>>, vector<1x8x16xf32>
    %360 = vector.shape_cast %359 : vector<1x8x16xf32> to vector<8x16xf32>
    %361 = vector.extract_strided_slice %360 {offsets = [0, 0], sizes = [7, 16], strides = [1, 1]} : vector<8x16xf32> to vector<7x16xf32>
    %362 = tpu.concatenate %9, %361 in 0 : vector<1x16xf32>, vector<7x16xf32> -> vector<8x16xf32>
    %363 = vector.extract_strided_slice %335 {offsets = [0, 0], sizes = [7, 16], strides = [1, 1]} : vector<8x16xf32> to vector<7x16xf32>
    %364 = tpu.concatenate %9, %363 in 0 : vector<1x16xf32>, vector<7x16xf32> -> vector<8x16xf32>
    %365 = vector.extract_strided_slice %335 {offsets = [1, 0], sizes = [7, 16], strides = [1, 1]} : vector<8x16xf32> to vector<7x16xf32>
    %366 = tpu.concatenate %365, %9 in 0 : vector<7x16xf32>, vector<1x16xf32> -> vector<8x16xf32>
    %367 = tpu.concatenate %362, %360, %364, %335, %366 in 1 : vector<8x16xf32>, vector<8x16xf32>, vector<8x16xf32>, vector<8x16xf32>, vector<8x16xf32> -> vector<8x80xf32>
    %cst_70 = arith.constant dense<0.000000e+00> : vector<8x64xf32>
    %368 = tpu.matmul %367, %11, %cst_70 {dimension_numbers = #tpu.dot_dimension_numbers<[1], [0], [0], [1], [0, 0, 1, 1], [], []>} : vector<8x80xf32>, vector<80x64xf32>, vector<8x64xf32> -> vector<8x64xf32>
    %369 = vector.broadcast %13 : vector<1x64xf32> to vector<8x64xf32>
    %370 = arith.addf %368, %369 : vector<8x64xf32>
    %371 = arith.negf %370 : vector<8x64xf32>
    %372 = math.exp %371 : vector<8x64xf32>
    %cst_71 = arith.constant 1.000000e+00 : f32
    %373 = vector.broadcast %cst_71 : f32 to vector<8x64xf32>
    %374 = arith.addf %373, %372 : vector<8x64xf32>
    %375 = arith.divf %373, %374 : vector<8x64xf32>
    %376 = vector.extract_strided_slice %375 {offsets = [0, 0], sizes = [8, 16], strides = [1, 1]} : vector<8x64xf32> to vector<8x16xf32>
    %377 = vector.extract_strided_slice %375 {offsets = [0, 16], sizes = [8, 16], strides = [1, 1]} : vector<8x64xf32> to vector<8x16xf32>
    %378 = vector.extract_strided_slice %375 {offsets = [0, 32], sizes = [8, 16], strides = [1, 1]} : vector<8x64xf32> to vector<8x16xf32>
    %379 = vector.extract_strided_slice %375 {offsets = [0, 48], sizes = [8, 16], strides = [1, 1]} : vector<8x64xf32> to vector<8x16xf32>
    %380 = arith.mulf %378, %333 : vector<8x16xf32>
    %381 = arith.mulf %376, %377 : vector<8x16xf32>
    %382 = arith.addf %380, %381 : vector<8x16xf32>
    %383 = math.tanh %382 : vector<8x16xf32>
    %384 = arith.mulf %379, %383 : vector<8x16xf32>
    %385 = tpu.transpose %384, [1, 0] : vector<8x16xf32> -> vector<16x8xf32>
    %386 = vector.extract_strided_slice %385 {offsets = [0, 0], sizes = [1, 8], strides = [1, 1]} : vector<16x8xf32> to vector<1x8xf32>
    %387 = vector.extract_strided_slice %385 {offsets = [2, 0], sizes = [1, 8], strides = [1, 1]} : vector<16x8xf32> to vector<1x8xf32>
    %388 = vector.extract_strided_slice %385 {offsets = [4, 0], sizes = [1, 8], strides = [1, 1]} : vector<16x8xf32> to vector<1x8xf32>
    %389 = vector.extract_strided_slice %385 {offsets = [6, 0], sizes = [1, 8], strides = [1, 1]} : vector<16x8xf32> to vector<1x8xf32>
    %390 = vector.extract_strided_slice %385 {offsets = [8, 0], sizes = [1, 8], strides = [1, 1]} : vector<16x8xf32> to vector<1x8xf32>
    %391 = vector.extract_strided_slice %385 {offsets = [10, 0], sizes = [1, 8], strides = [1, 1]} : vector<16x8xf32> to vector<1x8xf32>
    %392 = vector.extract_strided_slice %385 {offsets = [12, 0], sizes = [1, 8], strides = [1, 1]} : vector<16x8xf32> to vector<1x8xf32>
    %393 = vector.extract_strided_slice %385 {offsets = [14, 0], sizes = [1, 8], strides = [1, 1]} : vector<16x8xf32> to vector<1x8xf32>
    %394 = tpu.concatenate %386, %387, %388, %389, %390, %391, %392, %393 in 0 : vector<1x8xf32>, vector<1x8xf32>, vector<1x8xf32>, vector<1x8xf32>, vector<1x8xf32>, vector<1x8xf32>, vector<1x8xf32>, vector<1x8xf32> -> vector<8x8xf32>
    %395 = vector.extract_strided_slice %385 {offsets = [1, 0], sizes = [1, 8], strides = [1, 1]} : vector<16x8xf32> to vector<1x8xf32>
    %396 = vector.extract_strided_slice %385 {offsets = [3, 0], sizes = [1, 8], strides = [1, 1]} : vector<16x8xf32> to vector<1x8xf32>
    %397 = vector.extract_strided_slice %385 {offsets = [5, 0], sizes = [1, 8], strides = [1, 1]} : vector<16x8xf32> to vector<1x8xf32>
    %398 = vector.extract_strided_slice %385 {offsets = [7, 0], sizes = [1, 8], strides = [1, 1]} : vector<16x8xf32> to vector<1x8xf32>
    %399 = vector.extract_strided_slice %385 {offsets = [9, 0], sizes = [1, 8], strides = [1, 1]} : vector<16x8xf32> to vector<1x8xf32>
    %400 = vector.extract_strided_slice %385 {offsets = [11, 0], sizes = [1, 8], strides = [1, 1]} : vector<16x8xf32> to vector<1x8xf32>
    %401 = vector.extract_strided_slice %385 {offsets = [13, 0], sizes = [1, 8], strides = [1, 1]} : vector<16x8xf32> to vector<1x8xf32>
    %402 = vector.extract_strided_slice %385 {offsets = [15, 0], sizes = [1, 8], strides = [1, 1]} : vector<16x8xf32> to vector<1x8xf32>
    %403 = tpu.concatenate %395, %396, %397, %398, %399, %400, %401, %402 in 0 : vector<1x8xf32>, vector<1x8xf32>, vector<1x8xf32>, vector<1x8xf32>, vector<1x8xf32>, vector<1x8xf32>, vector<1x8xf32>, vector<1x8xf32> -> vector<8x8xf32>
    %404 = tpu.concatenate %394, %403 in 1 : vector<8x8xf32>, vector<8x8xf32> -> vector<8x16xf32>
    %c7_72 = arith.constant 7 : index
    %c0_73 = arith.constant 0 : index
    %c0_74 = arith.constant 0 : index
    %405 = vector.load %arg11[%c7_72, %c0_73, %c0_74] : memref<8x8x16xf32, #tpu.memory_space<vmem>>, vector<1x8x16xf32>
    %406 = vector.shape_cast %405 : vector<1x8x16xf32> to vector<8x16xf32>
    %407 = vector.shape_cast %404 : vector<8x16xf32> to vector<1x8x16xf32>
    tpu.vector_store %arg11[%c7_72, %c0_73, %c0_74], %407 {strides = array<i32>} : memref<8x8x16xf32, #tpu.memory_space<vmem>>, vector<1x8x16xf32>,
    %c1_75 = arith.constant 1 : index
    %c0_76 = arith.constant 0 : index
    %c0_77 = arith.constant 0 : index
    %408 = vector.load %arg4[%c1_75, %c0_76, %c0_77] : memref<2x80x64xf32, #tpu.memory_space<vmem>>, vector<1x80x64xf32>
    %409 = vector.shape_cast %408 : vector<1x80x64xf32> to vector<80x64xf32>
    %c1_78 = arith.constant 1 : index
    %c0_79 = arith.constant 0 : index
    %c0_80 = arith.constant 0 : index
    %410 = vector.load %arg5[%c1_78, %c0_79, %c0_80] : memref<2x1x64xf32, #tpu.memory_space<vmem>>, vector<1x1x64xf32>
    %411 = vector.shape_cast %410 : vector<1x1x64xf32> to vector<1x64xf32>
    %cst_81 = arith.constant 0.000000e+00 : f32
    %412 = vector.broadcast %cst_81 : f32 to vector<8x16xf32>
    %cst_82 = arith.constant 0.000000e+00 : f32
    %413 = vector.broadcast %cst_82 : f32 to vector<8x16xf32>
    %c0_83 = arith.constant 0 : index
    %c0_84 = arith.constant 0 : index
    %c0_85 = arith.constant 0 : index
    %414 = vector.load %arg11[%c0_83, %c0_84, %c0_85] : memref<8x8x16xf32, #tpu.memory_space<vmem>>, vector<1x8x16xf32>
    %415 = vector.shape_cast %414 : vector<1x8x16xf32> to vector<8x16xf32>
    %416 = vector.extract_strided_slice %415 {offsets = [0, 0], sizes = [7, 16], strides = [1, 1]} : vector<8x16xf32> to vector<7x16xf32>
    %417 = tpu.concatenate %9, %416 in 0 : vector<1x16xf32>, vector<7x16xf32> -> vector<8x16xf32>
    %418 = vector.extract_strided_slice %412 {offsets = [0, 0], sizes = [7, 16], strides = [1, 1]} : vector<8x16xf32> to vector<7x16xf32>
    %419 = tpu.concatenate %9, %418 in 0 : vector<1x16xf32>, vector<7x16xf32> -> vector<8x16xf32>
    %420 = vector.extract_strided_slice %412 {offsets = [1, 0], sizes = [7, 16], strides = [1, 1]} : vector<8x16xf32> to vector<7x16xf32>
    %421 = tpu.concatenate %420, %9 in 0 : vector<7x16xf32>, vector<1x16xf32> -> vector<8x16xf32>
    %422 = tpu.concatenate %417, %415, %419, %412, %421 in 1 : vector<8x16xf32>, vector<8x16xf32>, vector<8x16xf32>, vector<8x16xf32>, vector<8x16xf32> -> vector<8x80xf32>
    %cst_86 = arith.constant dense<0.000000e+00> : vector<8x64xf32>
    %423 = tpu.matmul %422, %409, %cst_86 {dimension_numbers = #tpu.dot_dimension_numbers<[1], [0], [0], [1], [0, 0, 1, 1], [], []>} : vector<8x80xf32>, vector<80x64xf32>, vector<8x64xf32> -> vector<8x64xf32>
    %424 = vector.broadcast %411 : vector<1x64xf32> to vector<8x64xf32>
    %425 = arith.addf %423, %424 : vector<8x64xf32>
    %426 = arith.negf %425 : vector<8x64xf32>
    %427 = math.exp %426 : vector<8x64xf32>
    %cst_87 = arith.constant 1.000000e+00 : f32
    %428 = vector.broadcast %cst_87 : f32 to vector<8x64xf32>
    %429 = arith.addf %428, %427 : vector<8x64xf32>
    %430 = arith.divf %428, %429 : vector<8x64xf32>
    %431 = vector.extract_strided_slice %430 {offsets = [0, 0], sizes = [8, 16], strides = [1, 1]} : vector<8x64xf32> to vector<8x16xf32>
    %432 = vector.extract_strided_slice %430 {offsets = [0, 16], sizes = [8, 16], strides = [1, 1]} : vector<8x64xf32> to vector<8x16xf32>
    %433 = vector.extract_strided_slice %430 {offsets = [0, 32], sizes = [8, 16], strides = [1, 1]} : vector<8x64xf32> to vector<8x16xf32>
    %434 = vector.extract_strided_slice %430 {offsets = [0, 48], sizes = [8, 16], strides = [1, 1]} : vector<8x64xf32> to vector<8x16xf32>
    %435 = arith.mulf %433, %413 : vector<8x16xf32>
    %436 = arith.mulf %431, %432 : vector<8x16xf32>
    %437 = arith.addf %435, %436 : vector<8x16xf32>
    %438 = math.tanh %437 : vector<8x16xf32>
    %439 = arith.mulf %434, %438 : vector<8x16xf32>
    %440 = tpu.transpose %439, [1, 0] : vector<8x16xf32> -> vector<16x8xf32>
    %441 = vector.extract_strided_slice %440 {offsets = [0, 0], sizes = [1, 8], strides = [1, 1]} : vector<16x8xf32> to vector<1x8xf32>
    %442 = vector.extract_strided_slice %440 {offsets = [2, 0], sizes = [1, 8], strides = [1, 1]} : vector<16x8xf32> to vector<1x8xf32>
    %443 = vector.extract_strided_slice %440 {offsets = [4, 0], sizes = [1, 8], strides = [1, 1]} : vector<16x8xf32> to vector<1x8xf32>
    %444 = vector.extract_strided_slice %440 {offsets = [6, 0], sizes = [1, 8], strides = [1, 1]} : vector<16x8xf32> to vector<1x8xf32>
    %445 = vector.extract_strided_slice %440 {offsets = [8, 0], sizes = [1, 8], strides = [1, 1]} : vector<16x8xf32> to vector<1x8xf32>
    %446 = vector.extract_strided_slice %440 {offsets = [10, 0], sizes = [1, 8], strides = [1, 1]} : vector<16x8xf32> to vector<1x8xf32>
    %447 = vector.extract_strided_slice %440 {offsets = [12, 0], sizes = [1, 8], strides = [1, 1]} : vector<16x8xf32> to vector<1x8xf32>
    %448 = vector.extract_strided_slice %440 {offsets = [14, 0], sizes = [1, 8], strides = [1, 1]} : vector<16x8xf32> to vector<1x8xf32>
    %449 = tpu.concatenate %441, %442, %443, %444, %445, %446, %447, %448 in 0 : vector<1x8xf32>, vector<1x8xf32>, vector<1x8xf32>, vector<1x8xf32>, vector<1x8xf32>, vector<1x8xf32>, vector<1x8xf32>, vector<1x8xf32> -> vector<8x8xf32>
    %450 = vector.extract_strided_slice %440 {offsets = [1, 0], sizes = [1, 8], strides = [1, 1]} : vector<16x8xf32> to vector<1x8xf32>
    %451 = vector.extract_strided_slice %440 {offsets = [3, 0], sizes = [1, 8], strides = [1, 1]} : vector<16x8xf32> to vector<1x8xf32>
    %452 = vector.extract_strided_slice %440 {offsets = [5, 0], sizes = [1, 8], strides = [1, 1]} : vector<16x8xf32> to vector<1x8xf32>
    %453 = vector.extract_strided_slice %440 {offsets = [7, 0], sizes = [1, 8], strides = [1, 1]} : vector<16x8xf32> to vector<1x8xf32>
    %454 = vector.extract_strided_slice %440 {offsets = [9, 0], sizes = [1, 8], strides = [1, 1]} : vector<16x8xf32> to vector<1x8xf32>
    %455 = vector.extract_strided_slice %440 {offsets = [11, 0], sizes = [1, 8], strides = [1, 1]} : vector<16x8xf32> to vector<1x8xf32>
    %456 = vector.extract_strided_slice %440 {offsets = [13, 0], sizes = [1, 8], strides = [1, 1]} : vector<16x8xf32> to vector<1x8xf32>
    %457 = vector.extract_strided_slice %440 {offsets = [15, 0], sizes = [1, 8], strides = [1, 1]} : vector<16x8xf32> to vector<1x8xf32>
    %458 = tpu.concatenate %450, %451, %452, %453, %454, %455, %456, %457 in 0 : vector<1x8xf32>, vector<1x8xf32>, vector<1x8xf32>, vector<1x8xf32>, vector<1x8xf32>, vector<1x8xf32>, vector<1x8xf32>, vector<1x8xf32> -> vector<8x8xf32>
    %459 = tpu.concatenate %449, %458 in 1 : vector<8x8xf32>, vector<8x8xf32> -> vector<8x16xf32>
    %c0_88 = arith.constant 0 : index
    %c0_89 = arith.constant 0 : index
    %c0_90 = arith.constant 0 : index
    %460 = vector.load %arg11[%c0_88, %c0_89, %c0_90] : memref<8x8x16xf32, #tpu.memory_space<vmem>>, vector<1x8x16xf32>
    %461 = vector.shape_cast %460 : vector<1x8x16xf32> to vector<8x16xf32>
    %462 = vector.shape_cast %459 : vector<8x16xf32> to vector<1x8x16xf32>
    tpu.vector_store %arg11[%c0_88, %c0_89, %c0_90], %462 {strides = array<i32>} : memref<8x8x16xf32, #tpu.memory_space<vmem>>, vector<1x8x16xf32>,
    %c1_91 = arith.constant 1 : index
    %c0_92 = arith.constant 0 : index
    %c0_93 = arith.constant 0 : index
    %463 = vector.load %arg11[%c1_91, %c0_92, %c0_93] : memref<8x8x16xf32, #tpu.memory_space<vmem>>, vector<1x8x16xf32>
    %464 = vector.shape_cast %463 : vector<1x8x16xf32> to vector<8x16xf32>
    %465 = vector.extract_strided_slice %464 {offsets = [0, 0], sizes = [7, 16], strides = [1, 1]} : vector<8x16xf32> to vector<7x16xf32>
    %466 = tpu.concatenate %9, %465 in 0 : vector<1x16xf32>, vector<7x16xf32> -> vector<8x16xf32>
    %467 = vector.extract_strided_slice %439 {offsets = [0, 0], sizes = [7, 16], strides = [1, 1]} : vector<8x16xf32> to vector<7x16xf32>
    %468 = tpu.concatenate %9, %467 in 0 : vector<1x16xf32>, vector<7x16xf32> -> vector<8x16xf32>
    %469 = vector.extract_strided_slice %439 {offsets = [1, 0], sizes = [7, 16], strides = [1, 1]} : vector<8x16xf32> to vector<7x16xf32>
    %470 = tpu.concatenate %469, %9 in 0 : vector<7x16xf32>, vector<1x16xf32> -> vector<8x16xf32>
    %471 = tpu.concatenate %466, %464, %468, %439, %470 in 1 : vector<8x16xf32>, vector<8x16xf32>, vector<8x16xf32>, vector<8x16xf32>, vector<8x16xf32> -> vector<8x80xf32>
    %cst_94 = arith.constant dense<0.000000e+00> : vector<8x64xf32>
    %472 = tpu.matmul %471, %409, %cst_94 {dimension_numbers = #tpu.dot_dimension_numbers<[1], [0], [0], [1], [0, 0, 1, 1], [], []>} : vector<8x80xf32>, vector<80x64xf32>, vector<8x64xf32> -> vector<8x64xf32>
    %473 = vector.broadcast %411 : vector<1x64xf32> to vector<8x64xf32>
    %474 = arith.addf %472, %473 : vector<8x64xf32>
    %475 = arith.negf %474 : vector<8x64xf32>
    %476 = math.exp %475 : vector<8x64xf32>
    %cst_95 = arith.constant 1.000000e+00 : f32
    %477 = vector.broadcast %cst_95 : f32 to vector<8x64xf32>
    %478 = arith.addf %477, %476 : vector<8x64xf32>
    %479 = arith.divf %477, %478 : vector<8x64xf32>
    %480 = vector.extract_strided_slice %479 {offsets = [0, 0], sizes = [8, 16], strides = [1, 1]} : vector<8x64xf32> to vector<8x16xf32>
    %481 = vector.extract_strided_slice %479 {offsets = [0, 16], sizes = [8, 16], strides = [1, 1]} : vector<8x64xf32> to vector<8x16xf32>
    %482 = vector.extract_strided_slice %479 {offsets = [0, 32], sizes = [8, 16], strides = [1, 1]} : vector<8x64xf32> to vector<8x16xf32>
    %483 = vector.extract_strided_slice %479 {offsets = [0, 48], sizes = [8, 16], strides = [1, 1]} : vector<8x64xf32> to vector<8x16xf32>
    %484 = arith.mulf %482, %437 : vector<8x16xf32>
    %485 = arith.mulf %480, %481 : vector<8x16xf32>
    %486 = arith.addf %484, %485 : vector<8x16xf32>
    %487 = math.tanh %486 : vector<8x16xf32>
    %488 = arith.mulf %483, %487 : vector<8x16xf32>
    %489 = tpu.transpose %488, [1, 0] : vector<8x16xf32> -> vector<16x8xf32>
    %490 = vector.extract_strided_slice %489 {offsets = [0, 0], sizes = [1, 8], strides = [1, 1]} : vector<16x8xf32> to vector<1x8xf32>
    %491 = vector.extract_strided_slice %489 {offsets = [2, 0], sizes = [1, 8], strides = [1, 1]} : vector<16x8xf32> to vector<1x8xf32>
    %492 = vector.extract_strided_slice %489 {offsets = [4, 0], sizes = [1, 8], strides = [1, 1]} : vector<16x8xf32> to vector<1x8xf32>
    %493 = vector.extract_strided_slice %489 {offsets = [6, 0], sizes = [1, 8], strides = [1, 1]} : vector<16x8xf32> to vector<1x8xf32>
    %494 = vector.extract_strided_slice %489 {offsets = [8, 0], sizes = [1, 8], strides = [1, 1]} : vector<16x8xf32> to vector<1x8xf32>
    %495 = vector.extract_strided_slice %489 {offsets = [10, 0], sizes = [1, 8], strides = [1, 1]} : vector<16x8xf32> to vector<1x8xf32>
    %496 = vector.extract_strided_slice %489 {offsets = [12, 0], sizes = [1, 8], strides = [1, 1]} : vector<16x8xf32> to vector<1x8xf32>
    %497 = vector.extract_strided_slice %489 {offsets = [14, 0], sizes = [1, 8], strides = [1, 1]} : vector<16x8xf32> to vector<1x8xf32>
    %498 = tpu.concatenate %490, %491, %492, %493, %494, %495, %496, %497 in 0 : vector<1x8xf32>, vector<1x8xf32>, vector<1x8xf32>, vector<1x8xf32>, vector<1x8xf32>, vector<1x8xf32>, vector<1x8xf32>, vector<1x8xf32> -> vector<8x8xf32>
    %499 = vector.extract_strided_slice %489 {offsets = [1, 0], sizes = [1, 8], strides = [1, 1]} : vector<16x8xf32> to vector<1x8xf32>
    %500 = vector.extract_strided_slice %489 {offsets = [3, 0], sizes = [1, 8], strides = [1, 1]} : vector<16x8xf32> to vector<1x8xf32>
    %501 = vector.extract_strided_slice %489 {offsets = [5, 0], sizes = [1, 8], strides = [1, 1]} : vector<16x8xf32> to vector<1x8xf32>
    %502 = vector.extract_strided_slice %489 {offsets = [7, 0], sizes = [1, 8], strides = [1, 1]} : vector<16x8xf32> to vector<1x8xf32>
    %503 = vector.extract_strided_slice %489 {offsets = [9, 0], sizes = [1, 8], strides = [1, 1]} : vector<16x8xf32> to vector<1x8xf32>
    %504 = vector.extract_strided_slice %489 {offsets = [11, 0], sizes = [1, 8], strides = [1, 1]} : vector<16x8xf32> to vector<1x8xf32>
    %505 = vector.extract_strided_slice %489 {offsets = [13, 0], sizes = [1, 8], strides = [1, 1]} : vector<16x8xf32> to vector<1x8xf32>
    %506 = vector.extract_strided_slice %489 {offsets = [15, 0], sizes = [1, 8], strides = [1, 1]} : vector<16x8xf32> to vector<1x8xf32>
    %507 = tpu.concatenate %499, %500, %501, %502, %503, %504, %505, %506 in 0 : vector<1x8xf32>, vector<1x8xf32>, vector<1x8xf32>, vector<1x8xf32>, vector<1x8xf32>, vector<1x8xf32>, vector<1x8xf32>, vector<1x8xf32> -> vector<8x8xf32>
    %508 = tpu.concatenate %498, %507 in 1 : vector<8x8xf32>, vector<8x8xf32> -> vector<8x16xf32>
    %c1_96 = arith.constant 1 : index
    %c0_97 = arith.constant 0 : index
    %c0_98 = arith.constant 0 : index
    %509 = vector.load %arg11[%c1_96, %c0_97, %c0_98] : memref<8x8x16xf32, #tpu.memory_space<vmem>>, vector<1x8x16xf32>
    %510 = vector.shape_cast %509 : vector<1x8x16xf32> to vector<8x16xf32>
    %511 = vector.shape_cast %508 : vector<8x16xf32> to vector<1x8x16xf32>
    tpu.vector_store %arg11[%c1_96, %c0_97, %c0_98], %511 {strides = array<i32>} : memref<8x8x16xf32, #tpu.memory_space<vmem>>, vector<1x8x16xf32>,
    %c2_99 = arith.constant 2 : index
    %c0_100 = arith.constant 0 : index
    %c0_101 = arith.constant 0 : index
    %512 = vector.load %arg11[%c2_99, %c0_100, %c0_101] : memref<8x8x16xf32, #tpu.memory_space<vmem>>, vector<1x8x16xf32>
    %513 = vector.shape_cast %512 : vector<1x8x16xf32> to vector<8x16xf32>
    %514 = vector.extract_strided_slice %513 {offsets = [0, 0], sizes = [7, 16], strides = [1, 1]} : vector<8x16xf32> to vector<7x16xf32>
    %515 = tpu.concatenate %9, %514 in 0 : vector<1x16xf32>, vector<7x16xf32> -> vector<8x16xf32>
    %516 = vector.extract_strided_slice %488 {offsets = [0, 0], sizes = [7, 16], strides = [1, 1]} : vector<8x16xf32> to vector<7x16xf32>
    %517 = tpu.concatenate %9, %516 in 0 : vector<1x16xf32>, vector<7x16xf32> -> vector<8x16xf32>
    %518 = vector.extract_strided_slice %488 {offsets = [1, 0], sizes = [7, 16], strides = [1, 1]} : vector<8x16xf32> to vector<7x16xf32>
    %519 = tpu.concatenate %518, %9 in 0 : vector<7x16xf32>, vector<1x16xf32> -> vector<8x16xf32>
    %520 = tpu.concatenate %515, %513, %517, %488, %519 in 1 : vector<8x16xf32>, vector<8x16xf32>, vector<8x16xf32>, vector<8x16xf32>, vector<8x16xf32> -> vector<8x80xf32>
    %cst_102 = arith.constant dense<0.000000e+00> : vector<8x64xf32>
    %521 = tpu.matmul %520, %409, %cst_102 {dimension_numbers = #tpu.dot_dimension_numbers<[1], [0], [0], [1], [0, 0, 1, 1], [], []>} : vector<8x80xf32>, vector<80x64xf32>, vector<8x64xf32> -> vector<8x64xf32>
    %522 = vector.broadcast %411 : vector<1x64xf32> to vector<8x64xf32>
    %523 = arith.addf %521, %522 : vector<8x64xf32>
    %524 = arith.negf %523 : vector<8x64xf32>
    %525 = math.exp %524 : vector<8x64xf32>
    %cst_103 = arith.constant 1.000000e+00 : f32
    %526 = vector.broadcast %cst_103 : f32 to vector<8x64xf32>
    %527 = arith.addf %526, %525 : vector<8x64xf32>
    %528 = arith.divf %526, %527 : vector<8x64xf32>
    %529 = vector.extract_strided_slice %528 {offsets = [0, 0], sizes = [8, 16], strides = [1, 1]} : vector<8x64xf32> to vector<8x16xf32>
    %530 = vector.extract_strided_slice %528 {offsets = [0, 16], sizes = [8, 16], strides = [1, 1]} : vector<8x64xf32> to vector<8x16xf32>
    %531 = vector.extract_strided_slice %528 {offsets = [0, 32], sizes = [8, 16], strides = [1, 1]} : vector<8x64xf32> to vector<8x16xf32>
    %532 = vector.extract_strided_slice %528 {offsets = [0, 48], sizes = [8, 16], strides = [1, 1]} : vector<8x64xf32> to vector<8x16xf32>
    %533 = arith.mulf %531, %486 : vector<8x16xf32>
    %534 = arith.mulf %529, %530 : vector<8x16xf32>
    %535 = arith.addf %533, %534 : vector<8x16xf32>
    %536 = math.tanh %535 : vector<8x16xf32>
    %537 = arith.mulf %532, %536 : vector<8x16xf32>
    %538 = tpu.transpose %537, [1, 0] : vector<8x16xf32> -> vector<16x8xf32>
    %539 = vector.extract_strided_slice %538 {offsets = [0, 0], sizes = [1, 8], strides = [1, 1]} : vector<16x8xf32> to vector<1x8xf32>
    %540 = vector.extract_strided_slice %538 {offsets = [2, 0], sizes = [1, 8], strides = [1, 1]} : vector<16x8xf32> to vector<1x8xf32>
    %541 = vector.extract_strided_slice %538 {offsets = [4, 0], sizes = [1, 8], strides = [1, 1]} : vector<16x8xf32> to vector<1x8xf32>
    %542 = vector.extract_strided_slice %538 {offsets = [6, 0], sizes = [1, 8], strides = [1, 1]} : vector<16x8xf32> to vector<1x8xf32>
    %543 = vector.extract_strided_slice %538 {offsets = [8, 0], sizes = [1, 8], strides = [1, 1]} : vector<16x8xf32> to vector<1x8xf32>
    %544 = vector.extract_strided_slice %538 {offsets = [10, 0], sizes = [1, 8], strides = [1, 1]} : vector<16x8xf32> to vector<1x8xf32>
    %545 = vector.extract_strided_slice %538 {offsets = [12, 0], sizes = [1, 8], strides = [1, 1]} : vector<16x8xf32> to vector<1x8xf32>
    %546 = vector.extract_strided_slice %538 {offsets = [14, 0], sizes = [1, 8], strides = [1, 1]} : vector<16x8xf32> to vector<1x8xf32>
    %547 = tpu.concatenate %539, %540, %541, %542, %543, %544, %545, %546 in 0 : vector<1x8xf32>, vector<1x8xf32>, vector<1x8xf32>, vector<1x8xf32>, vector<1x8xf32>, vector<1x8xf32>, vector<1x8xf32>, vector<1x8xf32> -> vector<8x8xf32>
    %548 = vector.extract_strided_slice %538 {offsets = [1, 0], sizes = [1, 8], strides = [1, 1]} : vector<16x8xf32> to vector<1x8xf32>
    %549 = vector.extract_strided_slice %538 {offsets = [3, 0], sizes = [1, 8], strides = [1, 1]} : vector<16x8xf32> to vector<1x8xf32>
    %550 = vector.extract_strided_slice %538 {offsets = [5, 0], sizes = [1, 8], strides = [1, 1]} : vector<16x8xf32> to vector<1x8xf32>
    %551 = vector.extract_strided_slice %538 {offsets = [7, 0], sizes = [1, 8], strides = [1, 1]} : vector<16x8xf32> to vector<1x8xf32>
    %552 = vector.extract_strided_slice %538 {offsets = [9, 0], sizes = [1, 8], strides = [1, 1]} : vector<16x8xf32> to vector<1x8xf32>
    %553 = vector.extract_strided_slice %538 {offsets = [11, 0], sizes = [1, 8], strides = [1, 1]} : vector<16x8xf32> to vector<1x8xf32>
    %554 = vector.extract_strided_slice %538 {offsets = [13, 0], sizes = [1, 8], strides = [1, 1]} : vector<16x8xf32> to vector<1x8xf32>
    %555 = vector.extract_strided_slice %538 {offsets = [15, 0], sizes = [1, 8], strides = [1, 1]} : vector<16x8xf32> to vector<1x8xf32>
    %556 = tpu.concatenate %548, %549, %550, %551, %552, %553, %554, %555 in 0 : vector<1x8xf32>, vector<1x8xf32>, vector<1x8xf32>, vector<1x8xf32>, vector<1x8xf32>, vector<1x8xf32>, vector<1x8xf32>, vector<1x8xf32> -> vector<8x8xf32>
    %557 = tpu.concatenate %547, %556 in 1 : vector<8x8xf32>, vector<8x8xf32> -> vector<8x16xf32>
    %c2_104 = arith.constant 2 : index
    %c0_105 = arith.constant 0 : index
    %c0_106 = arith.constant 0 : index
    %558 = vector.load %arg11[%c2_104, %c0_105, %c0_106] : memref<8x8x16xf32, #tpu.memory_space<vmem>>, vector<1x8x16xf32>
    %559 = vector.shape_cast %558 : vector<1x8x16xf32> to vector<8x16xf32>
    %560 = vector.shape_cast %557 : vector<8x16xf32> to vector<1x8x16xf32>
    tpu.vector_store %arg11[%c2_104, %c0_105, %c0_106], %560 {strides = array<i32>} : memref<8x8x16xf32, #tpu.memory_space<vmem>>, vector<1x8x16xf32>,
    %c3_107 = arith.constant 3 : index
    %c0_108 = arith.constant 0 : index
    %c0_109 = arith.constant 0 : index
    %561 = vector.load %arg11[%c3_107, %c0_108, %c0_109] : memref<8x8x16xf32, #tpu.memory_space<vmem>>, vector<1x8x16xf32>
    %562 = vector.shape_cast %561 : vector<1x8x16xf32> to vector<8x16xf32>
    %563 = vector.extract_strided_slice %562 {offsets = [0, 0], sizes = [7, 16], strides = [1, 1]} : vector<8x16xf32> to vector<7x16xf32>
    %564 = tpu.concatenate %9, %563 in 0 : vector<1x16xf32>, vector<7x16xf32> -> vector<8x16xf32>
    %565 = vector.extract_strided_slice %537 {offsets = [0, 0], sizes = [7, 16], strides = [1, 1]} : vector<8x16xf32> to vector<7x16xf32>
    %566 = tpu.concatenate %9, %565 in 0 : vector<1x16xf32>, vector<7x16xf32> -> vector<8x16xf32>
    %567 = vector.extract_strided_slice %537 {offsets = [1, 0], sizes = [7, 16], strides = [1, 1]} : vector<8x16xf32> to vector<7x16xf32>
    %568 = tpu.concatenate %567, %9 in 0 : vector<7x16xf32>, vector<1x16xf32> -> vector<8x16xf32>
    %569 = tpu.concatenate %564, %562, %566, %537, %568 in 1 : vector<8x16xf32>, vector<8x16xf32>, vector<8x16xf32>, vector<8x16xf32>, vector<8x16xf32> -> vector<8x80xf32>
    %cst_110 = arith.constant dense<0.000000e+00> : vector<8x64xf32>
    %570 = tpu.matmul %569, %409, %cst_110 {dimension_numbers = #tpu.dot_dimension_numbers<[1], [0], [0], [1], [0, 0, 1, 1], [], []>} : vector<8x80xf32>, vector<80x64xf32>, vector<8x64xf32> -> vector<8x64xf32>
    %571 = vector.broadcast %411 : vector<1x64xf32> to vector<8x64xf32>
    %572 = arith.addf %570, %571 : vector<8x64xf32>
    %573 = arith.negf %572 : vector<8x64xf32>
    %574 = math.exp %573 : vector<8x64xf32>
    %cst_111 = arith.constant 1.000000e+00 : f32
    %575 = vector.broadcast %cst_111 : f32 to vector<8x64xf32>
    %576 = arith.addf %575, %574 : vector<8x64xf32>
    %577 = arith.divf %575, %576 : vector<8x64xf32>
    %578 = vector.extract_strided_slice %577 {offsets = [0, 0], sizes = [8, 16], strides = [1, 1]} : vector<8x64xf32> to vector<8x16xf32>
    %579 = vector.extract_strided_slice %577 {offsets = [0, 16], sizes = [8, 16], strides = [1, 1]} : vector<8x64xf32> to vector<8x16xf32>
    %580 = vector.extract_strided_slice %577 {offsets = [0, 32], sizes = [8, 16], strides = [1, 1]} : vector<8x64xf32> to vector<8x16xf32>
    %581 = vector.extract_strided_slice %577 {offsets = [0, 48], sizes = [8, 16], strides = [1, 1]} : vector<8x64xf32> to vector<8x16xf32>
    %582 = arith.mulf %580, %535 : vector<8x16xf32>
    %583 = arith.mulf %578, %579 : vector<8x16xf32>
    %584 = arith.addf %582, %583 : vector<8x16xf32>
    %585 = math.tanh %584 : vector<8x16xf32>
    %586 = arith.mulf %581, %585 : vector<8x16xf32>
    %587 = tpu.transpose %586, [1, 0] : vector<8x16xf32> -> vector<16x8xf32>
    %588 = vector.extract_strided_slice %587 {offsets = [0, 0], sizes = [1, 8], strides = [1, 1]} : vector<16x8xf32> to vector<1x8xf32>
    %589 = vector.extract_strided_slice %587 {offsets = [2, 0], sizes = [1, 8], strides = [1, 1]} : vector<16x8xf32> to vector<1x8xf32>
    %590 = vector.extract_strided_slice %587 {offsets = [4, 0], sizes = [1, 8], strides = [1, 1]} : vector<16x8xf32> to vector<1x8xf32>
    %591 = vector.extract_strided_slice %587 {offsets = [6, 0], sizes = [1, 8], strides = [1, 1]} : vector<16x8xf32> to vector<1x8xf32>
    %592 = vector.extract_strided_slice %587 {offsets = [8, 0], sizes = [1, 8], strides = [1, 1]} : vector<16x8xf32> to vector<1x8xf32>
    %593 = vector.extract_strided_slice %587 {offsets = [10, 0], sizes = [1, 8], strides = [1, 1]} : vector<16x8xf32> to vector<1x8xf32>
    %594 = vector.extract_strided_slice %587 {offsets = [12, 0], sizes = [1, 8], strides = [1, 1]} : vector<16x8xf32> to vector<1x8xf32>
    %595 = vector.extract_strided_slice %587 {offsets = [14, 0], sizes = [1, 8], strides = [1, 1]} : vector<16x8xf32> to vector<1x8xf32>
    %596 = tpu.concatenate %588, %589, %590, %591, %592, %593, %594, %595 in 0 : vector<1x8xf32>, vector<1x8xf32>, vector<1x8xf32>, vector<1x8xf32>, vector<1x8xf32>, vector<1x8xf32>, vector<1x8xf32>, vector<1x8xf32> -> vector<8x8xf32>
    %597 = vector.extract_strided_slice %587 {offsets = [1, 0], sizes = [1, 8], strides = [1, 1]} : vector<16x8xf32> to vector<1x8xf32>
    %598 = vector.extract_strided_slice %587 {offsets = [3, 0], sizes = [1, 8], strides = [1, 1]} : vector<16x8xf32> to vector<1x8xf32>
    %599 = vector.extract_strided_slice %587 {offsets = [5, 0], sizes = [1, 8], strides = [1, 1]} : vector<16x8xf32> to vector<1x8xf32>
    %600 = vector.extract_strided_slice %587 {offsets = [7, 0], sizes = [1, 8], strides = [1, 1]} : vector<16x8xf32> to vector<1x8xf32>
    %601 = vector.extract_strided_slice %587 {offsets = [9, 0], sizes = [1, 8], strides = [1, 1]} : vector<16x8xf32> to vector<1x8xf32>
    %602 = vector.extract_strided_slice %587 {offsets = [11, 0], sizes = [1, 8], strides = [1, 1]} : vector<16x8xf32> to vector<1x8xf32>
    %603 = vector.extract_strided_slice %587 {offsets = [13, 0], sizes = [1, 8], strides = [1, 1]} : vector<16x8xf32> to vector<1x8xf32>
    %604 = vector.extract_strided_slice %587 {offsets = [15, 0], sizes = [1, 8], strides = [1, 1]} : vector<16x8xf32> to vector<1x8xf32>
    %605 = tpu.concatenate %597, %598, %599, %600, %601, %602, %603, %604 in 0 : vector<1x8xf32>, vector<1x8xf32>, vector<1x8xf32>, vector<1x8xf32>, vector<1x8xf32>, vector<1x8xf32>, vector<1x8xf32>, vector<1x8xf32> -> vector<8x8xf32>
    %606 = tpu.concatenate %596, %605 in 1 : vector<8x8xf32>, vector<8x8xf32> -> vector<8x16xf32>
    %c3_112 = arith.constant 3 : index
    %c0_113 = arith.constant 0 : index
    %c0_114 = arith.constant 0 : index
    %607 = vector.load %arg11[%c3_112, %c0_113, %c0_114] : memref<8x8x16xf32, #tpu.memory_space<vmem>>, vector<1x8x16xf32>
    %608 = vector.shape_cast %607 : vector<1x8x16xf32> to vector<8x16xf32>
    %609 = vector.shape_cast %606 : vector<8x16xf32> to vector<1x8x16xf32>
    tpu.vector_store %arg11[%c3_112, %c0_113, %c0_114], %609 {strides = array<i32>} : memref<8x8x16xf32, #tpu.memory_space<vmem>>, vector<1x8x16xf32>,
    %c4_115 = arith.constant 4 : index
    %c0_116 = arith.constant 0 : index
    %c0_117 = arith.constant 0 : index
    %610 = vector.load %arg11[%c4_115, %c0_116, %c0_117] : memref<8x8x16xf32, #tpu.memory_space<vmem>>, vector<1x8x16xf32>
    %611 = vector.shape_cast %610 : vector<1x8x16xf32> to vector<8x16xf32>
    %612 = vector.extract_strided_slice %611 {offsets = [0, 0], sizes = [7, 16], strides = [1, 1]} : vector<8x16xf32> to vector<7x16xf32>
    %613 = tpu.concatenate %9, %612 in 0 : vector<1x16xf32>, vector<7x16xf32> -> vector<8x16xf32>
    %614 = vector.extract_strided_slice %586 {offsets = [0, 0], sizes = [7, 16], strides = [1, 1]} : vector<8x16xf32> to vector<7x16xf32>
    %615 = tpu.concatenate %9, %614 in 0 : vector<1x16xf32>, vector<7x16xf32> -> vector<8x16xf32>
    %616 = vector.extract_strided_slice %586 {offsets = [1, 0], sizes = [7, 16], strides = [1, 1]} : vector<8x16xf32> to vector<7x16xf32>
    %617 = tpu.concatenate %616, %9 in 0 : vector<7x16xf32>, vector<1x16xf32> -> vector<8x16xf32>
    %618 = tpu.concatenate %613, %611, %615, %586, %617 in 1 : vector<8x16xf32>, vector<8x16xf32>, vector<8x16xf32>, vector<8x16xf32>, vector<8x16xf32> -> vector<8x80xf32>
    %cst_118 = arith.constant dense<0.000000e+00> : vector<8x64xf32>
    %619 = tpu.matmul %618, %409, %cst_118 {dimension_numbers = #tpu.dot_dimension_numbers<[1], [0], [0], [1], [0, 0, 1, 1], [], []>} : vector<8x80xf32>, vector<80x64xf32>, vector<8x64xf32> -> vector<8x64xf32>
    %620 = vector.broadcast %411 : vector<1x64xf32> to vector<8x64xf32>
    %621 = arith.addf %619, %620 : vector<8x64xf32>
    %622 = arith.negf %621 : vector<8x64xf32>
    %623 = math.exp %622 : vector<8x64xf32>
    %cst_119 = arith.constant 1.000000e+00 : f32
    %624 = vector.broadcast %cst_119 : f32 to vector<8x64xf32>
    %625 = arith.addf %624, %623 : vector<8x64xf32>
    %626 = arith.divf %624, %625 : vector<8x64xf32>
    %627 = vector.extract_strided_slice %626 {offsets = [0, 0], sizes = [8, 16], strides = [1, 1]} : vector<8x64xf32> to vector<8x16xf32>
    %628 = vector.extract_strided_slice %626 {offsets = [0, 16], sizes = [8, 16], strides = [1, 1]} : vector<8x64xf32> to vector<8x16xf32>
    %629 = vector.extract_strided_slice %626 {offsets = [0, 32], sizes = [8, 16], strides = [1, 1]} : vector<8x64xf32> to vector<8x16xf32>
    %630 = vector.extract_strided_slice %626 {offsets = [0, 48], sizes = [8, 16], strides = [1, 1]} : vector<8x64xf32> to vector<8x16xf32>
    %631 = arith.mulf %629, %584 : vector<8x16xf32>
    %632 = arith.mulf %627, %628 : vector<8x16xf32>
    %633 = arith.addf %631, %632 : vector<8x16xf32>
    %634 = math.tanh %633 : vector<8x16xf32>
    %635 = arith.mulf %630, %634 : vector<8x16xf32>
    %636 = tpu.transpose %635, [1, 0] : vector<8x16xf32> -> vector<16x8xf32>
    %637 = vector.extract_strided_slice %636 {offsets = [0, 0], sizes = [1, 8], strides = [1, 1]} : vector<16x8xf32> to vector<1x8xf32>
    %638 = vector.extract_strided_slice %636 {offsets = [2, 0], sizes = [1, 8], strides = [1, 1]} : vector<16x8xf32> to vector<1x8xf32>
    %639 = vector.extract_strided_slice %636 {offsets = [4, 0], sizes = [1, 8], strides = [1, 1]} : vector<16x8xf32> to vector<1x8xf32>
    %640 = vector.extract_strided_slice %636 {offsets = [6, 0], sizes = [1, 8], strides = [1, 1]} : vector<16x8xf32> to vector<1x8xf32>
    %641 = vector.extract_strided_slice %636 {offsets = [8, 0], sizes = [1, 8], strides = [1, 1]} : vector<16x8xf32> to vector<1x8xf32>
    %642 = vector.extract_strided_slice %636 {offsets = [10, 0], sizes = [1, 8], strides = [1, 1]} : vector<16x8xf32> to vector<1x8xf32>
    %643 = vector.extract_strided_slice %636 {offsets = [12, 0], sizes = [1, 8], strides = [1, 1]} : vector<16x8xf32> to vector<1x8xf32>
    %644 = vector.extract_strided_slice %636 {offsets = [14, 0], sizes = [1, 8], strides = [1, 1]} : vector<16x8xf32> to vector<1x8xf32>
    %645 = tpu.concatenate %637, %638, %639, %640, %641, %642, %643, %644 in 0 : vector<1x8xf32>, vector<1x8xf32>, vector<1x8xf32>, vector<1x8xf32>, vector<1x8xf32>, vector<1x8xf32>, vector<1x8xf32>, vector<1x8xf32> -> vector<8x8xf32>
    %646 = vector.extract_strided_slice %636 {offsets = [1, 0], sizes = [1, 8], strides = [1, 1]} : vector<16x8xf32> to vector<1x8xf32>
    %647 = vector.extract_strided_slice %636 {offsets = [3, 0], sizes = [1, 8], strides = [1, 1]} : vector<16x8xf32> to vector<1x8xf32>
    %648 = vector.extract_strided_slice %636 {offsets = [5, 0], sizes = [1, 8], strides = [1, 1]} : vector<16x8xf32> to vector<1x8xf32>
    %649 = vector.extract_strided_slice %636 {offsets = [7, 0], sizes = [1, 8], strides = [1, 1]} : vector<16x8xf32> to vector<1x8xf32>
    %650 = vector.extract_strided_slice %636 {offsets = [9, 0], sizes = [1, 8], strides = [1, 1]} : vector<16x8xf32> to vector<1x8xf32>
    %651 = vector.extract_strided_slice %636 {offsets = [11, 0], sizes = [1, 8], strides = [1, 1]} : vector<16x8xf32> to vector<1x8xf32>
    %652 = vector.extract_strided_slice %636 {offsets = [13, 0], sizes = [1, 8], strides = [1, 1]} : vector<16x8xf32> to vector<1x8xf32>
    %653 = vector.extract_strided_slice %636 {offsets = [15, 0], sizes = [1, 8], strides = [1, 1]} : vector<16x8xf32> to vector<1x8xf32>
    %654 = tpu.concatenate %646, %647, %648, %649, %650, %651, %652, %653 in 0 : vector<1x8xf32>, vector<1x8xf32>, vector<1x8xf32>, vector<1x8xf32>, vector<1x8xf32>, vector<1x8xf32>, vector<1x8xf32>, vector<1x8xf32> -> vector<8x8xf32>
    %655 = tpu.concatenate %645, %654 in 1 : vector<8x8xf32>, vector<8x8xf32> -> vector<8x16xf32>
    %c4_120 = arith.constant 4 : index
    %c0_121 = arith.constant 0 : index
    %c0_122 = arith.constant 0 : index
    %656 = vector.load %arg11[%c4_120, %c0_121, %c0_122] : memref<8x8x16xf32, #tpu.memory_space<vmem>>, vector<1x8x16xf32>
    %657 = vector.shape_cast %656 : vector<1x8x16xf32> to vector<8x16xf32>
    %658 = vector.shape_cast %655 : vector<8x16xf32> to vector<1x8x16xf32>
    tpu.vector_store %arg11[%c4_120, %c0_121, %c0_122], %658 {strides = array<i32>} : memref<8x8x16xf32, #tpu.memory_space<vmem>>, vector<1x8x16xf32>,
    %c5_123 = arith.constant 5 : index
    %c0_124 = arith.constant 0 : index
    %c0_125 = arith.constant 0 : index
    %659 = vector.load %arg11[%c5_123, %c0_124, %c0_125] : memref<8x8x16xf32, #tpu.memory_space<vmem>>, vector<1x8x16xf32>
    %660 = vector.shape_cast %659 : vector<1x8x16xf32> to vector<8x16xf32>
    %661 = vector.extract_strided_slice %660 {offsets = [0, 0], sizes = [7, 16], strides = [1, 1]} : vector<8x16xf32> to vector<7x16xf32>
    %662 = tpu.concatenate %9, %661 in 0 : vector<1x16xf32>, vector<7x16xf32> -> vector<8x16xf32>
    %663 = vector.extract_strided_slice %635 {offsets = [0, 0], sizes = [7, 16], strides = [1, 1]} : vector<8x16xf32> to vector<7x16xf32>
    %664 = tpu.concatenate %9, %663 in 0 : vector<1x16xf32>, vector<7x16xf32> -> vector<8x16xf32>
    %665 = vector.extract_strided_slice %635 {offsets = [1, 0], sizes = [7, 16], strides = [1, 1]} : vector<8x16xf32> to vector<7x16xf32>
    %666 = tpu.concatenate %665, %9 in 0 : vector<7x16xf32>, vector<1x16xf32> -> vector<8x16xf32>
    %667 = tpu.concatenate %662, %660, %664, %635, %666 in 1 : vector<8x16xf32>, vector<8x16xf32>, vector<8x16xf32>, vector<8x16xf32>, vector<8x16xf32> -> vector<8x80xf32>
    %cst_126 = arith.constant dense<0.000000e+00> : vector<8x64xf32>
    %668 = tpu.matmul %667, %409, %cst_126 {dimension_numbers = #tpu.dot_dimension_numbers<[1], [0], [0], [1], [0, 0, 1, 1], [], []>} : vector<8x80xf32>, vector<80x64xf32>, vector<8x64xf32> -> vector<8x64xf32>
    %669 = vector.broadcast %411 : vector<1x64xf32> to vector<8x64xf32>
    %670 = arith.addf %668, %669 : vector<8x64xf32>
    %671 = arith.negf %670 : vector<8x64xf32>
    %672 = math.exp %671 : vector<8x64xf32>
    %cst_127 = arith.constant 1.000000e+00 : f32
    %673 = vector.broadcast %cst_127 : f32 to vector<8x64xf32>
    %674 = arith.addf %673, %672 : vector<8x64xf32>
    %675 = arith.divf %673, %674 : vector<8x64xf32>
    %676 = vector.extract_strided_slice %675 {offsets = [0, 0], sizes = [8, 16], strides = [1, 1]} : vector<8x64xf32> to vector<8x16xf32>
    %677 = vector.extract_strided_slice %675 {offsets = [0, 16], sizes = [8, 16], strides = [1, 1]} : vector<8x64xf32> to vector<8x16xf32>
    %678 = vector.extract_strided_slice %675 {offsets = [0, 32], sizes = [8, 16], strides = [1, 1]} : vector<8x64xf32> to vector<8x16xf32>
    %679 = vector.extract_strided_slice %675 {offsets = [0, 48], sizes = [8, 16], strides = [1, 1]} : vector<8x64xf32> to vector<8x16xf32>
    %680 = arith.mulf %678, %633 : vector<8x16xf32>
    %681 = arith.mulf %676, %677 : vector<8x16xf32>
    %682 = arith.addf %680, %681 : vector<8x16xf32>
    %683 = math.tanh %682 : vector<8x16xf32>
    %684 = arith.mulf %679, %683 : vector<8x16xf32>
    %685 = tpu.transpose %684, [1, 0] : vector<8x16xf32> -> vector<16x8xf32>
    %686 = vector.extract_strided_slice %685 {offsets = [0, 0], sizes = [1, 8], strides = [1, 1]} : vector<16x8xf32> to vector<1x8xf32>
    %687 = vector.extract_strided_slice %685 {offsets = [2, 0], sizes = [1, 8], strides = [1, 1]} : vector<16x8xf32> to vector<1x8xf32>
    %688 = vector.extract_strided_slice %685 {offsets = [4, 0], sizes = [1, 8], strides = [1, 1]} : vector<16x8xf32> to vector<1x8xf32>
    %689 = vector.extract_strided_slice %685 {offsets = [6, 0], sizes = [1, 8], strides = [1, 1]} : vector<16x8xf32> to vector<1x8xf32>
    %690 = vector.extract_strided_slice %685 {offsets = [8, 0], sizes = [1, 8], strides = [1, 1]} : vector<16x8xf32> to vector<1x8xf32>
    %691 = vector.extract_strided_slice %685 {offsets = [10, 0], sizes = [1, 8], strides = [1, 1]} : vector<16x8xf32> to vector<1x8xf32>
    %692 = vector.extract_strided_slice %685 {offsets = [12, 0], sizes = [1, 8], strides = [1, 1]} : vector<16x8xf32> to vector<1x8xf32>
    %693 = vector.extract_strided_slice %685 {offsets = [14, 0], sizes = [1, 8], strides = [1, 1]} : vector<16x8xf32> to vector<1x8xf32>
    %694 = tpu.concatenate %686, %687, %688, %689, %690, %691, %692, %693 in 0 : vector<1x8xf32>, vector<1x8xf32>, vector<1x8xf32>, vector<1x8xf32>, vector<1x8xf32>, vector<1x8xf32>, vector<1x8xf32>, vector<1x8xf32> -> vector<8x8xf32>
    %695 = vector.extract_strided_slice %685 {offsets = [1, 0], sizes = [1, 8], strides = [1, 1]} : vector<16x8xf32> to vector<1x8xf32>
    %696 = vector.extract_strided_slice %685 {offsets = [3, 0], sizes = [1, 8], strides = [1, 1]} : vector<16x8xf32> to vector<1x8xf32>
    %697 = vector.extract_strided_slice %685 {offsets = [5, 0], sizes = [1, 8], strides = [1, 1]} : vector<16x8xf32> to vector<1x8xf32>
    %698 = vector.extract_strided_slice %685 {offsets = [7, 0], sizes = [1, 8], strides = [1, 1]} : vector<16x8xf32> to vector<1x8xf32>
    %699 = vector.extract_strided_slice %685 {offsets = [9, 0], sizes = [1, 8], strides = [1, 1]} : vector<16x8xf32> to vector<1x8xf32>
    %700 = vector.extract_strided_slice %685 {offsets = [11, 0], sizes = [1, 8], strides = [1, 1]} : vector<16x8xf32> to vector<1x8xf32>
    %701 = vector.extract_strided_slice %685 {offsets = [13, 0], sizes = [1, 8], strides = [1, 1]} : vector<16x8xf32> to vector<1x8xf32>
    %702 = vector.extract_strided_slice %685 {offsets = [15, 0], sizes = [1, 8], strides = [1, 1]} : vector<16x8xf32> to vector<1x8xf32>
    %703 = tpu.concatenate %695, %696, %697, %698, %699, %700, %701, %702 in 0 : vector<1x8xf32>, vector<1x8xf32>, vector<1x8xf32>, vector<1x8xf32>, vector<1x8xf32>, vector<1x8xf32>, vector<1x8xf32>, vector<1x8xf32> -> vector<8x8xf32>
    %704 = tpu.concatenate %694, %703 in 1 : vector<8x8xf32>, vector<8x8xf32> -> vector<8x16xf32>
    %c5_128 = arith.constant 5 : index
    %c0_129 = arith.constant 0 : index
    %c0_130 = arith.constant 0 : index
    %705 = vector.load %arg11[%c5_128, %c0_129, %c0_130] : memref<8x8x16xf32, #tpu.memory_space<vmem>>, vector<1x8x16xf32>
    %706 = vector.shape_cast %705 : vector<1x8x16xf32> to vector<8x16xf32>
    %707 = vector.shape_cast %704 : vector<8x16xf32> to vector<1x8x16xf32>
    tpu.vector_store %arg11[%c5_128, %c0_129, %c0_130], %707 {strides = array<i32>} : memref<8x8x16xf32, #tpu.memory_space<vmem>>, vector<1x8x16xf32>,
    %c6_131 = arith.constant 6 : index
    %c0_132 = arith.constant 0 : index
    %c0_133 = arith.constant 0 : index
    %708 = vector.load %arg11[%c6_131, %c0_132, %c0_133] : memref<8x8x16xf32, #tpu.memory_space<vmem>>, vector<1x8x16xf32>
    %709 = vector.shape_cast %708 : vector<1x8x16xf32> to vector<8x16xf32>
    %710 = vector.extract_strided_slice %709 {offsets = [0, 0], sizes = [7, 16], strides = [1, 1]} : vector<8x16xf32> to vector<7x16xf32>
    %711 = tpu.concatenate %9, %710 in 0 : vector<1x16xf32>, vector<7x16xf32> -> vector<8x16xf32>
    %712 = vector.extract_strided_slice %684 {offsets = [0, 0], sizes = [7, 16], strides = [1, 1]} : vector<8x16xf32> to vector<7x16xf32>
    %713 = tpu.concatenate %9, %712 in 0 : vector<1x16xf32>, vector<7x16xf32> -> vector<8x16xf32>
    %714 = vector.extract_strided_slice %684 {offsets = [1, 0], sizes = [7, 16], strides = [1, 1]} : vector<8x16xf32> to vector<7x16xf32>
    %715 = tpu.concatenate %714, %9 in 0 : vector<7x16xf32>, vector<1x16xf32> -> vector<8x16xf32>
    %716 = tpu.concatenate %711, %709, %713, %684, %715 in 1 : vector<8x16xf32>, vector<8x16xf32>, vector<8x16xf32>, vector<8x16xf32>, vector<8x16xf32> -> vector<8x80xf32>
    %cst_134 = arith.constant dense<0.000000e+00> : vector<8x64xf32>
    %717 = tpu.matmul %716, %409, %cst_134 {dimension_numbers = #tpu.dot_dimension_numbers<[1], [0], [0], [1], [0, 0, 1, 1], [], []>} : vector<8x80xf32>, vector<80x64xf32>, vector<8x64xf32> -> vector<8x64xf32>
    %718 = vector.broadcast %411 : vector<1x64xf32> to vector<8x64xf32>
    %719 = arith.addf %717, %718 : vector<8x64xf32>
    %720 = arith.negf %719 : vector<8x64xf32>
    %721 = math.exp %720 : vector<8x64xf32>
    %cst_135 = arith.constant 1.000000e+00 : f32
    %722 = vector.broadcast %cst_135 : f32 to vector<8x64xf32>
    %723 = arith.addf %722, %721 : vector<8x64xf32>
    %724 = arith.divf %722, %723 : vector<8x64xf32>
    %725 = vector.extract_strided_slice %724 {offsets = [0, 0], sizes = [8, 16], strides = [1, 1]} : vector<8x64xf32> to vector<8x16xf32>
    %726 = vector.extract_strided_slice %724 {offsets = [0, 16], sizes = [8, 16], strides = [1, 1]} : vector<8x64xf32> to vector<8x16xf32>
    %727 = vector.extract_strided_slice %724 {offsets = [0, 32], sizes = [8, 16], strides = [1, 1]} : vector<8x64xf32> to vector<8x16xf32>
    %728 = vector.extract_strided_slice %724 {offsets = [0, 48], sizes = [8, 16], strides = [1, 1]} : vector<8x64xf32> to vector<8x16xf32>
    %729 = arith.mulf %727, %682 : vector<8x16xf32>
    %730 = arith.mulf %725, %726 : vector<8x16xf32>
    %731 = arith.addf %729, %730 : vector<8x16xf32>
    %732 = math.tanh %731 : vector<8x16xf32>
    %733 = arith.mulf %728, %732 : vector<8x16xf32>
    %734 = tpu.transpose %733, [1, 0] : vector<8x16xf32> -> vector<16x8xf32>
    %735 = vector.extract_strided_slice %734 {offsets = [0, 0], sizes = [1, 8], strides = [1, 1]} : vector<16x8xf32> to vector<1x8xf32>
    %736 = vector.extract_strided_slice %734 {offsets = [2, 0], sizes = [1, 8], strides = [1, 1]} : vector<16x8xf32> to vector<1x8xf32>
    %737 = vector.extract_strided_slice %734 {offsets = [4, 0], sizes = [1, 8], strides = [1, 1]} : vector<16x8xf32> to vector<1x8xf32>
    %738 = vector.extract_strided_slice %734 {offsets = [6, 0], sizes = [1, 8], strides = [1, 1]} : vector<16x8xf32> to vector<1x8xf32>
    %739 = vector.extract_strided_slice %734 {offsets = [8, 0], sizes = [1, 8], strides = [1, 1]} : vector<16x8xf32> to vector<1x8xf32>
    %740 = vector.extract_strided_slice %734 {offsets = [10, 0], sizes = [1, 8], strides = [1, 1]} : vector<16x8xf32> to vector<1x8xf32>
    %741 = vector.extract_strided_slice %734 {offsets = [12, 0], sizes = [1, 8], strides = [1, 1]} : vector<16x8xf32> to vector<1x8xf32>
    %742 = vector.extract_strided_slice %734 {offsets = [14, 0], sizes = [1, 8], strides = [1, 1]} : vector<16x8xf32> to vector<1x8xf32>
    %743 = tpu.concatenate %735, %736, %737, %738, %739, %740, %741, %742 in 0 : vector<1x8xf32>, vector<1x8xf32>, vector<1x8xf32>, vector<1x8xf32>, vector<1x8xf32>, vector<1x8xf32>, vector<1x8xf32>, vector<1x8xf32> -> vector<8x8xf32>
    %744 = vector.extract_strided_slice %734 {offsets = [1, 0], sizes = [1, 8], strides = [1, 1]} : vector<16x8xf32> to vector<1x8xf32>
    %745 = vector.extract_strided_slice %734 {offsets = [3, 0], sizes = [1, 8], strides = [1, 1]} : vector<16x8xf32> to vector<1x8xf32>
    %746 = vector.extract_strided_slice %734 {offsets = [5, 0], sizes = [1, 8], strides = [1, 1]} : vector<16x8xf32> to vector<1x8xf32>
    %747 = vector.extract_strided_slice %734 {offsets = [7, 0], sizes = [1, 8], strides = [1, 1]} : vector<16x8xf32> to vector<1x8xf32>
    %748 = vector.extract_strided_slice %734 {offsets = [9, 0], sizes = [1, 8], strides = [1, 1]} : vector<16x8xf32> to vector<1x8xf32>
    %749 = vector.extract_strided_slice %734 {offsets = [11, 0], sizes = [1, 8], strides = [1, 1]} : vector<16x8xf32> to vector<1x8xf32>
    %750 = vector.extract_strided_slice %734 {offsets = [13, 0], sizes = [1, 8], strides = [1, 1]} : vector<16x8xf32> to vector<1x8xf32>
    %751 = vector.extract_strided_slice %734 {offsets = [15, 0], sizes = [1, 8], strides = [1, 1]} : vector<16x8xf32> to vector<1x8xf32>
    %752 = tpu.concatenate %744, %745, %746, %747, %748, %749, %750, %751 in 0 : vector<1x8xf32>, vector<1x8xf32>, vector<1x8xf32>, vector<1x8xf32>, vector<1x8xf32>, vector<1x8xf32>, vector<1x8xf32>, vector<1x8xf32> -> vector<8x8xf32>
    %753 = tpu.concatenate %743, %752 in 1 : vector<8x8xf32>, vector<8x8xf32> -> vector<8x16xf32>
    %c6_136 = arith.constant 6 : index
    %c0_137 = arith.constant 0 : index
    %c0_138 = arith.constant 0 : index
    %754 = vector.load %arg11[%c6_136, %c0_137, %c0_138] : memref<8x8x16xf32, #tpu.memory_space<vmem>>, vector<1x8x16xf32>
    %755 = vector.shape_cast %754 : vector<1x8x16xf32> to vector<8x16xf32>
    %756 = vector.shape_cast %753 : vector<8x16xf32> to vector<1x8x16xf32>
    tpu.vector_store %arg11[%c6_136, %c0_137, %c0_138], %756 {strides = array<i32>} : memref<8x8x16xf32, #tpu.memory_space<vmem>>, vector<1x8x16xf32>,
    %c7_139 = arith.constant 7 : index
    %c0_140 = arith.constant 0 : index
    %c0_141 = arith.constant 0 : index
    %757 = vector.load %arg11[%c7_139, %c0_140, %c0_141] : memref<8x8x16xf32, #tpu.memory_space<vmem>>, vector<1x8x16xf32>
    %758 = vector.shape_cast %757 : vector<1x8x16xf32> to vector<8x16xf32>
    %759 = vector.extract_strided_slice %758 {offsets = [0, 0], sizes = [7, 16], strides = [1, 1]} : vector<8x16xf32> to vector<7x16xf32>
    %760 = tpu.concatenate %9, %759 in 0 : vector<1x16xf32>, vector<7x16xf32> -> vector<8x16xf32>
    %761 = vector.extract_strided_slice %733 {offsets = [0, 0], sizes = [7, 16], strides = [1, 1]} : vector<8x16xf32> to vector<7x16xf32>
    %762 = tpu.concatenate %9, %761 in 0 : vector<1x16xf32>, vector<7x16xf32> -> vector<8x16xf32>
    %763 = vector.extract_strided_slice %733 {offsets = [1, 0], sizes = [7, 16], strides = [1, 1]} : vector<8x16xf32> to vector<7x16xf32>
    %764 = tpu.concatenate %763, %9 in 0 : vector<7x16xf32>, vector<1x16xf32> -> vector<8x16xf32>
    %765 = tpu.concatenate %760, %758, %762, %733, %764 in 1 : vector<8x16xf32>, vector<8x16xf32>, vector<8x16xf32>, vector<8x16xf32>, vector<8x16xf32> -> vector<8x80xf32>
    %cst_142 = arith.constant dense<0.000000e+00> : vector<8x64xf32>
    %766 = tpu.matmul %765, %409, %cst_142 {dimension_numbers = #tpu.dot_dimension_numbers<[1], [0], [0], [1], [0, 0, 1, 1], [], []>} : vector<8x80xf32>, vector<80x64xf32>, vector<8x64xf32> -> vector<8x64xf32>
    %767 = vector.broadcast %411 : vector<1x64xf32> to vector<8x64xf32>
    %768 = arith.addf %766, %767 : vector<8x64xf32>
    %769 = arith.negf %768 : vector<8x64xf32>
    %770 = math.exp %769 : vector<8x64xf32>
    %cst_143 = arith.constant 1.000000e+00 : f32
    %771 = vector.broadcast %cst_143 : f32 to vector<8x64xf32>
    %772 = arith.addf %771, %770 : vector<8x64xf32>
    %773 = arith.divf %771, %772 : vector<8x64xf32>
    %774 = vector.extract_strided_slice %773 {offsets = [0, 0], sizes = [8, 16], strides = [1, 1]} : vector<8x64xf32> to vector<8x16xf32>
    %775 = vector.extract_strided_slice %773 {offsets = [0, 16], sizes = [8, 16], strides = [1, 1]} : vector<8x64xf32> to vector<8x16xf32>
    %776 = vector.extract_strided_slice %773 {offsets = [0, 32], sizes = [8, 16], strides = [1, 1]} : vector<8x64xf32> to vector<8x16xf32>
    %777 = vector.extract_strided_slice %773 {offsets = [0, 48], sizes = [8, 16], strides = [1, 1]} : vector<8x64xf32> to vector<8x16xf32>
    %778 = arith.mulf %776, %731 : vector<8x16xf32>
    %779 = arith.mulf %774, %775 : vector<8x16xf32>
    %780 = arith.addf %778, %779 : vector<8x16xf32>
    %781 = math.tanh %780 : vector<8x16xf32>
    %782 = arith.mulf %777, %781 : vector<8x16xf32>
    %783 = tpu.transpose %782, [1, 0] : vector<8x16xf32> -> vector<16x8xf32>
    %784 = vector.extract_strided_slice %783 {offsets = [0, 0], sizes = [1, 8], strides = [1, 1]} : vector<16x8xf32> to vector<1x8xf32>
    %785 = vector.extract_strided_slice %783 {offsets = [2, 0], sizes = [1, 8], strides = [1, 1]} : vector<16x8xf32> to vector<1x8xf32>
    %786 = vector.extract_strided_slice %783 {offsets = [4, 0], sizes = [1, 8], strides = [1, 1]} : vector<16x8xf32> to vector<1x8xf32>
    %787 = vector.extract_strided_slice %783 {offsets = [6, 0], sizes = [1, 8], strides = [1, 1]} : vector<16x8xf32> to vector<1x8xf32>
    %788 = vector.extract_strided_slice %783 {offsets = [8, 0], sizes = [1, 8], strides = [1, 1]} : vector<16x8xf32> to vector<1x8xf32>
    %789 = vector.extract_strided_slice %783 {offsets = [10, 0], sizes = [1, 8], strides = [1, 1]} : vector<16x8xf32> to vector<1x8xf32>
    %790 = vector.extract_strided_slice %783 {offsets = [12, 0], sizes = [1, 8], strides = [1, 1]} : vector<16x8xf32> to vector<1x8xf32>
    %791 = vector.extract_strided_slice %783 {offsets = [14, 0], sizes = [1, 8], strides = [1, 1]} : vector<16x8xf32> to vector<1x8xf32>
    %792 = tpu.concatenate %784, %785, %786, %787, %788, %789, %790, %791 in 0 : vector<1x8xf32>, vector<1x8xf32>, vector<1x8xf32>, vector<1x8xf32>, vector<1x8xf32>, vector<1x8xf32>, vector<1x8xf32>, vector<1x8xf32> -> vector<8x8xf32>
    %793 = vector.extract_strided_slice %783 {offsets = [1, 0], sizes = [1, 8], strides = [1, 1]} : vector<16x8xf32> to vector<1x8xf32>
    %794 = vector.extract_strided_slice %783 {offsets = [3, 0], sizes = [1, 8], strides = [1, 1]} : vector<16x8xf32> to vector<1x8xf32>
    %795 = vector.extract_strided_slice %783 {offsets = [5, 0], sizes = [1, 8], strides = [1, 1]} : vector<16x8xf32> to vector<1x8xf32>
    %796 = vector.extract_strided_slice %783 {offsets = [7, 0], sizes = [1, 8], strides = [1, 1]} : vector<16x8xf32> to vector<1x8xf32>
    %797 = vector.extract_strided_slice %783 {offsets = [9, 0], sizes = [1, 8], strides = [1, 1]} : vector<16x8xf32> to vector<1x8xf32>
    %798 = vector.extract_strided_slice %783 {offsets = [11, 0], sizes = [1, 8], strides = [1, 1]} : vector<16x8xf32> to vector<1x8xf32>
    %799 = vector.extract_strided_slice %783 {offsets = [13, 0], sizes = [1, 8], strides = [1, 1]} : vector<16x8xf32> to vector<1x8xf32>
    %800 = vector.extract_strided_slice %783 {offsets = [15, 0], sizes = [1, 8], strides = [1, 1]} : vector<16x8xf32> to vector<1x8xf32>
    %801 = tpu.concatenate %793, %794, %795, %796, %797, %798, %799, %800 in 0 : vector<1x8xf32>, vector<1x8xf32>, vector<1x8xf32>, vector<1x8xf32>, vector<1x8xf32>, vector<1x8xf32>, vector<1x8xf32>, vector<1x8xf32> -> vector<8x8xf32>
    %802 = tpu.concatenate %792, %801 in 1 : vector<8x8xf32>, vector<8x8xf32> -> vector<8x16xf32>
    %c7_144 = arith.constant 7 : index
    %c0_145 = arith.constant 0 : index
    %c0_146 = arith.constant 0 : index
    %803 = vector.load %arg11[%c7_144, %c0_145, %c0_146] : memref<8x8x16xf32, #tpu.memory_space<vmem>>, vector<1x8x16xf32>
    %804 = vector.shape_cast %803 : vector<1x8x16xf32> to vector<8x16xf32>
    %805 = vector.shape_cast %802 : vector<8x16xf32> to vector<1x8x16xf32>
    tpu.vector_store %arg11[%c7_144, %c0_145, %c0_146], %805 {strides = array<i32>} : memref<8x8x16xf32, #tpu.memory_space<vmem>>, vector<1x8x16xf32>,
    %c0_147 = arith.constant 0 : index
    %c0_148 = arith.constant 0 : index
    %c0_149 = arith.constant 0 : index
    %806 = vector.load %arg11[%c0_147, %c0_148, %c0_149] : memref<8x8x16xf32, #tpu.memory_space<vmem>>, vector<8x8x16xf32>
    %807 = vector.shape_cast %806 : vector<8x8x16xf32> to vector<64x16xf32>
    %c0_150 = arith.constant 0 : index
    %c0_151 = arith.constant 0 : index
    %808 = vector.load %arg6[%c0_150, %c0_151] : memref<16x32xf32, #tpu.memory_space<vmem>>, vector<16x32xf32>
    %cst_152 = arith.constant dense<0.000000e+00> : vector<64x32xf32>
    %809 = tpu.matmul %807, %808, %cst_152 {dimension_numbers = #tpu.dot_dimension_numbers<[1], [0], [0], [1], [0, 0, 1, 1], [], []>} : vector<64x16xf32>, vector<16x32xf32>, vector<64x32xf32> -> vector<64x32xf32>
    %c0_153 = arith.constant 0 : index
    %c0_154 = arith.constant 0 : index
    %810 = vector.load %arg7[%c0_153, %c0_154] : memref<1x32xf32, #tpu.memory_space<vmem>>, vector<1x32xf32>
    %811 = vector.broadcast %810 : vector<1x32xf32> to vector<64x32xf32>
    %812 = arith.addf %809, %811 : vector<64x32xf32>
    %cst_155 = arith.constant 0.000000e+00 : f32
    %813 = vector.broadcast %cst_155 : f32 to vector<64x32xf32>
    %814 = arith.maximumf %812, %813 : vector<64x32xf32>
    %c0_156 = arith.constant 0 : index
    %c0_157 = arith.constant 0 : index
    %815 = vector.load %arg8[%c0_156, %c0_157] : memref<32x32xf32, #tpu.memory_space<vmem>>, vector<32x32xf32>
    %cst_158 = arith.constant dense<0.000000e+00> : vector<64x32xf32>
    %816 = tpu.matmul %814, %815, %cst_158 {dimension_numbers = #tpu.dot_dimension_numbers<[1], [0], [0], [1], [0, 0, 1, 1], [], []>} : vector<64x32xf32>, vector<32x32xf32>, vector<64x32xf32> -> vector<64x32xf32>
    %c0_159 = arith.constant 0 : index
    %c0_160 = arith.constant 0 : index
    %817 = vector.load %arg9[%c0_159, %c0_160] : memref<1x32xf32, #tpu.memory_space<vmem>>, vector<1x32xf32>
    %818 = vector.broadcast %817 : vector<1x32xf32> to vector<64x32xf32>
    %819 = arith.addf %816, %818 : vector<64x32xf32>
    %820 = arith.negf %819 : vector<64x32xf32>
    %821 = math.exp %820 : vector<64x32xf32>
    %cst_161 = arith.constant 1.000000e+00 : f32
    %822 = vector.broadcast %cst_161 : f32 to vector<64x32xf32>
    %823 = arith.addf %822, %821 : vector<64x32xf32>
    %824 = arith.divf %822, %823 : vector<64x32xf32>
    %c0_162 = arith.constant 0 : index
    %c0_163 = arith.constant 0 : index
    %c0_164 = arith.constant 0 : index
    %825 = vector.load %arg10[%c0_162, %c0_163, %c0_164] : memref<1x64x32xf32, #tpu.memory_space<vmem>>, vector<1x64x32xf32>
    %826 = vector.shape_cast %825 : vector<1x64x32xf32> to vector<64x32xf32>
    %827 = vector.shape_cast %824 : vector<64x32xf32> to vector<1x64x32xf32>
    tpu.vector_store %arg10[%c0_162, %c0_163, %c0_164], %827 {strides = array<i32>} : memref<1x64x32xf32, #tpu.memory_space<vmem>>, vector<1x64x32xf32>,
    return
  }
  func.func @transform_0(%arg0: i32) -> (i32, i32, i32) {
    %c0_i32 = arith.constant 0 : i32
    %c0_i32_0 = arith.constant 0 : i32
    %c0_i32_1 = arith.constant 0 : i32
    return %arg0, %c0_i32, %c0_i32_0 : i32, i32, i32
  }
  func.func @transform_1(%arg0: i32) -> (i32, i32) {
    %c0_i32 = arith.constant 0 : i32
    %c0_i32_0 = arith.constant 0 : i32
    %c0_i32_1 = arith.constant 0 : i32
    return %c0_i32, %c0_i32_0 : i32, i32
  }
  func.func @transform_2(%arg0: i32) -> (i32, i32) {
    %c0_i32 = arith.constant 0 : i32
    %c0_i32_0 = arith.constant 0 : i32
    %c0_i32_1 = arith.constant 0 : i32
    return %c0_i32, %c0_i32_0 : i32, i32
  }
  func.func @transform_3(%arg0: i32) -> (i32, i32, i32) {
    %c0_i32 = arith.constant 0 : i32
    %c0_i32_0 = arith.constant 0 : i32
    %c0_i32_1 = arith.constant 0 : i32
    %c0_i32_2 = arith.constant 0 : i32
    return %c0_i32, %c0_i32_0, %c0_i32_1 : i32, i32, i32
  }
  func.func @transform_4(%arg0: i32) -> (i32, i32, i32) {
    %c0_i32 = arith.constant 0 : i32
    %c0_i32_0 = arith.constant 0 : i32
    %c0_i32_1 = arith.constant 0 : i32
    %c0_i32_2 = arith.constant 0 : i32
    return %c0_i32, %c0_i32_0, %c0_i32_1 : i32, i32, i32
  }
  func.func @transform_5(%arg0: i32) -> (i32, i32) {
    %c0_i32 = arith.constant 0 : i32
    %c0_i32_0 = arith.constant 0 : i32
    %c0_i32_1 = arith.constant 0 : i32
    return %c0_i32, %c0_i32_0 : i32, i32
  }
  func.func @transform_6(%arg0: i32) -> (i32, i32) {
    %c0_i32 = arith.constant 0 : i32
    %c0_i32_0 = arith.constant 0 : i32
    %c0_i32_1 = arith.constant 0 : i32
    return %c0_i32, %c0_i32_0 : i32, i32
  }
  func.func @transform_7(%arg0: i32) -> (i32, i32) {
    %c0_i32 = arith.constant 0 : i32
    %c0_i32_0 = arith.constant 0 : i32
    %c0_i32_1 = arith.constant 0 : i32
    return %c0_i32, %c0_i32_0 : i32, i32
  }
  func.func @transform_8(%arg0: i32) -> (i32, i32) {
    %c0_i32 = arith.constant 0 : i32
    %c0_i32_0 = arith.constant 0 : i32
    %c0_i32_1 = arith.constant 0 : i32
    return %c0_i32, %c0_i32_0 : i32, i32
  }
  func.func @transform_9(%arg0: i32) -> (i32, i32, i32) {
    %c0_i32 = arith.constant 0 : i32
    %c0_i32_0 = arith.constant 0 : i32
    %c0_i32_1 = arith.constant 0 : i32
    return %arg0, %c0_i32, %c0_i32_0 : i32, i32, i32
  }
}

</mosaic_0001>

<bundles_post_ra>
// kernel: mul.9
= control target key start
LH: loop header
LB: loop body
LE: loop exit
PB: predicated region body
PF: predicated region fallthrough
CT: control target
= control target key end

     0   :  { %s2168_s0 = inlined_call_operand.vmem [shape: f32[16,32,7,7], index: 0, kind: input, shape index: {}]   ;;  %s2169_s1 = inlined_call_operand.vmem [shape: f32[16,32,7,7], index: 1, kind: input, shape index: {}]   ;;  %s2170_s2 = inlined_call_operand.vmem [shape: f32[16,32,7,7], index: 2, kind: output, shape index: {}]  }
   0x1   :  { %v3_v0 = vld [vmem:[%s2168_s0] sm:$0xff]  ;;  %v980_v2 = vld [vmem:[%s2168_s0 + $0x70] sm:$0xff] }
   0x2   :  { %v4_v1 = vld [vmem:[%s2169_s1] sm:$0xff]  ;;  %v981_v4 = vld [vmem:[%s2169_s1 + $0x70] sm:$0xff] }
   0x3   :  { %v7_v3 = vmul.f32 %v4_v1, %v3_v0  ;;  %v983_v5 = vld [vmem:[%s2168_s0 + $0xe0] sm:$0xff]  ;;  %v16_v7 = vmul.f32 %v981_v4, %v980_v2  ;;  %v986_v9 = vld [vmem:[%s2168_s0 + $0x150] sm:$0xff] }
   0x4   :  { %v984_v6 = vld [vmem:[%s2169_s1 + $0xe0] sm:$0xff]  ;;  %v987_v10 = vld [vmem:[%s2169_s1 + $0x150] sm:$0xff] }
   0x5   :  { %v26_v8 = vmul.f32 %v984_v6, %v983_v5  ;;  %v989_v11 = vld [vmem:[%s2168_s0 + $0x1c0] sm:$0xff]  ;;  %9 = vst [vmem:[%s2170_s2] sm:$0xff] %v7_v3  ;;  %v36_v12 = vmul.f32 %v987_v10, %v986_v9  ;;  %v992_v14 = vld [vmem:[%s2168_s0 + $0x230] sm:$0xff]  ;;  %982 = vst [vmem:[%s2170_s2 + $0x70] sm:$0xff] %v16_v7 }
   0x6   :  { %v990_v13 = vld [vmem:[%s2169_s1 + $0x1c0] sm:$0xff]  ;;  %v993_v15 = vld [vmem:[%s2169_s1 + $0x230] sm:$0xff] }
   0x7   :  { %985 = vst [vmem:[%s2170_s2 + $0xe0] sm:$0xff] %v26_v8  ;;  %v46_v16 = vmul.f32 %v990_v13, %v989_v11  ;;  %v56_v17 = vmul.f32 %v993_v15, %v992_v14  ;;  %v995_v18 = vld [vmem:[%s2168_s0 + $0x2a0] sm:$0xff]  ;;  %v998_v20 = vld [vmem:[%s2168_s0 + $0x10] sm:$0xff]  ;;  %988 = vst [vmem:[%s2170_s2 + $0x150] sm:$0xff] %v36_v12 }
   0x8   :  { %v996_v19 = vld [vmem:[%s2169_s1 + $0x2a0] sm:$0xff]  ;;  %v999_v22 = vld [vmem:[%s2169_s1 + $0x10] sm:$0xff] }
   0x9   :  { %v66_v21 = vmul.f32 %v996_v19, %v995_v18  ;;  %v1001_v23 = vld [vmem:[%s2168_s0 + $0x80] sm:$0xff]  ;;  %991 = vst [vmem:[%s2170_s2 + $0x1c0] sm:$0xff] %v46_v16  ;;  %994 = vst [vmem:[%s2170_s2 + $0x230] sm:$0xff] %v56_v17  ;;  %v76_v25 = vmul.f32 %v999_v22, %v998_v20  ;;  %v1004_v27 = vld [vmem:[%s2168_s0 + $0xf0] sm:$0xff] }
   0xa   :  { %v1002_v24 = vld [vmem:[%s2169_s1 + $0x80] sm:$0xff]  ;;  %v1005_v28 = vld [vmem:[%s2169_s1 + $0xf0] sm:$0xff] }
   0xb   :  { %v86_v26 = vmul.f32 %v1002_v24, %v1001_v23  ;;  %v1007_v29 = vld [vmem:[%s2168_s0 + $0x160] sm:$0xff]  ;;  %997 = vst [vmem:[%s2170_s2 + $0x2a0] sm:$0xff] %v66_v21  ;;  %v96_v30 = vmul.f32 %v1005_v28, %v1004_v27  ;;  %v1010_v32 = vld [vmem:[%s2168_s0 + $0x1d0] sm:$0xff]  ;;  %1000 = vst [vmem:[%s2170_s2 + $0x10] sm:$0xff] %v76_v25 }
   0xc   :  { %v1008_v31 = vld [vmem:[%s2169_s1 + $0x160] sm:$0xff]  ;;  %v1011_v33 = vld [vmem:[%s2169_s1 + $0x1d0] sm:$0xff] }
   0xd   :  { %1003 = vst [vmem:[%s2170_s2 + $0x80] sm:$0xff] %v86_v26  ;;  %v106_v34 = vmul.f32 %v1008_v31, %v1007_v29  ;;  %v116_v35 = vmul.f32 %v1011_v33, %v1010_v32  ;;  %v1013_v36 = vld [vmem:[%s2168_s0 + $0x240] sm:$0xff]  ;;  %v1016_v38 = vld [vmem:[%s2168_s0 + $0x2b0] sm:$0xff]  ;;  %1006 = vst [vmem:[%s2170_s2 + $0xf0] sm:$0xff] %v96_v30 }
   0xe   :  { %v1014_v37 = vld [vmem:[%s2169_s1 + $0x240] sm:$0xff]  ;;  %v1017_v40 = vld [vmem:[%s2169_s1 + $0x2b0] sm:$0xff] }
   0xf   :  { %v126_v39 = vmul.f32 %v1014_v37, %v1013_v36  ;;  %v1019_v41 = vld [vmem:[%s2168_s0 + $0x20] sm:$0xff]  ;;  %1009 = vst [vmem:[%s2170_s2 + $0x160] sm:$0xff] %v106_v34  ;;  %1012 = vst [vmem:[%s2170_s2 + $0x1d0] sm:$0xff] %v116_v35  ;;  %v136_v43 = vmul.f32 %v1017_v40, %v1016_v38  ;;  %v1022_v45 = vld [vmem:[%s2168_s0 + $0x90] sm:$0xff] }
  0x10   :  { %v1020_v42 = vld [vmem:[%s2169_s1 + $0x20] sm:$0xff]  ;;  %v1023_v46 = vld [vmem:[%s2169_s1 + $0x90] sm:$0xff] }
  0x11   :  { %v146_v44 = vmul.f32 %v1020_v42, %v1019_v41  ;;  %v1025_v47 = vld [vmem:[%s2168_s0 + $0x100] sm:$0xff]  ;;  %1015 = vst [vmem:[%s2170_s2 + $0x240] sm:$0xff] %v126_v39  ;;  %v156_v48 = vmul.f32 %v1023_v46, %v1022_v45  ;;  %v1028_v50 = vld [vmem:[%s2168_s0 + $0x170] sm:$0xff]  ;;  %1018 = vst [vmem:[%s2170_s2 + $0x2b0] sm:$0xff] %v136_v43 }
  0x12   :  { %v1026_v49 = vld [vmem:[%s2169_s1 + $0x100] sm:$0xff]  ;;  %v1029_v51 = vld [vmem:[%s2169_s1 + $0x170] sm:$0xff] }
  0x13   :  { %1021 = vst [vmem:[%s2170_s2 + $0x20] sm:$0xff] %v146_v44  ;;  %v166_v52 = vmul.f32 %v1026_v49, %v1025_v47  ;;  %v176_v53 = vmul.f32 %v1029_v51, %v1028_v50  ;;  %v1031_v54 = vld [vmem:[%s2168_s0 + $0x1e0] sm:$0xff]  ;;  %v1034_v56 = vld [vmem:[%s2168_s0 + $0x250] sm:$0xff]  ;;  %1024 = vst [vmem:[%s2170_s2 + $0x90] sm:$0xff] %v156_v48 }
  0x14   :  { %v1032_v55 = vld [vmem:[%s2169_s1 + $0x1e0] sm:$0xff]  ;;  %v1035_v58 = vld [vmem:[%s2169_s1 + $0x250] sm:$0xff] }
  0x15   :  { %v186_v57 = vmul.f32 %v1032_v55, %v1031_v54  ;;  %v1037_v59 = vld [vmem:[%s2168_s0 + $0x2c0] sm:$0xff]  ;;  %1027 = vst [vmem:[%s2170_s2 + $0x100] sm:$0xff] %v166_v52  ;;  %1030 = vst [vmem:[%s2170_s2 + $0x170] sm:$0xff] %v176_v53  ;;  %v196_v61 = vmul.f32 %v1035_v58, %v1034_v56  ;;  %v1040_v63 = vld [vmem:[%s2168_s0 + $0x30] sm:$0xff] }
  0x16   :  { %v1038_v60 = vld [vmem:[%s2169_s1 + $0x2c0] sm:$0xff]  ;;  %v1041_v0 = vld [vmem:[%s2169_s1 + $0x30] sm:$0xff] }
  0x17   :  { %v206_v62 = vmul.f32 %v1038_v60, %v1037_v59  ;;  %v1043_v1 = vld [vmem:[%s2168_s0 + $0xa0] sm:$0xff]  ;;  %1033 = vst [vmem:[%s2170_s2 + $0x1e0] sm:$0xff] %v186_v57  ;;  %v216_v2 = vmul.f32 %v1041_v0, %v1040_v63  ;;  %v1046_v4 = vld [vmem:[%s2168_s0 + $0x110] sm:$0xff]  ;;  %1036 = vst [vmem:[%s2170_s2 + $0x250] sm:$0xff] %v196_v61 }
  0x18   :  { %v1044_v3 = vld [vmem:[%s2169_s1 + $0xa0] sm:$0xff]  ;;  %v1047_v5 = vld [vmem:[%s2169_s1 + $0x110] sm:$0xff] }
  0x19   :  { %1039 = vst [vmem:[%s2170_s2 + $0x2c0] sm:$0xff] %v206_v62  ;;  %v226_v6 = vmul.f32 %v1044_v3, %v1043_v1  ;;  %v236_v7 = vmul.f32 %v1047_v5, %v1046_v4  ;;  %v1049_v8 = vld [vmem:[%s2168_s0 + $0x180] sm:$0xff]  ;;  %v1052_v10 = vld [vmem:[%s2168_s0 + $0x1f0] sm:$0xff]  ;;  %1042 = vst [vmem:[%s2170_s2 + $0x30] sm:$0xff] %v216_v2 }
  0x1a   :  { %v1050_v9 = vld [vmem:[%s2169_s1 + $0x180] sm:$0xff]  ;;  %v1053_v12 = vld [vmem:[%s2169_s1 + $0x1f0] sm:$0xff] }
  0x1b   :  { %v246_v11 = vmul.f32 %v1050_v9, %v1049_v8  ;;  %v1055_v13 = vld [vmem:[%s2168_s0 + $0x260] sm:$0xff]  ;;  %1045 = vst [vmem:[%s2170_s2 + $0xa0] sm:$0xff] %v226_v6  ;;  %1048 = vst [vmem:[%s2170_s2 + $0x110] sm:$0xff] %v236_v7  ;;  %v256_v15 = vmul.f32 %v1053_v12, %v1052_v10  ;;  %v1058_v17 = vld [vmem:[%s2168_s0 + $0x2d0] sm:$0xff] }
  0x1c   :  { %v1056_v14 = vld [vmem:[%s2169_s1 + $0x260] sm:$0xff]  ;;  %v1059_v18 = vld [vmem:[%s2169_s1 + $0x2d0] sm:$0xff] }
  0x1d   :  { %v266_v16 = vmul.f32 %v1056_v14, %v1055_v13  ;;  %v1061_v19 = vld [vmem:[%s2168_s0 + $0x40] sm:$0xff]  ;;  %1051 = vst [vmem:[%s2170_s2 + $0x180] sm:$0xff] %v246_v11  ;;  %v276_v20 = vmul.f32 %v1059_v18, %v1058_v17  ;;  %v1064_v22 = vld [vmem:[%s2168_s0 + $0xb0] sm:$0xff]  ;;  %1054 = vst [vmem:[%s2170_s2 + $0x1f0] sm:$0xff] %v256_v15 }
  0x1e   :  { %v1062_v21 = vld [vmem:[%s2169_s1 + $0x40] sm:$0xff]  ;;  %v1065_v23 = vld [vmem:[%s2169_s1 + $0xb0] sm:$0xff]  ;;  %v1124_v18 = vld [vmem:[%s2168_s0 + $0x8] sm:$0xff] }
  0x1f   :  { %1057 = vst [vmem:[%s2170_s2 + $0x260] sm:$0xff] %v266_v16  ;;  %v286_v24 = vmul.f32 %v1062_v21, %v1061_v19  ;;  %v296_v25 = vmul.f32 %v1065_v23, %v1064_v22  ;;  %v1067_v26 = vld [vmem:[%s2168_s0 + $0x120] sm:$0xff]  ;;  %v1070_v28 = vld [vmem:[%s2168_s0 + $0x190] sm:$0xff]  ;;  %1060 = vst [vmem:[%s2170_s2 + $0x2d0] sm:$0xff] %v276_v20 }
  0x20   :  { %v1068_v27 = vld [vmem:[%s2169_s1 + $0x120] sm:$0xff]  ;;  %v1071_v30 = vld [vmem:[%s2169_s1 + $0x190] sm:$0xff]  ;;  %v1125_v20 = vld [vmem:[%s2169_s1 + $0x8] sm:$0xff] }
  0x21   :  { %v306_v29 = vmul.f32 %v1068_v27, %v1067_v26  ;;  %v1073_v31 = vld [vmem:[%s2168_s0 + $0x200] sm:$0xff]  ;;  %1063 = vst [vmem:[%s2170_s2 + $0x40] sm:$0xff] %v286_v24  ;;  %1066 = vst [vmem:[%s2170_s2 + $0xb0] sm:$0xff] %v296_v25  ;;  %v316_v33 = vmul.f32 %v1071_v30, %v1070_v28  ;;  %v1076_v35 = vld [vmem:[%s2168_s0 + $0x270] sm:$0xff]  ;;  %v496_v23 = vmul.f32 %v1125_v20, %v1124_v18 }
  0x22   :  { %v1074_v32 = vld [vmem:[%s2169_s1 + $0x200] sm:$0xff]  ;;  %v1077_v36 = vld [vmem:[%s2169_s1 + $0x270] sm:$0xff]  ;;  %v1127_v21 = vld [vmem:[%s2168_s0 + $0x78] sm:$0xff] }
  0x23   :  { %v326_v34 = vmul.f32 %v1074_v32, %v1073_v31  ;;  %v1079_v37 = vld [vmem:[%s2168_s0 + $0x2e0] sm:$0xff]  ;;  %1069 = vst [vmem:[%s2170_s2 + $0x120] sm:$0xff] %v306_v29  ;;  %v336_v38 = vmul.f32 %v1077_v36, %v1076_v35  ;;  %v1082_v40 = vld [vmem:[%s2168_s0 + $0x50] sm:$0xff]  ;;  %1072 = vst [vmem:[%s2170_s2 + $0x190] sm:$0xff] %v316_v33 }
  0x24   :  { %v1080_v39 = vld [vmem:[%s2169_s1 + $0x2e0] sm:$0xff]  ;;  %v1083_v41 = vld [vmem:[%s2169_s1 + $0x50] sm:$0xff]  ;;  %v1128_v22 = vld [vmem:[%s2169_s1 + $0x78] sm:$0xff]  ;;  %1126 = vst [vmem:[%s2170_s2 + $0x8] sm:$0xff] %v496_v23 }
  0x25   :  { %1075 = vst [vmem:[%s2170_s2 + $0x200] sm:$0xff] %v326_v34  ;;  %v346_v42 = vmul.f32 %v1080_v39, %v1079_v37  ;;  %v356_v43 = vmul.f32 %v1083_v41, %v1082_v40  ;;  %v1085_v44 = vld [vmem:[%s2168_s0 + $0xc0] sm:$0xff]  ;;  %v1088_v46 = vld [vmem:[%s2168_s0 + $0x130] sm:$0xff]  ;;  %1078 = vst [vmem:[%s2170_s2 + $0x270] sm:$0xff] %v336_v38  ;;  %v506_v24 = vmul.f32 %v1128_v22, %v1127_v21 }
  0x26   :  { %v1086_v45 = vld [vmem:[%s2169_s1 + $0xc0] sm:$0xff]  ;;  %v1089_v48 = vld [vmem:[%s2169_s1 + $0x130] sm:$0xff]  ;;  %v1130_v25 = vld [vmem:[%s2168_s0 + $0xe8] sm:$0xff] }
  0x27   :  { %v366_v47 = vmul.f32 %v1086_v45, %v1085_v44  ;;  %v1091_v49 = vld [vmem:[%s2168_s0 + $0x1a0] sm:$0xff]  ;;  %1081 = vst [vmem:[%s2170_s2 + $0x2e0] sm:$0xff] %v346_v42  ;;  %1084 = vst [vmem:[%s2170_s2 + $0x50] sm:$0xff] %v356_v43  ;;  %v376_v51 = vmul.f32 %v1089_v48, %v1088_v46  ;;  %v1094_v53 = vld [vmem:[%s2168_s0 + $0x210] sm:$0xff] }
  0x28   :  { %v1092_v50 = vld [vmem:[%s2169_s1 + $0x1a0] sm:$0xff]  ;;  %v1095_v54 = vld [vmem:[%s2169_s1 + $0x210] sm:$0xff]  ;;  %v1131_v26 = vld [vmem:[%s2169_s1 + $0xe8] sm:$0xff]  ;;  %1129 = vst [vmem:[%s2170_s2 + $0x78] sm:$0xff] %v506_v24 }
  0x29   :  { %v386_v52 = vmul.f32 %v1092_v50, %v1091_v49  ;;  %v1097_v55 = vld [vmem:[%s2168_s0 + $0x280] sm:$0xff]  ;;  %1087 = vst [vmem:[%s2170_s2 + $0xc0] sm:$0xff] %v366_v47  ;;  %v396_v56 = vmul.f32 %v1095_v54, %v1094_v53  ;;  %v1100_v58 = vld [vmem:[%s2168_s0 + $0x2f0] sm:$0xff]  ;;  %1090 = vst [vmem:[%s2170_s2 + $0x130] sm:$0xff] %v376_v51  ;;  %v516_v28 = vmul.f32 %v1131_v26, %v1130_v25 }
  0x2a   :  { %v1098_v57 = vld [vmem:[%s2169_s1 + $0x280] sm:$0xff]  ;;  %v1101_v59 = vld [vmem:[%s2169_s1 + $0x2f0] sm:$0xff]  ;;  %v1133_v27 = vld [vmem:[%s2168_s0 + $0x158] sm:$0xff] }
  0x2b   :  { %1093 = vst [vmem:[%s2170_s2 + $0x1a0] sm:$0xff] %v386_v52  ;;  %v406_v60 = vmul.f32 %v1098_v57, %v1097_v55  ;;  %v416_v61 = vmul.f32 %v1101_v59, %v1100_v58  ;;  %v1103_v62 = vld [vmem:[%s2168_s0 + $0x60] sm:$0xff]  ;;  %v1106_v0 = vld [vmem:[%s2168_s0 + $0xd0] sm:$0xff]  ;;  %1096 = vst [vmem:[%s2170_s2 + $0x210] sm:$0xff] %v396_v56 }
  0x2c   :  { %v1104_v63 = vld [vmem:[%s2169_s1 + $0x60] sm:$0xff]  ;;  %v1107_v2 = vld [vmem:[%s2169_s1 + $0xd0] sm:$0xff]  ;;  %v1134_v29 = vld [vmem:[%s2169_s1 + $0x158] sm:$0xff]  ;;  %1132 = vst [vmem:[%s2170_s2 + $0xe8] sm:$0xff] %v516_v28 }
  0x2d   :  { %v426_v1 = vmul.f32 %v1104_v63, %v1103_v62  ;;  %v1109_v3 = vld [vmem:[%s2168_s0 + $0x140] sm:$0xff]  ;;  %1099 = vst [vmem:[%s2170_s2 + $0x280] sm:$0xff] %v406_v60  ;;  %1102 = vst [vmem:[%s2170_s2 + $0x2f0] sm:$0xff] %v416_v61  ;;  %v436_v5 = vmul.f32 %v1107_v2, %v1106_v0  ;;  %v1112_v7 = vld [vmem:[%s2168_s0 + $0x1b0] sm:$0xff]  ;;  %v526_v32 = vmul.f32 %v1134_v29, %v1133_v27 }
  0x2e   :  { %v1110_v4 = vld [vmem:[%s2169_s1 + $0x140] sm:$0xff]  ;;  %v1113_v8 = vld [vmem:[%s2169_s1 + $0x1b0] sm:$0xff]  ;;  %v1136_v30 = vld [vmem:[%s2168_s0 + $0x1c8] sm:$0xff] }
  0x2f   :  { %v446_v6 = vmul.f32 %v1110_v4, %v1109_v3  ;;  %v1115_v9 = vld [vmem:[%s2168_s0 + $0x220] sm:$0xff]  ;;  %1105 = vst [vmem:[%s2170_s2 + $0x60] sm:$0xff] %v426_v1  ;;  %v456_v10 = vmul.f32 %v1113_v8, %v1112_v7  ;;  %v1118_v12 = vld [vmem:[%s2168_s0 + $0x290] sm:$0xff]  ;;  %1108 = vst [vmem:[%s2170_s2 + $0xd0] sm:$0xff] %v436_v5 }
  0x30   :  { %v1116_v11 = vld [vmem:[%s2169_s1 + $0x220] sm:$0xff]  ;;  %v1119_v13 = vld [vmem:[%s2169_s1 + $0x290] sm:$0xff]  ;;  %v1137_v31 = vld [vmem:[%s2169_s1 + $0x1c8] sm:$0xff]  ;;  %1135 = vst [vmem:[%s2170_s2 + $0x158] sm:$0xff] %v526_v32 }
  0x31   :  { %1111 = vst [vmem:[%s2170_s2 + $0x140] sm:$0xff] %v446_v6  ;;  %v466_v14 = vmul.f32 %v1116_v11, %v1115_v9  ;;  %v476_v15 = vmul.f32 %v1119_v13, %v1118_v12  ;;  %v1121_v16 = vld [vmem:[%s2168_s0 + $0x300] sm:$0xff]  ;;  %1114 = vst [vmem:[%s2170_s2 + $0x1b0] sm:$0xff] %v456_v10  ;;  %v536_v33 = vmul.f32 %v1137_v31, %v1136_v30  ;;  %v1139_v34 = vld [vmem:[%s2168_s0 + $0x238] sm:$0xff] }
  0x32   :  { %v1122_v17 = vld [vmem:[%s2169_s1 + $0x300] sm:$0xff]  ;;  %v1140_v35 = vld [vmem:[%s2169_s1 + $0x238] sm:$0xff]  ;;  %v1142_v36 = vld [vmem:[%s2168_s0 + $0x2a8] sm:$0xff] }
  0x33   :  { %v486_v19 = vmul.f32 %v1122_v17, %v1121_v16  ;;  %1117 = vst [vmem:[%s2170_s2 + $0x220] sm:$0xff] %v466_v14  ;;  %1120 = vst [vmem:[%s2170_s2 + $0x290] sm:$0xff] %v476_v15  ;;  %v546_v37 = vmul.f32 %v1140_v35, %v1139_v34  ;;  %v1143_v38 = vld [vmem:[%s2169_s1 + $0x2a8] sm:$0xff]  ;;  %v1145_v39 = vld [vmem:[%s2168_s0 + $0x18] sm:$0xff] }
  0x34   :  { %v1146_v40 = vld [vmem:[%s2169_s1 + $0x18] sm:$0xff]  ;;  %1138 = vst [vmem:[%s2170_s2 + $0x1c8] sm:$0xff] %v536_v33  ;;  %v556_v41 = vmul.f32 %v1143_v38, %v1142_v36  ;;  %v1148_v43 = vld [vmem:[%s2168_s0 + $0x88] sm:$0xff] }
  0x35   :  { %1123 = vst [vmem:[%s2170_s2 + $0x300] sm:$0xff] %v486_v19  ;;  %v566_v42 = vmul.f32 %v1146_v40, %v1145_v39  ;;  %v1149_v44 = vld [vmem:[%s2169_s1 + $0x88] sm:$0xff]  ;;  %v1151_v45 = vld [vmem:[%s2168_s0 + $0xf8] sm:$0xff]  ;;  %1141 = vst [vmem:[%s2170_s2 + $0x238] sm:$0xff] %v546_v37 }
  0x36   :  { %v576_v46 = vmul.f32 %v1149_v44, %v1148_v43  ;;  %v1152_v47 = vld [vmem:[%s2169_s1 + $0xf8] sm:$0xff]  ;;  %v1154_v48 = vld [vmem:[%s2168_s0 + $0x168] sm:$0xff]  ;;  %1144 = vst [vmem:[%s2170_s2 + $0x2a8] sm:$0xff] %v556_v41 }
  0x37   :  { %v1155_v49 = vld [vmem:[%s2169_s1 + $0x168] sm:$0xff]  ;;  %1147 = vst [vmem:[%s2170_s2 + $0x18] sm:$0xff] %v566_v42  ;;  %v586_v50 = vmul.f32 %v1152_v47, %v1151_v45  ;;  %v1157_v52 = vld [vmem:[%s2168_s0 + $0x1d8] sm:$0xff] }
  0x38   :  { %v596_v51 = vmul.f32 %v1155_v49, %v1154_v48  ;;  %v1158_v53 = vld [vmem:[%s2169_s1 + $0x1d8] sm:$0xff]  ;;  %v1160_v54 = vld [vmem:[%s2168_s0 + $0x248] sm:$0xff]  ;;  %1150 = vst [vmem:[%s2170_s2 + $0x88] sm:$0xff] %v576_v46 }
  0x39   :  { %v606_v55 = vmul.f32 %v1158_v53, %v1157_v52  ;;  %v1161_v56 = vld [vmem:[%s2169_s1 + $0x248] sm:$0xff]  ;;  %v1163_v57 = vld [vmem:[%s2168_s0 + $0x2b8] sm:$0xff]  ;;  %1153 = vst [vmem:[%s2170_s2 + $0xf8] sm:$0xff] %v586_v50 }
  0x3a   :  { %v1164_v58 = vld [vmem:[%s2169_s1 + $0x2b8] sm:$0xff]  ;;  %1156 = vst [vmem:[%s2170_s2 + $0x168] sm:$0xff] %v596_v51  ;;  %v616_v59 = vmul.f32 %v1161_v56, %v1160_v54  ;;  %v1166_v61 = vld [vmem:[%s2168_s0 + $0x28] sm:$0xff] }
  0x3b   :  { %v626_v60 = vmul.f32 %v1164_v58, %v1163_v57  ;;  %v1167_v62 = vld [vmem:[%s2169_s1 + $0x28] sm:$0xff]  ;;  %v1169_v63 = vld [vmem:[%s2168_s0 + $0x98] sm:$0xff]  ;;  %1159 = vst [vmem:[%s2170_s2 + $0x1d8] sm:$0xff] %v606_v55 }
  0x3c   :  { %v636_v0 = vmul.f32 %v1167_v62, %v1166_v61  ;;  %v1170_v1 = vld [vmem:[%s2169_s1 + $0x98] sm:$0xff]  ;;  %v1172_v2 = vld [vmem:[%s2168_s0 + $0x108] sm:$0xff]  ;;  %1162 = vst [vmem:[%s2170_s2 + $0x248] sm:$0xff] %v616_v59 }
  0x3d   :  { %v1173_v3 = vld [vmem:[%s2169_s1 + $0x108] sm:$0xff]  ;;  %1165 = vst [vmem:[%s2170_s2 + $0x2b8] sm:$0xff] %v626_v60  ;;  %v646_v4 = vmul.f32 %v1170_v1, %v1169_v63  ;;  %v1175_v6 = vld [vmem:[%s2168_s0 + $0x178] sm:$0xff] }
  0x3e   :  { %v656_v5 = vmul.f32 %v1173_v3, %v1172_v2  ;;  %v1176_v7 = vld [vmem:[%s2169_s1 + $0x178] sm:$0xff]  ;;  %v1178_v8 = vld [vmem:[%s2168_s0 + $0x1e8] sm:$0xff]  ;;  %1168 = vst [vmem:[%s2170_s2 + $0x28] sm:$0xff] %v636_v0 }
  0x3f   :  { %v666_v9 = vmul.f32 %v1176_v7, %v1175_v6  ;;  %v1179_v10 = vld [vmem:[%s2169_s1 + $0x1e8] sm:$0xff]  ;;  %v1181_v11 = vld [vmem:[%s2168_s0 + $0x258] sm:$0xff]  ;;  %1171 = vst [vmem:[%s2170_s2 + $0x98] sm:$0xff] %v646_v4 }
  0x40   :  { %v1182_v12 = vld [vmem:[%s2169_s1 + $0x258] sm:$0xff]  ;;  %1174 = vst [vmem:[%s2170_s2 + $0x108] sm:$0xff] %v656_v5  ;;  %v676_v13 = vmul.f32 %v1179_v10, %v1178_v8  ;;  %v1184_v15 = vld [vmem:[%s2168_s0 + $0x2c8] sm:$0xff] }
  0x41   :  { %v686_v14 = vmul.f32 %v1182_v12, %v1181_v11  ;;  %v1185_v16 = vld [vmem:[%s2169_s1 + $0x2c8] sm:$0xff]  ;;  %v1187_v17 = vld [vmem:[%s2168_s0 + $0x38] sm:$0xff]  ;;  %1177 = vst [vmem:[%s2170_s2 + $0x178] sm:$0xff] %v666_v9 }
  0x42   :  { %v696_v18 = vmul.f32 %v1185_v16, %v1184_v15  ;;  %v1188_v19 = vld [vmem:[%s2169_s1 + $0x38] sm:$0xff]  ;;  %v1190_v20 = vld [vmem:[%s2168_s0 + $0xa8] sm:$0xff]  ;;  %1180 = vst [vmem:[%s2170_s2 + $0x1e8] sm:$0xff] %v676_v13 }
  0x43   :  { %v1191_v21 = vld [vmem:[%s2169_s1 + $0xa8] sm:$0xff]  ;;  %1183 = vst [vmem:[%s2170_s2 + $0x258] sm:$0xff] %v686_v14  ;;  %v706_v22 = vmul.f32 %v1188_v19, %v1187_v17  ;;  %v1193_v24 = vld [vmem:[%s2168_s0 + $0x118] sm:$0xff] }
  0x44   :  { %v716_v23 = vmul.f32 %v1191_v21, %v1190_v20  ;;  %v1194_v25 = vld [vmem:[%s2169_s1 + $0x118] sm:$0xff]  ;;  %v1196_v26 = vld [vmem:[%s2168_s0 + $0x188] sm:$0xff]  ;;  %1186 = vst [vmem:[%s2170_s2 + $0x2c8] sm:$0xff] %v696_v18 }
  0x45   :  { %v726_v27 = vmul.f32 %v1194_v25, %v1193_v24  ;;  %v1197_v28 = vld [vmem:[%s2169_s1 + $0x188] sm:$0xff]  ;;  %v1199_v29 = vld [vmem:[%s2168_s0 + $0x1f8] sm:$0xff]  ;;  %1189 = vst [vmem:[%s2170_s2 + $0x38] sm:$0xff] %v706_v22 }
  0x46   :  { %v1200_v30 = vld [vmem:[%s2169_s1 + $0x1f8] sm:$0xff]  ;;  %1192 = vst [vmem:[%s2170_s2 + $0xa8] sm:$0xff] %v716_v23  ;;  %v736_v31 = vmul.f32 %v1197_v28, %v1196_v26  ;;  %v1202_v33 = vld [vmem:[%s2168_s0 + $0x268] sm:$0xff] }
  0x47   :  { %v746_v32 = vmul.f32 %v1200_v30, %v1199_v29  ;;  %v1203_v34 = vld [vmem:[%s2169_s1 + $0x268] sm:$0xff]  ;;  %v1205_v35 = vld [vmem:[%s2168_s0 + $0x2d8] sm:$0xff]  ;;  %1195 = vst [vmem:[%s2170_s2 + $0x118] sm:$0xff] %v726_v27 }
  0x48   :  { %v756_v36 = vmul.f32 %v1203_v34, %v1202_v33  ;;  %v1206_v37 = vld [vmem:[%s2169_s1 + $0x2d8] sm:$0xff]  ;;  %v1208_v38 = vld [vmem:[%s2168_s0 + $0x48] sm:$0xff]  ;;  %1198 = vst [vmem:[%s2170_s2 + $0x188] sm:$0xff] %v736_v31 }
  0x49   :  { %v1209_v39 = vld [vmem:[%s2169_s1 + $0x48] sm:$0xff]  ;;  %1201 = vst [vmem:[%s2170_s2 + $0x1f8] sm:$0xff] %v746_v32  ;;  %v766_v40 = vmul.f32 %v1206_v37, %v1205_v35  ;;  %v1211_v42 = vld [vmem:[%s2168_s0 + $0xb8] sm:$0xff] }
  0x4a   :  { %v776_v41 = vmul.f32 %v1209_v39, %v1208_v38  ;;  %v1212_v43 = vld [vmem:[%s2169_s1 + $0xb8] sm:$0xff]  ;;  %v1214_v44 = vld [vmem:[%s2168_s0 + $0x128] sm:$0xff]  ;;  %1204 = vst [vmem:[%s2170_s2 + $0x268] sm:$0xff] %v756_v36 }
  0x4b   :  { %v786_v45 = vmul.f32 %v1212_v43, %v1211_v42  ;;  %v1215_v46 = vld [vmem:[%s2169_s1 + $0x128] sm:$0xff]  ;;  %v1217_v47 = vld [vmem:[%s2168_s0 + $0x198] sm:$0xff]  ;;  %1207 = vst [vmem:[%s2170_s2 + $0x2d8] sm:$0xff] %v766_v40 }
  0x4c   :  { %v1218_v48 = vld [vmem:[%s2169_s1 + $0x198] sm:$0xff]  ;;  %1210 = vst [vmem:[%s2170_s2 + $0x48] sm:$0xff] %v776_v41  ;;  %v796_v49 = vmul.f32 %v1215_v46, %v1214_v44  ;;  %v1220_v51 = vld [vmem:[%s2168_s0 + $0x208] sm:$0xff] }
  0x4d   :  { %v806_v50 = vmul.f32 %v1218_v48, %v1217_v47  ;;  %v1221_v52 = vld [vmem:[%s2169_s1 + $0x208] sm:$0xff]  ;;  %v1223_v53 = vld [vmem:[%s2168_s0 + $0x278] sm:$0xff]  ;;  %1213 = vst [vmem:[%s2170_s2 + $0xb8] sm:$0xff] %v786_v45 }
  0x4e   :  { %v816_v54 = vmul.f32 %v1221_v52, %v1220_v51  ;;  %v1224_v55 = vld [vmem:[%s2169_s1 + $0x278] sm:$0xff]  ;;  %v1226_v56 = vld [vmem:[%s2168_s0 + $0x2e8] sm:$0xff]  ;;  %1216 = vst [vmem:[%s2170_s2 + $0x128] sm:$0xff] %v796_v49 }
  0x4f   :  { %v1227_v57 = vld [vmem:[%s2169_s1 + $0x2e8] sm:$0xff]  ;;  %1219 = vst [vmem:[%s2170_s2 + $0x198] sm:$0xff] %v806_v50  ;;  %v826_v58 = vmul.f32 %v1224_v55, %v1223_v53  ;;  %v1229_v60 = vld [vmem:[%s2168_s0 + $0x58] sm:$0xff] }
  0x50   :  { %v836_v59 = vmul.f32 %v1227_v57, %v1226_v56  ;;  %v1230_v61 = vld [vmem:[%s2169_s1 + $0x58] sm:$0xff]  ;;  %v1232_v62 = vld [vmem:[%s2168_s0 + $0xc8] sm:$0xff]  ;;  %1222 = vst [vmem:[%s2170_s2 + $0x208] sm:$0xff] %v816_v54 }
  0x51   :  { %v846_v63 = vmul.f32 %v1230_v61, %v1229_v60  ;;  %v1233_v0 = vld [vmem:[%s2169_s1 + $0xc8] sm:$0xff]  ;;  %v1235_v1 = vld [vmem:[%s2168_s0 + $0x138] sm:$0xff]  ;;  %1225 = vst [vmem:[%s2170_s2 + $0x278] sm:$0xff] %v826_v58 }
  0x52   :  { %v1236_v2 = vld [vmem:[%s2169_s1 + $0x138] sm:$0xff]  ;;  %1228 = vst [vmem:[%s2170_s2 + $0x2e8] sm:$0xff] %v836_v59  ;;  %v856_v3 = vmul.f32 %v1233_v0, %v1232_v62  ;;  %v1238_v5 = vld [vmem:[%s2168_s0 + $0x1a8] sm:$0xff] }
  0x53   :  { %v866_v4 = vmul.f32 %v1236_v2, %v1235_v1  ;;  %v1239_v6 = vld [vmem:[%s2169_s1 + $0x1a8] sm:$0xff]  ;;  %v1241_v7 = vld [vmem:[%s2168_s0 + $0x218] sm:$0xff]  ;;  %1231 = vst [vmem:[%s2170_s2 + $0x58] sm:$0xff] %v846_v63 }
  0x54   :  { %v876_v8 = vmul.f32 %v1239_v6, %v1238_v5  ;;  %v1242_v9 = vld [vmem:[%s2169_s1 + $0x218] sm:$0xff]  ;;  %v1244_v10 = vld [vmem:[%s2168_s0 + $0x288] sm:$0xff]  ;;  %1234 = vst [vmem:[%s2170_s2 + $0xc8] sm:$0xff] %v856_v3 }
  0x55   :  { %v1245_v11 = vld [vmem:[%s2169_s1 + $0x288] sm:$0xff]  ;;  %1237 = vst [vmem:[%s2170_s2 + $0x138] sm:$0xff] %v866_v4  ;;  %v886_v12 = vmul.f32 %v1242_v9, %v1241_v7  ;;  %v1247_v14 = vld [vmem:[%s2168_s0 + $0x2f8] sm:$0xff] }
  0x56   :  { %v896_v13 = vmul.f32 %v1245_v11, %v1244_v10  ;;  %v1248_v15 = vld [vmem:[%s2169_s1 + $0x2f8] sm:$0xff]  ;;  %v1250_v16 = vld [vmem:[%s2168_s0 + $0x68] sm:$0xff]  ;;  %1240 = vst [vmem:[%s2170_s2 + $0x1a8] sm:$0xff] %v876_v8 }
  0x57   :  { %v906_v17 = vmul.f32 %v1248_v15, %v1247_v14  ;;  %v1251_v18 = vld [vmem:[%s2169_s1 + $0x68] sm:$0xff]  ;;  %v1253_v19 = vld [vmem:[%s2168_s0 + $0xd8] sm:$0xff]  ;;  %1243 = vst [vmem:[%s2170_s2 + $0x218] sm:$0xff] %v886_v12 }
  0x58   :  { %v1254_v20 = vld [vmem:[%s2169_s1 + $0xd8] sm:$0xff]  ;;  %1246 = vst [vmem:[%s2170_s2 + $0x288] sm:$0xff] %v896_v13  ;;  %v916_v21 = vmul.f32 %v1251_v18, %v1250_v16  ;;  %v1256_v23 = vld [vmem:[%s2168_s0 + $0x148] sm:$0xff] }
  0x59   :  { %v926_v22 = vmul.f32 %v1254_v20, %v1253_v19  ;;  %v1257_v24 = vld [vmem:[%s2169_s1 + $0x148] sm:$0xff]  ;;  %v1259_v25 = vld [vmem:[%s2168_s0 + $0x1b8] sm:$0xff]  ;;  %1249 = vst [vmem:[%s2170_s2 + $0x2f8] sm:$0xff] %v906_v17 }
  0x5a   :  { %v936_v26 = vmul.f32 %v1257_v24, %v1256_v23  ;;  %v1260_v27 = vld [vmem:[%s2169_s1 + $0x1b8] sm:$0xff]  ;;  %v1262_v28 = vld [vmem:[%s2168_s0 + $0x228] sm:$0xff]  ;;  %1252 = vst [vmem:[%s2170_s2 + $0x68] sm:$0xff] %v916_v21 }
  0x5b   :  { %v1263_v29 = vld [vmem:[%s2169_s1 + $0x228] sm:$0xff]  ;;  %1255 = vst [vmem:[%s2170_s2 + $0xd8] sm:$0xff] %v926_v22  ;;  %v946_v30 = vmul.f32 %v1260_v27, %v1259_v25  ;;  %v1265_v32 = vld [vmem:[%s2168_s0 + $0x298] sm:$0xff] }
  0x5c   :  { %v956_v31 = vmul.f32 %v1263_v29, %v1262_v28  ;;  %v1266_v33 = vld [vmem:[%s2169_s1 + $0x298] sm:$0xff]  ;;  %v1268_v34 = vld [vmem:[%s2168_s0 + $0x308] sm:$0xff]  ;;  %1258 = vst [vmem:[%s2170_s2 + $0x148] sm:$0xff] %v936_v26 }
  0x5d   :  { %v966_v35 = vmul.f32 %v1266_v33, %v1265_v32  ;;  %v1269_v36 = vld [vmem:[%s2169_s1 + $0x308] sm:$0xff]  ;;  %1261 = vst [vmem:[%s2170_s2 + $0x1b8] sm:$0xff] %v946_v30 }
  0x5e   :  { %1264 = vst [vmem:[%s2170_s2 + $0x228] sm:$0xff] %v956_v31  ;;  %v976_v37 = vmul.f32 %v1269_v36, %v1268_v34 }
  0x5f   :  { %1267 = vst [vmem:[%s2170_s2 + $0x298] sm:$0xff] %v966_v35 }
  0x60   :  { %1270 = vst [vmem:[%s2170_s2 + $0x308] sm:$0xff] %v976_v37 }

// kernel: pixelrnn_forward.1
= control target key start
LH: loop header
LB: loop body
LE: loop exit
PB: predicated region body
PF: predicated region fallthrough
CT: control target
= control target key end

     0   :  { %14 = vsyncpa [#allocation4], 0  ;;  %s7393_s0 = inlined_call_operand.vmem [shape: f32[2,64,768], index: 0, kind: input, shape index: {}]   ;;  %s7394_s1 = inlined_call_operand.vmem [shape: f32[768,16], index: 1, kind: input, shape index: {}]   ;;  %s7395_s2 = inlined_call_operand.vmem [shape: f32[1,16], index: 2, kind: input, shape index: {}]   ;;  %s7396_s3 = inlined_call_operand.vmem [shape: f32[2,80,64], index: 3, kind: input, shape index: {}]   ;;  %s7397_s4 = inlined_call_operand.vmem [shape: f32[2,1,64], index: 4, kind: input, shape index: {}]   ;;  %s7398_s5 = inlined_call_operand.vmem [shape: f32[16,32], index: 5, kind: input, shape index: {}]   ;;  %s7399_s6 = inlined_call_operand.vmem [shape: f32[1,32], index: 6, kind: input, shape index: {}]   ;;  %s7400_s7 = inlined_call_operand.vmem [shape: f32[32,32], index: 7, kind: input, shape index: {}]   ;;  %s7401_s8 = inlined_call_operand.vmem [shape: f32[1,32], index: 8, kind: input, shape index: {}]   ;;  %s7402_s9 = inlined_call_operand.hbm [shape: f32[2,64,32], index: 9, kind: output, shape index: {}]  }
   0x1   :  { %16 = vsyncpa [#allocation4 + $0x1], 0  ;;  %s5603_s30 = smov 0   ;;  %s5605_s10 = smov 0  }
   0x2   :  { %s5607_s11 = smov 0   ;;  %s5609_s12 = smov 0  }
   0x3 LB: > { %s5624_s13 = sadd.s32 4294967295, %s5541_s12   ;;  %s4430_s14 = sadd.s32 4294967294, %s5541_s12   ;;  %s5541_s12 = sphi %s5609_s12, %s7411_s12   ;;  %s5537_s11 = sphi %s5607_s11, %s7410_s11   ;;  %s5533_s10 = sphi %s5605_s10, %s7409_s10   ;;  %s5529_s30 = sphi %s5603_s30, %s7408_s30  }
   0x4   : > { %s5628_s15 = sadd.s32 1, %s5541_s12   ;;  %s223_s16 = sadd.s32 1, %s5537_s11 }
   0x5   : > { %s220_s17 = ssub.s32 %s5541_s12, %s5628_s15  ;;  %p233_p0 = scmp.ne.s32.totalorder %s5537_s11, %s5533_s10 }
   0x6   : > { %p221_p1 = scmp.eq.s32.totalorder %s220_s17, 0  ;;  %p234_p2 = scmp.eq.s32.totalorder %s5624_s13, 1 }
   0x7   : > { %p239_p3 = scmp.ne.s32.totalorder %s5533_s10, %s5529_s30  ;;  %p240_p4 = scmp.eq.s32.totalorder %s4430_s14, 1 }
   0x8   : > { %s5639_s18 = scalar_select %p221_p1, %s5537_s11, %s223_s16  }
   0x9   : > { %p5641_p5 = por %p234_p2, %p233_p0  ;;  %p5645_p6 = por %p240_p4, %p239_p3 }
   0xa   : > { %p4433_p7 = scmp.ge.s32.totalorder %s5541_s12, 1  ;;  %p290_p8 = scmp.lt.s32.totalorder %s5541_s12, 3 }
   0xc   : > { %p291_p9 = pnand %p4433_p7, %p290_p8 }
   0xd   : > { %p326_p10 = scmp.lt.s32.totalorder (!%p291_p9), %s5624_s13, 1  ;;  %s5544_s24 = smov (!%p291_p9), 64  }
   0xe   : > { %294 = sbr.rel (%p291_p9) target bundleno = 13078 (0x3316), region = 56  ;;  %s5546_s23 = smov (!%p291_p9), 16  }
   0xf   : > { %s5548_s26 = smov (!%p291_p9), 112   ;;  %s5549_s28 = smov (!%p291_p9), 80  }
  0x10   : > { %s323_s22 = sand.u32 (!%p291_p9), 1, %s5533_s10   ;;  %s4513_s29 = sshll.u32 (!%p291_p9), %s5624_s13, 10 }
  0x13   : > { %v410_v0 = vld [vmem:[%s7394_s1 + $0xf8] sm:$0xff]  ;;  %v409_v2 = vld [vmem:[%s7394_s1 + $0xf0] sm:$0xff]  ;;  %v408_v6 = vld [vmem:[%s7394_s1 + $0xe8] sm:$0xff]  ;;  %s5772_s27 = scalar_select %p326_p10, %s5624_s13, 1  ;;  %vm797_vm0 = vcmask 130048   ;;  %vm5545_vm1 = vmmov 0  }
  0x14   : > { %v394_v1 = vld [vmem:[%s7394_s1 + $0x78] sm:$0xff]  ;;  %4514 = vmatprep.subr.mxu0 %v410_v0  ;;  %v393_v4 = vld [vmem:[%s7394_s1 + $0x70] sm:$0xff]  ;;  %v392_v8 = vld [vmem:[%s7394_s1 + $0x68] sm:$0xff]  ;;  %vm821_vm2 = vcmask 1040384   ;;  %vm834_vm3 = vcmask 261120   ;;  %vm836_vm4 = vcmask 392192  }
  0x15   : > { %v442_v3 = vld [vmem:[%s7394_s1 + $0x1f8] sm:$0xff]  ;;  %4515 = vmatpush3.msra.mxu0 %v394_v1  ;;  %v441_v7 = vld [vmem:[%s7394_s1 + $0x1f0] sm:$0xff]  ;;  %v440_v10 = vld [vmem:[%s7394_s1 + $0x1e8] sm:$0xff]  ;;  %s5292_s21 = smul.u32 384, %s5772_s27  ;;  %vm838_vm5 = vcmask 523264   ;;  %vm846_vm6 = vcmask 654336  }
  0x16   : > { %v426_v5 = vld [vmem:[%s7394_s1 + $0x178] sm:$0xff]  ;;  %4570 = vmatprep.subr.mxu1 %v442_v3  ;;  %4516 = vmatprep.subr.mxu0 %v409_v2  ;;  %v425_v9 = vld [vmem:[%s7394_s1 + $0x170] sm:$0xff]  ;;  %v407_v11 = vld [vmem:[%s7394_s1 + $0xe0] sm:$0xff]  ;;  %vm1006_vm7 = vcmask 1046528   ;;  %vm996_vm8 = vcmask 1041408   ;;  %vm998_vm9 = vcmask 1042432  }
  0x17   : > { %4571 = vmatpush3.msra.mxu1 %v426_v5  ;;  %4517 = vmatpush3.msra.mxu0 %v393_v4  ;;  %v424_v12 = vld [vmem:[%s7394_s1 + $0x168] sm:$0xff]  ;;  %v391_v13 = vld [vmem:[%s7394_s1 + $0x60] sm:$0xff]  ;;  %v406_v15 = vld [vmem:[%s7394_s1 + $0xd8] sm:$0xff]  ;;  %s5826_s14 = scalar_lea.vmem %s7393_s0, %s5292_s21  ;;  %vm1000_vm10 = vcmask 1043456   ;;  %vm1002_vm11 = vcmask 1044480   ;;  %vm1004_vm12 = vcmask 1045504  }
  0x18   : > { %4572 = vmatprep.subr.mxu1 %v441_v7  ;;  %4518 = vmatprep.subr.mxu0 %v408_v6  ;;  %v439_v14 = vld [vmem:[%s7394_s1 + $0x1e0] sm:$0xff]  ;;  %v390_v17 = vld [vmem:[%s7394_s1 + $0x58] sm:$0xff]  ;;  %v405_v19 = vld [vmem:[%s7394_s1 + $0xd0] sm:$0xff]  ;;  %vm1021_vm13 = vcmask 64512   ;;  %s4434_s21 = sshll.u32 %s323_s22, 6 }
  0x19   : > { %4573 = vmatpush3.msra.mxu1 %v425_v9  ;;  %4519 = vmatpush3.msra.mxu0 %v392_v8  ;;  %v423_v16 = vld [vmem:[%s7394_s1 + $0x160] sm:$0xff]  ;;  %v438_v18 = vld [vmem:[%s7394_s1 + $0x1d8] sm:$0xff]  ;;  %v389_v21 = vld [vmem:[%s7394_s1 + $0x50] sm:$0xff]  ;;  %s7323_s25 = scalar_lea.vmem [#allocation3], %s4434_s21 }
  0x1a   : > { %4574 = vmatprep.subr.mxu1 %v440_v10  ;;  %4520 = vmatprep.subr.mxu0 %v407_v11  ;;  %v422_v20 = vld [vmem:[%s7394_s1 + $0x158] sm:$0xff]  ;;  %v437_v22 = vld [vmem:[%s7394_s1 + $0x1d0] sm:$0xff]  ;;  %v404_v23 = vld [vmem:[%s7394_s1 + $0xc8] sm:$0xff]  ;;  %s4368_s27 = sshll.u32 %s7323_s25, 4  ;;  %s7346_s27 = int_to_ptr.vmem [resolvable:$true] %s4368_s27 }
  0x1b   : > { %4575 = vmatpush3.msra.mxu1 %v424_v12  ;;  %4521 = vmatpush3.msra.mxu0 %v391_v13  ;;  %v421_v24 = vld [vmem:[%s7394_s1 + $0x150] sm:$0xff]  ;;  %v388_v25 = vld [vmem:[%s7394_s1 + $0x48] sm:$0xff]  ;;  %v403_v27 = vld [vmem:[%s7394_s1 + $0xc0] sm:$0xff]  ;;  %s5481_s13 = scalar_lea.vmem %s7346_s27, 1024 }
  0x1c   : > { %4576 = vmatprep.subr.mxu1 %v439_v14  ;;  %4522 = vmatprep.subr.mxu0 %v406_v15  ;;  %v436_v26 = vld [vmem:[%s7394_s1 + $0x1c8] sm:$0xff]  ;;  %v387_v29 = vld [vmem:[%s7394_s1 + $0x40] sm:$0xff]  ;;  %v402_v31 = vld [vmem:[%s7394_s1 + $0xb8] sm:$0xff]  ;;  %p5482_p11 = scmp.ne.s32.totalorder %s7346_s27, %s5481_s13 }
  0x1d   : > { %4577 = vmatpush3.msra.mxu1 %v423_v16  ;;  %4523 = vmatpush3.msra.mxu0 %v390_v17  ;;  %v420_v28 = vld [vmem:[%s7394_s1 + $0x148] sm:$0xff]  ;;  %v435_v30 = vld [vmem:[%s7394_s1 + $0x1c0] sm:$0xff]  ;;  %v386_v33 = vld [vmem:[%s7394_s1 + $0x38] sm:$0xff] }
  0x1e   : > { %4578 = vmatprep.subr.mxu1 %v438_v18  ;;  %4524 = vmatprep.subr.mxu0 %v405_v19  ;;  %v419_v32 = vld [vmem:[%s7394_s1 + $0x140] sm:$0xff]  ;;  %v434_v34 = vld [vmem:[%s7394_s1 + $0x1b8] sm:$0xff]  ;;  %v401_v35 = vld [vmem:[%s7394_s1 + $0xb0] sm:$0xff]  ;;  %p5483_p12 = pnand %p5482_p11, %p5641_p5 }
  0x1f   : > { %4579 = vmatpush3.msra.mxu1 %v422_v20  ;;  %4525 = vmatpush3.msra.mxu0 %v389_v21  ;;  %v418_v36 = vld [vmem:[%s7394_s1 + $0x138] sm:$0xff]  ;;  %v385_v37 = vld [vmem:[%s7394_s1 + $0x30] sm:$0xff]  ;;  %v400_v39 = vld [vmem:[%s7394_s1 + $0xa8] sm:$0xff] }
  0x20   : > { %4580 = vmatprep.subr.mxu1 %v437_v22  ;;  %4526 = vmatprep.subr.mxu0 %v404_v23  ;;  %v433_v38 = vld [vmem:[%s7394_s1 + $0x1b0] sm:$0xff]  ;;  %v384_v41 = vld [vmem:[%s7394_s1 + $0x28] sm:$0xff]  ;;  %v399_v43 = vld [vmem:[%s7394_s1 + $0xa0] sm:$0xff]  ;;  %p5484_p13 = pneg %p5483_p12 }
  0x21   : > { %4581 = vmatpush3.msra.mxu1 %v421_v24  ;;  %4527 = vmatpush3.msra.mxu0 %v388_v25  ;;  %v417_v40 = vld [vmem:[%s7394_s1 + $0x130] sm:$0xff]  ;;  %v432_v42 = vld [vmem:[%s7394_s1 + $0x1a8] sm:$0xff]  ;;  %v383_v45 = vld [vmem:[%s7394_s1 + $0x20] sm:$0xff] }
  0x22   : > { %4582 = vmatprep.subr.mxu1 %v436_v26  ;;  %4528 = vmatprep.subr.mxu0 %v403_v27  ;;  %v416_v44 = vld [vmem:[%s7394_s1 + $0x128] sm:$0xff]  ;;  %v431_v46 = vld [vmem:[%s7394_s1 + $0x1a0] sm:$0xff]  ;;  %v398_v47 = vld [vmem:[%s7394_s1 + $0x98] sm:$0xff] }
  0x23   : > { %4583 = vmatpush3.msra.mxu1 %v420_v28  ;;  %4529 = vmatpush3.msra.mxu0 %v387_v29  ;;  %v415_v48 = vld [vmem:[%s7394_s1 + $0x120] sm:$0xff]  ;;  %v382_v49 = vld [vmem:[%s7394_s1 + $0x18] sm:$0xff]  ;;  %v397_v51 = vld [vmem:[%s7394_s1 + $0x90] sm:$0xff] }
  0x24   : > { %4584 = vmatprep.subr.mxu1 %v435_v30  ;;  %4530 = vmatprep.subr.mxu0 %v402_v31  ;;  %v430_v50 = vld [vmem:[%s7394_s1 + $0x198] sm:$0xff]  ;;  %v381_v53 = vld [vmem:[%s7394_s1 + $0x10] sm:$0xff]  ;;  %v396_v55 = vld [vmem:[%s7394_s1 + $0x88] sm:$0xff] }
  0x25   : > { %4585 = vmatpush3.msra.mxu1 %v419_v32  ;;  %4531 = vmatpush3.msra.mxu0 %v386_v33  ;;  %v414_v52 = vld [vmem:[%s7394_s1 + $0x118] sm:$0xff]  ;;  %v429_v54 = vld [vmem:[%s7394_s1 + $0x190] sm:$0xff]  ;;  %v380_v57 = vld [vmem:[%s7394_s1 + $0x8] sm:$0xff] }
  0x26   : > { %4586 = vmatprep.subr.mxu1 %v434_v34  ;;  %4532 = vmatprep.subr.mxu0 %v401_v35  ;;  %v413_v56 = vld [vmem:[%s7394_s1 + $0x110] sm:$0xff]  ;;  %v428_v58 = vld [vmem:[%s7394_s1 + $0x188] sm:$0xff]  ;;  %v395_v59 = vld [vmem:[%s7394_s1 + $0x80] sm:$0xff] }
  0x27   : > { %4587 = vmatpush3.msra.mxu1 %v418_v36  ;;  %4533 = vmatpush3.msra.mxu0 %v385_v37  ;;  %v332_v60 = vld [vmem:[%s5826_s14 + $0x8] sm:$0xff]  ;;  %v379_v61 = vld [vmem:[%s7394_s1] sm:$0xff]  ;;  %v474_v1 = vld [vmem:[%s7394_s1 + $0x2f8] sm:$0xff] }
  0x28   : > { %4588 = vmatprep.subr.mxu1 %v433_v38  ;;  %4534 = vmatprep.subr.mxu0 %v400_v39  ;;  %v412_v62 = vld [vmem:[%s7394_s1 + $0x108] sm:$0xff]  ;;  %v331_v63 = vld [vmem:[%s5826_s14] sm:$0xff]  ;;  %v334_v3 = vld [vmem:[%s5826_s14 + $0x18] sm:$0xff] }
  0x29   : > { %4589 = vmatpush3.msra.mxu1 %v417_v40  ;;  %4535 = vmatpush3.msra.mxu0 %v384_v41  ;;  %v427_v0 = vld [vmem:[%s7394_s1 + $0x180] sm:$0xff]  ;;  %v458_v4 = vld [vmem:[%s7394_s1 + $0x278] sm:$0xff]  ;;  %v333_v5 = vld [vmem:[%s5826_s14 + $0x10] sm:$0xff] }
  0x2a   : > { %4590 = vmatprep.subr.mxu1 %v432_v42  ;;  %4536 = vmatprep.subr.mxu0 %v399_v43  ;;  %v411_v2 = vld [vmem:[%s7394_s1 + $0x100] sm:$0xff]  ;;  %v473_v6 = vld [vmem:[%s7394_s1 + $0x2f0] sm:$0xff]  ;;  %v338_v7 = vld [vmem:[%s5826_s14 + $0x38] sm:$0xff] }
  0x2b   : > { %4591 = vmatpush3.msra.mxu1 %v416_v44  ;;  %4537 = vmatpush3.msra.mxu0 %v383_v45  ;;  %v457_v8 = vld [vmem:[%s7394_s1 + $0x270] sm:$0xff]  ;;  %v472_v10 = vld [vmem:[%s7394_s1 + $0x2e8] sm:$0xff]  ;;  %v339_v13 = vld [vmem:[%s5826_s14 + $0x40] sm:$0xff] }
  0x2c   : > { %4592 = vmatprep.subr.mxu1 %v431_v46  ;;  %4538 = vmatprep.subr.mxu0 %v398_v47  ;;  %v337_v9 = vld [vmem:[%s5826_s14 + $0x30] sm:$0xff]  ;;  %v340_v11 = vld [vmem:[%s5826_s14 + $0x48] sm:$0xff]  ;;  %v471_v14 = vld [vmem:[%s7394_s1 + $0x2e0] sm:$0xff] }
  0x2d   : > { %4593 = vmatpush3.msra.mxu1 %v415_v48  ;;  %4539 = vmatpush3.msra.mxu0 %v382_v49  ;;  %v456_v12 = vld [vmem:[%s7394_s1 + $0x268] sm:$0xff]  ;;  %v455_v16 = vld [vmem:[%s7394_s1 + $0x260] sm:$0xff]  ;;  %v470_v18 = vld [vmem:[%s7394_s1 + $0x2d8] sm:$0xff] }
  0x2e   : > { %4594 = vmatprep.subr.mxu1 %v430_v50  ;;  %4540 = vmatprep.subr.mxu0 %v397_v51  ;;  %v344_v15 = vld [vmem:[%s5826_s14 + $0x68] sm:$0xff]  ;;  %v343_v17 = vld [vmem:[%s5826_s14 + $0x60] sm:$0xff]  ;;  %v346_v19 = vld [vmem:[%s5826_s14 + $0x78] sm:$0xff] }
  0x2f   : > { %4595 = vmatpush3.msra.mxu1 %v414_v52  ;;  %4541 = vmatpush3.msra.mxu0 %v381_v53  ;;  %v454_v20 = vld [vmem:[%s7394_s1 + $0x258] sm:$0xff]  ;;  %v345_v21 = vld [vmem:[%s5826_s14 + $0x70] sm:$0xff]  ;;  %v468_v26 = vld [vmem:[%s7394_s1 + $0x2c8] sm:$0xff] }
  0x30   : > { %4596 = vmatprep.subr.mxu1 %v429_v54  ;;  %4542 = vmatprep.subr.mxu0 %v396_v55  ;;  %v469_v22 = vld [vmem:[%s7394_s1 + $0x2d0] sm:$0xff]  ;;  %v350_v23 = vld [vmem:[%s5826_s14 + $0x98] sm:$0xff]  ;;  %v352_v27 = vld [vmem:[%s5826_s14 + $0xa8] sm:$0xff] }
  0x31   : > { %4597 = vmatpush3.msra.mxu1 %v413_v56  ;;  %4543 = vmatpush3.msra.mxu0 %v380_v57  ;;  %v453_v24 = vld [vmem:[%s7394_s1 + $0x250] sm:$0xff]  ;;  %v452_v28 = vld [vmem:[%s7394_s1 + $0x248] sm:$0xff]  ;;  %v351_v29 = vld [vmem:[%s5826_s14 + $0xa0] sm:$0xff] }
  0x32   : > { %4598 = vmatprep.subr.mxu1 %v428_v58  ;;  %4544 = vmatprep.subr.mxu0 %v395_v59  ;;  %v349_v25 = vld [vmem:[%s5826_s14 + $0x90] sm:$0xff]  ;;  %v467_v30 = vld [vmem:[%s7394_s1 + $0x2c0] sm:$0xff]  ;;  %v356_v31 = vld [vmem:[%s5826_s14 + $0xc8] sm:$0xff] }
  0x33   : > { %546 = vmatprep.mubr.f32.mxu0 %v332_v60  ;;  %4545 = vmatpush3.msra.mxu0 %v379_v61  ;;  %v451_v32 = vld [vmem:[%s7394_s1 + $0x240] sm:$0xff]  ;;  %v466_v34 = vld [vmem:[%s7394_s1 + $0x2b8] sm:$0xff]  ;;  %v357_v37 = vld [vmem:[%s5826_s14 + $0xd0] sm:$0xff] }
  0x34   : > { %4599 = vmatpush3.msra.mxu1 %v412_v62  ;;  %547 = vmatmul.mubr.f32.vlgmr.msra.gmra.mxu0 %v331_v63  ;;  %v355_v33 = vld [vmem:[%s5826_s14 + $0xc0] sm:$0xff]  ;;  %v358_v35 = vld [vmem:[%s5826_s14 + $0xd8] sm:$0xff]  ;;  %v465_v38 = vld [vmem:[%s7394_s1 + $0x2b0] sm:$0xff] }
  0x35   : > { %4600 = vmatprep.subr.mxu1 %v427_v0  ;;  %4626 = vmatprep.subr.mxu0 %v474_v1  ;;  %v450_v36 = vld [vmem:[%s7394_s1 + $0x238] sm:$0xff]  ;;  %v449_v40 = vld [vmem:[%s7394_s1 + $0x230] sm:$0xff]  ;;  %v464_v42 = vld [vmem:[%s7394_s1 + $0x2a8] sm:$0xff] }
  0x36   : > { %4601 = vmatpush3.msra.mxu1 %v411_v2  ;;  %651 = vmatprep.mubr.f32.mxu1 %v334_v3  ;;  %v362_v39 = vld [vmem:[%s5826_s14 + $0xf8] sm:$0xff]  ;;  %v361_v41 = vld [vmem:[%s5826_s14 + $0xf0] sm:$0xff]  ;;  %v364_v43 = vld [vmem:[%s5826_s14 + $0x108] sm:$0xff] }
  0x37   : > { %4627 = vmatpush3.msra.mxu0 %v458_v4  ;;  %652 = vmatmul.mubr.f32.vlgmr.msra.gmra.mxu1 %v333_v5  ;;  %v448_v44 = vld [vmem:[%s7394_s1 + $0x228] sm:$0xff]  ;;  %v363_v45 = vld [vmem:[%s5826_s14 + $0x100] sm:$0xff]  ;;  %v462_v50 = vld [vmem:[%s7394_s1 + $0x298] sm:$0xff] }
  0x38   : > { %4628 = vmatprep.subr.mxu0 %v473_v6  ;;  %551 = vmatprep.mubr.f32.mxu0 %v338_v7  ;;  %v463_v46 = vld [vmem:[%s7394_s1 + $0x2a0] sm:$0xff]  ;;  %v368_v47 = vld [vmem:[%s5826_s14 + $0x128] sm:$0xff]  ;;  %v370_v51 = vld [vmem:[%s5826_s14 + $0x138] sm:$0xff] }
  0x39   : > { %4629 = vmatpush3.msra.mxu0 %v457_v8  ;;  %656 = vmatprep.mubr.f32.mxu1 %v340_v11  ;;  %v447_v48 = vld [vmem:[%s7394_s1 + $0x220] sm:$0xff]  ;;  %v446_v52 = vld [vmem:[%s7394_s1 + $0x218] sm:$0xff]  ;;  %v369_v53 = vld [vmem:[%s5826_s14 + $0x130] sm:$0xff] }
  0x3a   : > { %552 = vmatmul.mubr.f32.gmra.mxu0 %v337_v9  ;;  %4630 = vmatprep.subr.mxu0 %v472_v10  ;;  %v367_v49 = vld [vmem:[%s5826_s14 + $0x120] sm:$0xff]  ;;  %v461_v54 = vld [vmem:[%s7394_s1 + $0x290] sm:$0xff]  ;;  %v374_v55 = vld [vmem:[%s5826_s14 + $0x158] sm:$0xff] }
  0x3b   : > { %4631 = vmatpush3.msra.mxu0 %v456_v12  ;;  %657 = vmatmul.mubr.f32.gmra.mxu1 %v339_v13  ;;  %v445_v56 = vld [vmem:[%s7394_s1 + $0x210] sm:$0xff]  ;;  %v460_v58 = vld [vmem:[%s7394_s1 + $0x288] sm:$0xff]  ;;  %v375_v61 = vld [vmem:[%s5826_s14 + $0x160] sm:$0xff] }
  0x3c   : > { %4632 = vmatprep.subr.mxu0 %v471_v14  ;;  %556 = vmatprep.mubr.f32.mxu0 %v344_v15  ;;  %v373_v57 = vld [vmem:[%s5826_s14 + $0x150] sm:$0xff]  ;;  %v376_v59 = vld [vmem:[%s5826_s14 + $0x168] sm:$0xff]  ;;  %v459_v62 = vld [vmem:[%s7394_s1 + $0x280] sm:$0xff] }
  0x3d   : > { %4633 = vmatpush3.msra.mxu0 %v455_v16  ;;  %661 = vmatprep.mubr.f32.mxu1 %v346_v19  ;;  %v444_v60 = vld [vmem:[%s7394_s1 + $0x208] sm:$0xff]  ;;  %v443_v63 = vld [vmem:[%s7394_s1 + $0x200] sm:$0xff]  ;;  %v342_v2 = vld [vmem:[%s5826_s14 + $0x58] sm:$0xff]  ;;  %v5543_v16 = vmov 0.0  }
  0x3e   : > { %557 = vmatmul.mubr.f32.gmra.mxu0 %v343_v17  ;;  %4634 = vmatprep.subr.mxu0 %v470_v18  ;;  %v336_v0 = vld [vmem:[%s5826_s14 + $0x28] sm:$0xff]  ;;  %v335_v1 = vld [vmem:[%s5826_s14 + $0x20] sm:$0xff]  ;;  %v341_v3 = vld [vmem:[%s5826_s14 + $0x50] sm:$0xff] }
  0x3f   : > { %4635 = vmatpush3.msra.mxu0 %v454_v20  ;;  %662 = vmatmul.mubr.f32.gmra.mxu1 %v345_v21  ;;  %v348_v4 = vld [vmem:[%s5826_s14 + $0x88] sm:$0xff]  ;;  %v347_v5 = vld [vmem:[%s5826_s14 + $0x80] sm:$0xff]  ;;  %v354_v6 = vld [vmem:[%s5826_s14 + $0xb8] sm:$0xff] }
  0x40   : > { %4636 = vmatprep.subr.mxu0 %v469_v22  ;;  %561 = vmatprep.mubr.f32.mxu0 %v350_v23  ;;  %v353_v7 = vld [vmem:[%s5826_s14 + $0xb0] sm:$0xff]  ;;  %v360_v8 = vld [vmem:[%s5826_s14 + $0xe8] sm:$0xff]  ;;  %v359_v9 = vld [vmem:[%s5826_s14 + $0xe0] sm:$0xff] }
  0x41   : > { %4637 = vmatpush3.msra.mxu0 %v453_v24  ;;  %666 = vmatprep.mubr.f32.mxu1 %v352_v27  ;;  %v366_v10 = vld [vmem:[%s5826_s14 + $0x118] sm:$0xff]  ;;  %v365_v11 = vld [vmem:[%s5826_s14 + $0x110] sm:$0xff]  ;;  %v372_v12 = vld [vmem:[%s5826_s14 + $0x148] sm:$0xff] }
  0x42   : > { %562 = vmatmul.mubr.f32.gmra.mxu0 %v349_v25  ;;  %4638 = vmatprep.subr.mxu0 %v468_v26  ;;  %v371_v13 = vld [vmem:[%s5826_s14 + $0x140] sm:$0xff]  ;;  %v378_v14 = vld [vmem:[%s5826_s14 + $0x178] sm:$0xff]  ;;  %v377_v15 = vld [vmem:[%s5826_s14 + $0x170] sm:$0xff]  ;;  %s7403_s14 = smov 8  }
  0x43   : > { %4639 = vmatpush3.msra.mxu0 %v452_v28  ;;  %667 = vmatmul.mubr.f32.gmra.mxu1 %v351_v29  ;;  %v6005_v17 = vld [vmem:[%s7396_s3 + $0x48] sm:$0xff]  ;;  %v6010_v18 = vld [vmem:[%s7396_s3 + $0x40] sm:$0xff]  ;;  %v6018_v19 = vld [vmem:[%s7396_s3 + $0x38] sm:$0xff] }
  0x44   : > { %4640 = vmatprep.subr.mxu0 %v467_v30  ;;  %566 = vmatprep.mubr.f32.mxu0 %v356_v31  ;;  %v6027_v20 = vld [vmem:[%s7396_s3 + $0x30] sm:$0xff]  ;;  %v6036_v21 = vld [vmem:[%s7396_s3 + $0x28] sm:$0xff]  ;;  %v6045_v22 = vld [vmem:[%s7396_s3 + $0x20] sm:$0xff] }
  0x45   : > { %4641 = vmatpush3.msra.mxu0 %v451_v32  ;;  %671 = vmatprep.mubr.f32.mxu1 %v358_v35  ;;  %v6054_v23 = vld [vmem:[%s7396_s3 + $0x18] sm:$0xff]  ;;  %v6063_v24 = vld [vmem:[%s7396_s3 + $0x10] sm:$0xff] }
  0x46   : > { %567 = vmatmul.mubr.f32.gmra.mxu0 %v355_v33  ;;  %4642 = vmatprep.subr.mxu0 %v466_v34 }
  0x47   : > { %4643 = vmatpush3.msra.mxu0 %v450_v36  ;;  %672 = vmatmul.mubr.f32.gmra.mxu1 %v357_v37 }
  0x48   : > { %4644 = vmatprep.subr.mxu0 %v465_v38  ;;  %571 = vmatprep.mubr.f32.mxu0 %v362_v39 }
  0x49   : > { %4645 = vmatpush3.msra.mxu0 %v449_v40  ;;  %676 = vmatprep.mubr.f32.mxu1 %v364_v43 }
  0x4a   : > { %572 = vmatmul.mubr.f32.gmra.mxu0 %v361_v41  ;;  %4646 = vmatprep.subr.mxu0 %v464_v42 }
  0x4b   : > { %4647 = vmatpush3.msra.mxu0 %v448_v44  ;;  %677 = vmatmul.mubr.f32.gmra.mxu1 %v363_v45 }
  0x4c   : > { %4648 = vmatprep.subr.mxu0 %v463_v46  ;;  %576 = vmatprep.mubr.f32.mxu0 %v368_v47 }
  0x4d   : > { %4649 = vmatpush3.msra.mxu0 %v447_v48  ;;  %681 = vmatprep.mubr.f32.mxu1 %v370_v51  ;;  %v6081_v48 = vld [vmem:[%s7395_s2] ss:$0 sm:$0xff] }
  0x4e   : > { %577 = vmatmul.mubr.f32.gmra.mxu0 %v367_v49  ;;  %4650 = vmatprep.subr.mxu0 %v462_v50 }
  0x4f   : > { %4651 = vmatpush3.msra.mxu0 %v446_v52  ;;  %682 = vmatmul.mubr.f32.gmra.mxu1 %v369_v53 }
  0x50   : > { %4652 = vmatprep.subr.mxu0 %v461_v54  ;;  %581 = vmatprep.mubr.f32.mxu0 %v374_v55 }
  0x51   : > { %4653 = vmatpush3.msra.mxu0 %v445_v56  ;;  %686 = vmatprep.mubr.f32.mxu1 %v376_v59 }
  0x52   : > { %582 = vmatmul.mubr.f32.gmra.mxu0 %v373_v57  ;;  %4654 = vmatprep.subr.mxu0 %v460_v58 }
  0x53   : > { %4655 = vmatpush3.msra.mxu0 %v444_v60  ;;  %687 = vmatmul.mubr.f32.gmra.mxu1 %v375_v61  ;;  %v6091_v60 = vld [vmem:[%s7396_s3 + $0x8] sm:$0xff] }
  0x54   : > { %4656 = vmatprep.subr.mxu0 %v459_v62  ;;  %756 = vmatprep.mubr.f32.mxu0 %v336_v0 }
  0x55   : > { %4657 = vmatpush3.msra.mxu0 %v443_v63  ;;  %4880 = vmatprep.subr.mxu1 %v5543_v16 }
  0x56   : > { %757 = vmatmul.mubr.f32.vlgmr.msra.gmra.mxu0 %v335_v1  ;;  %4926 = vmatprep.subr.mxu0 %v5543_v16 }
  0x57   : > { %761 = vmatprep.mubr.f32.mxu0 %v342_v2  ;;  %830 = vrot.lane.b32.xlu1 %v5543_v16, %s5544_s24  ;;  %s5547_s24 = smov 32  }
  0x58   : > { %4881 = vmatpush3.msra.mxu1 %v6005_v17  ;;  %4927 = vmatpush3.msra.mxu0 %v6005_v17 }
  0x59   : > { %4882 = vmatprep.subr.mxu1 %v5543_v16  ;;  %4928 = vmatprep.subr.mxu0 %v5543_v16 }
  0x5a   : > { %762 = vmatmul.mubr.f32.gmra.mxu0 %v341_v3  ;;  %4883 = vmatpush3.msra.mxu1 %v6010_v18 }
  0x5b   : > { %766 = vmatprep.mubr.f32.mxu0 %v348_v4  ;;  %4929 = vmatpush3.msra.mxu0 %v6010_v18 }
  0x5c   : > { %4884 = vmatprep.subr.mxu1 %v5543_v16  ;;  %4930 = vmatprep.subr.mxu0 %v5543_v16 }
  0x5d   : > { %4885 = vmatpush3.msra.mxu1 %v6018_v19  ;;  %4931 = vmatpush3.msra.mxu0 %v6018_v19 }
  0x5e   : > { %767 = vmatmul.mubr.f32.gmra.mxu0 %v347_v5  ;;  %4886 = vmatprep.subr.mxu1 %v5543_v16 }
  0x5f   : > { %771 = vmatprep.mubr.f32.mxu0 %v354_v6  ;;  %4932 = vmatprep.subr.mxu0 %v5543_v16 }
  0x60   : > { %4887 = vmatpush3.msra.mxu1 %v6027_v20  ;;  %4933 = vmatpush3.msra.mxu0 %v6027_v20 }
  0x61   : > { %4888 = vmatprep.subr.mxu1 %v5543_v16  ;;  %4934 = vmatprep.subr.mxu0 %v5543_v16 }
  0x62   : > { %772 = vmatmul.mubr.f32.gmra.mxu0 %v353_v7  ;;  %4889 = vmatpush3.msra.mxu1 %v6036_v21 }
  0x63   : > { %776 = vmatprep.mubr.f32.mxu0 %v360_v8  ;;  %4935 = vmatpush3.msra.mxu0 %v6036_v21 }
  0x64   : > { %4890 = vmatprep.subr.mxu1 %v5543_v16  ;;  %4936 = vmatprep.subr.mxu0 %v5543_v16 }
  0x65   : > { %4891 = vmatpush3.msra.mxu1 %v6045_v22  ;;  %4937 = vmatpush3.msra.mxu0 %v6045_v22 }
  0x66   : > { %777 = vmatmul.mubr.f32.gmra.mxu0 %v359_v9  ;;  %4892 = vmatprep.subr.mxu1 %v5543_v16  ;;  %v6103_v9 = vld [vmem:[%s7396_s3] sm:$0xff] }
  0x67   : > { %781 = vmatprep.mubr.f32.mxu0 %v366_v10  ;;  %4938 = vmatprep.subr.mxu0 %v5543_v16 }
  0x68   : > { %4893 = vmatpush3.msra.mxu1 %v6054_v23  ;;  %4939 = vmatpush3.msra.mxu0 %v6054_v23 }
  0x69   : > { %4894 = vmatprep.subr.mxu1 %v5543_v16  ;;  %4940 = vmatprep.subr.mxu0 %v5543_v16 }
  0x6a   : > { %782 = vmatmul.mubr.f32.gmra.mxu0 %v365_v11  ;;  %4895 = vmatpush3.msra.mxu1 %v6063_v24 }
  0x6b   : > { %786 = vmatprep.mubr.f32.mxu0 %v372_v12  ;;  %4941 = vmatpush3.msra.mxu0 %v6063_v24 }
  0x6c   : > { %4896 = vmatprep.subr.mxu1 %v5543_v16  ;;  %4942 = vmatprep.subr.mxu0 %v5543_v16 }
  0x6d   : > { %4897 = vmatpush3.msra.mxu1 %v6091_v60  ;;  %4943 = vmatpush3.msra.mxu0 %v6091_v60 }
  0x6e   : > { %787 = vmatmul.mubr.f32.gmra.mxu0 %v371_v13  ;;  %4898 = vmatprep.subr.mxu1 %v5543_v16 }
  0x6f   : > { %791 = vmatprep.mubr.f32.mxu0 %v378_v14  ;;  %4944 = vmatprep.subr.mxu0 %v5543_v16 }
  0x70   : > { %4899 = vmatpush3.msra.mxu1 %v6103_v9  ;;  %4900 = vmatprep.mubr.msk.f32.mxu1 %vm5545_vm1, %v5543_v16 }
  0x71   : > { %4903 = vmatprep.subr.mxu1 %v5543_v16  ;;  %4945 = vmatpush3.msra.mxu0 %v6103_v9 }
  0x72   : > { %792 = vmatmul.mubr.f32.gmra.mxu0 %v377_v15  ;;  %4972 = vmatprep.subr.mxu0 %v5543_v16 }
  0x73   : > { %4946 = vmatprep.mubr.msk.f32.mxu0 %vm5545_vm1, %v5543_v16 }
  0xf4   : > { %v4546_v25 = vpop.f32.mrf.mxu0 }
  0xf6   : > { %v4547_v26 = vpop.f32.mrf.mxu0 }
  0xf7   : > { %v4602_v27 = vpop.f32.mrf.mxu1  ;;  %v4548_v46 = vadd.f32 %v4547_v26, %v4546_v25 }
  0xf9   : > { %v4603_v29 = vpop.f32.mrf.mxu1  ;;  %v549_v51 = vadd.f32 %v4548_v46, %v6081_v48 }
  0xfa   : > { %v4549_v28 = vpop.f32.mrf.mxu0  ;;  %v4604_v52 = vadd.f32 %v4603_v29, %v4602_v27 }
  0xfb   : > { %v4605_v31 = vpop.f32.mrf.mxu1 }
  0xfc   : > { %v4550_v30 = vpop.f32.mrf.mxu0  ;;  %v654_v57 = vadd.f32 %v4604_v52, %v549_v51 }
  0xfd   : > { %v4606_v33 = vpop.f32.mrf.mxu1  ;;  %v4551_v54 = vadd.f32 %v4550_v30, %v4549_v28 }
  0xfe   : > { %v4552_v32 = vpop.f32.mrf.mxu0  ;;  %v4607_v62 = vadd.f32 %v4606_v33, %v4605_v31 }
  0xff   : > { %v4608_v35 = vpop.f32.mrf.mxu1  ;;  %v554_v61 = vadd.f32 %v4551_v54, %v6081_v48 }
 0x100   : > { %v4553_v34 = vpop.f32.mrf.mxu0 }
 0x101   : > { %v4609_v38 = vpop.f32.mrf.mxu1  ;;  %v4554_v58 = vadd.f32 %v4553_v34, %v4552_v32  ;;  %v659_v6 = vadd.f32 %v4607_v62, %v554_v61 }
 0x102   : > { %v4555_v36 = vpop.f32.mrf.mxu0  ;;  %v4610_v4 = vadd.f32 %v4609_v38, %v4608_v35 }
 0x103   : > { %v4611_v41 = vpop.f32.mrf.mxu1  ;;  %v559_v3 = vadd.f32 %v4554_v58, %v6081_v48 }
 0x104   : > { %v4556_v37 = vpop.f32.mrf.mxu0 }
 0x105   : > { %v4612_v44 = vpop.f32.mrf.mxu1  ;;  %v4557_v7 = vadd.f32 %v4556_v37, %v4555_v36  ;;  %v664_v13 = vadd.f32 %v4610_v4, %v559_v3 }
 0x106   : > { %v4558_v39 = vpop.f32.mrf.mxu0  ;;  %v4613_v25 = vadd.f32 %v4612_v44, %v4611_v41 }
 0x107   : > { %v4614_v49 = vpop.f32.mrf.mxu1  ;;  %v564_v15 = vadd.f32 %v4557_v7, %v6081_v48 }
 0x108   : > { %v4559_v40 = vpop.f32.mrf.mxu0 }
 0x109   : > { %v4615_v55 = vpop.f32.mrf.mxu1  ;;  %v4560_v26 = vadd.f32 %v4559_v40, %v4558_v39  ;;  %v669_v34 = vadd.f32 %v4613_v25, %v564_v15 }
 0x10a   : > { %v4561_v42 = vpop.f32.mrf.mxu0  ;;  %v4616_v36 = vadd.f32 %v4615_v55, %v4614_v49 }
 0x10b   : > { %v4617_v0 = vpop.f32.mrf.mxu1  ;;  %v569_v35 = vadd.f32 %v4560_v26, %v6081_v48  ;;  %v6169_v26 = vld [vmem:[%s7397_s4] ss:$0 sm:$0xff] }
 0x10c   : > { %v4562_v43 = vpop.f32.mrf.mxu0 }
 0x10d   : > { %v4618_v10 = vpop.f32.mrf.mxu1  ;;  %v4563_v31 = vadd.f32 %v4562_v43, %v4561_v42  ;;  %v674_v42 = vadd.f32 %v4616_v36, %v569_v35 }
 0x10e   : > { %v6074_v45 = vpop.f32.mrf.mxu0  ;;  %v4619_v44 = vadd.f32 %v4618_v10, %v4617_v0 }
 0x10f   : > { %v4620_v28 = vpop.f32.mrf.mxu1  ;;  %v574_v41 = vadd.f32 %v4563_v31, %v6081_v48 }
 0x110   : > { %v6076_v47 = vpop.f32.mrf.mxu0 }
 0x111   : > { %v4621_v38 = vpop.f32.mrf.mxu1  ;;  %v4566_v43 = vadd.f32 %v6076_v47, %v6074_v45  ;;  %v679_v55 = vadd.f32 %v4619_v44, %v574_v41 }
 0x112   : > { %v6083_v50 = vpop.f32.mrf.mxu0  ;;  %v4622_v58 = vadd.f32 %v4621_v38, %v4620_v28 }
 0x113   : > { %v4623_v51 = vpop.f32.mrf.mxu1 }
 0x114   : > { %v6086_v53 = vpop.f32.mrf.mxu0 }
 0x115   : > { %v4624_v47 = vpop.f32.mrf.mxu1 }
 0x116   : > { %v4658_v56 = vpop.f32.mrf.mxu0 }
 0x118   : > { %v4659_v59 = vpop.f32.mrf.mxu0 }
 0x119   : > { %v4660_v63 = vadd.f32 %v4659_v59, %v4658_v56  ;;  %v4569_v59 = vadd.f32 %v6086_v53, %v6083_v50 }
 0x11a   : > { %v4661_v1 = vpop.f32.mrf.mxu0 }
 0x11b   : > { %v759_v2 = vadd.f32 %v4660_v63, %v654_v57  ;;  %v579_v57 = vadd.f32 %v4566_v43, %v6081_v48 }
 0x11c   : > { %v4662_v5 = vpop.f32.mrf.mxu0 }
 0x11d   : > { %798 = vst.msk [vmem:[#allocation2] sm:$0xff] %vm797_vm0, %v759_v2  ;;  %v4663_v8 = vadd.f32 %v4662_v5, %v4661_v1  ;;  %v684_v0 = vadd.f32 %v4622_v58, %v579_v57  ;;  %v584_v1 = vadd.f32 %v4569_v59, %v6081_v48  ;;  %v4625_v2 = vadd.f32 %v4624_v47, %v4623_v51 }
 0x11e   : > { %v4664_v11 = vpop.f32.mrf.mxu0 }
 0x11f   : > { %v764_v12 = vadd.f32 %v4663_v8, %v659_v6  ;;  %v689_v7 = vadd.f32 %v4625_v2, %v584_v1 }
 0x120   : > { %v4665_v14 = vpop.f32.mrf.mxu0 }
 0x121   : > { %799 = vst.msk [vmem:[#allocation2 + $0x8] sm:$0xff] %vm797_vm0, %v764_v12  ;;  %v4666_v27 = vadd.f32 %v4665_v14, %v4664_v11 }
 0x122   : > { %v4667_v29 = vpop.f32.mrf.mxu0 }
 0x123   : > { %v769_v30 = vadd.f32 %v4666_v27, %v664_v13  ;;  %v6136_v13 = vpop.permute.xlu1 %830 }
 0x124   : > { %v4668_v32 = vpop.f32.mrf.mxu0  ;;  %v817_v33 = vld [vmem:[#allocation2] sm:$0xff] }
 0x125   : > { %800 = vst.msk [vmem:[#allocation2 + $0x10] sm:$0xff] %vm797_vm0, %v769_v30  ;;  %v4669_v37 = vadd.f32 %v4668_v32, %v4667_v29  ;;  %823 = vrot.lane.b32.xlu0 %v817_v33, %s5546_s23  ;;  %v819_v8 = vrot.slane %v817_v33, 7 }
 0x126   : > { %v4670_v39 = vpop.f32.mrf.mxu0 }
 0x127   : > { %v774_v40 = vadd.f32 %v4669_v37, %v669_v34  ;;  %v822_v48 = vsel %vm821_vm2, 0.0, %v819_v8 }
 0x128   : > { %v4671_v46 = vpop.f32.mrf.mxu0 }
 0x129   : > { %801 = vst.msk [vmem:[#allocation2 + $0x18] sm:$0xff] %vm797_vm0, %v774_v40  ;;  %v4672_v49 = vadd.f32 %v4671_v46, %v4670_v39  ;;  %827 = vrot.lane.b32.xlu0 %v5543_v16, %s5547_s24  ;;  %v1025_v40 = vld [vmem:[#allocation2 + $0x8] sm:$0xff] }
 0x12a   : > { %v4673_v52 = vpop.f32.mrf.mxu0 }
 0x12b   : > { %v779_v54 = vadd.f32 %v4672_v49, %v674_v42 }
 0x12c   : > { %v4674_v56 = vpop.f32.mrf.mxu0  ;;  %v1224_v8 = vld [vmem:[#allocation2 + $0x10] sm:$0xff] }
 0x12d   : > { %802 = vst.msk [vmem:[#allocation2 + $0x20] sm:$0xff] %vm797_vm0, %v779_v54  ;;  %v4675_v45 = vadd.f32 %v4674_v56, %v4673_v52  ;;  %v1027_v52 = vrot.slane %v1025_v40, 7 }
 0x12e   : > { %v4676_v61 = vpop.f32.mrf.mxu0 }
 0x12f   : > { %v784_v62 = vadd.f32 %v4675_v45, %v679_v55  ;;  %v1029_v55 = vsel %vm821_vm2, 0.0, %v1027_v52 }
 0x130   : > { %v4677_v63 = vpop.f32.mrf.mxu0 }
 0x131   : > { %803 = vst.msk [vmem:[#allocation2 + $0x28] sm:$0xff] %vm797_vm0, %v784_v62  ;;  %v4678_v3 = vadd.f32 %v4677_v63, %v4676_v61 }
 0x132   : > { %v4679_v4 = vpop.f32.mrf.mxu0 }
 0x133   : > { %v789_v5 = vadd.f32 %v4678_v3, %v684_v0 }
 0x134   : > { %v4680_v6 = vpop.f32.mrf.mxu0 }
 0x135   : > { %804 = vst.msk [vmem:[#allocation2 + $0x30] sm:$0xff] %vm797_vm0, %v789_v5  ;;  %v4681_v50 = vadd.f32 %v4680_v6, %v4679_v4 }
 0x137   : > { %v794_v53 = vadd.f32 %v4681_v50, %v689_v7 }
 0x139   : > { %805 = vst.msk [vmem:[#allocation2 + $0x38] sm:$0xff] %vm797_vm0, %v794_v53 }
 0x197   : > { %v824_v10 = vpop.permute.xlu0 %823 }
 0x198   : > { %v833_v11 = vsel %vm797_vm0, %v822_v48, %v824_v10 }
 0x19b   : > { %v6134_v12 = vpop.permute.xlu0 %827 }
 0x19c   : > { %v835_v14 = vsel %vm834_vm3, %v833_v11, %v6134_v12 }
 0x19d   : > { %v837_v15 = vsel %vm836_vm4, %v835_v14, 0.0 }
 0x19e   : > { %v839_v25 = vsel %vm838_vm5, %v837_v15, %v6136_v13 }
 0x19f   : > { %4901 = vmatmul.mubr.msk.f32.vlgmr.msra.gmra.mxu1 %vm846_vm6, %v839_v25 }
 0x1a0   : > { %4904 = vmatpush3.msra.mxu1 %v6005_v17  ;;  %4923 = vmatprep.mubr.msk.f32.mxu1 %vm5545_vm1, %v5543_v16 }
 0x1a1   : > { %4905 = vmatprep.subr.mxu1 %v5543_v16 }
 0x1a2   : > { %4906 = vmatpush3.msra.mxu1 %v6010_v18 }
 0x1a3   : > { %4907 = vmatprep.subr.mxu1 %v5543_v16 }
 0x1a4   : > { %4908 = vmatpush3.msra.mxu1 %v6018_v19 }
 0x1a5   : > { %4909 = vmatprep.subr.mxu1 %v5543_v16 }
 0x1a6   : > { %4910 = vmatpush3.msra.mxu1 %v6027_v20 }
 0x1a7   : > { %4911 = vmatprep.subr.mxu1 %v5543_v16 }
 0x1a8   : > { %4912 = vmatpush3.msra.mxu1 %v6036_v21 }
 0x1a9   : > { %4913 = vmatprep.subr.mxu1 %v5543_v16 }
 0x1aa   : > { %4914 = vmatpush3.msra.mxu1 %v6045_v22 }
 0x1ab   : > { %4915 = vmatprep.subr.mxu1 %v5543_v16 }
 0x1ac   : > { %4916 = vmatpush3.msra.mxu1 %v6054_v23 }
 0x1ad   : > { %4917 = vmatprep.subr.mxu1 %v5543_v16 }
 0x1ae   : > { %4918 = vmatpush3.msra.mxu1 %v6063_v24 }
 0x1af   : > { %4919 = vmatprep.subr.mxu1 %v5543_v16 }
 0x1b0   : > { %4920 = vmatpush3.msra.mxu1 %v6091_v60 }
 0x1b1   : > { %4921 = vmatprep.subr.mxu1 %v5543_v16 }
 0x1b2   : > { %4922 = vmatpush3.msra.mxu1 %v6103_v9 }
 0x1b3   : > { %4949 = vmatprep.subr.mxu1 %v5543_v16 }
 0x25f   : > { %v916_v27 = vpop.f32.mrf.mxu1 }
 0x260   : > { %v917_v28 = vadd.f32 %v6169_v26, %v916_v27 }
 0x261   : > { %v4902_v29 = vpop.f32.mrf.mxu1 }
 0x262   : > { %v4439_v30 = vmul.f32 -1.442695, %v917_v28  ;;  %v1226_v28 = vrot.slane %v1224_v8, 7 }
 0x264   : > { %5341 = vpow2.f32 %v4439_v30  ;;  %v1228_v30 = vsel %vm821_vm2, 0.0, %v1226_v28 }
 0x271   : > { %v5342_v31 = vpop.eup %5341 }
 0x272   : > { %v923_v32 = vadd.f32 1.0, %v5342_v31 }
 0x274   : > { %5343 = vrcp.f32 %v923_v32 }
 0x281   : > { %v5344_v33 = vpop.eup %5343 }
 0x282   : > { %928 = vrot.lane.b32.xlu1 %v5344_v33, %s5548_s26  ;;  %v926_v36 = vmul.f32 0.0, %v5344_v33 }
 0x2f4   : > { %v929_v34 = vpop.permute.xlu1 %928 }
 0x2f5   : > { %v931_v35 = vmul.f32 %v5344_v33, %v929_v34 }
 0x2f7   : > { %933 = vrot.lane.b32.xlu0 %v931_v35, %s5547_s24 }
 0x369   : > { %v934_v37 = vpop.permute.xlu0 %933 }
 0x36a   : > { %v936_v38 = vadd.f32 %v934_v37, %v926_v36 }
 0x36c   : > { %5345 = vtanh.f32 %v936_v38 }
 0x379   : > { %v5346_v39 = vpop.eup %5345 }
 0x37a   : > { %939 = vrot.lane.b32.xlu1 %v5346_v39, %s5546_s23 }
 0x37e   : > { %1038 = vrot.lane.b32.xlu1 %v1025_v40, %s5546_s23 }
 0x3ec   : > { %v940_v41 = vpop.permute.xlu1 %939 }
 0x3ed   : > { %v6176_v44 = vmul.f32 %v5344_v33, %v940_v41 }
 0x3ef   : > { %v1030_v46 = vrot.slane %v6176_v44, 7  ;;  %v1035_v42 = vrot.slane %v6176_v44, 1 }
 0x3f0   : > { %v1039_v54 = vpop.permute.xlu1 %1038 }
 0x3f1   : > { %1031 = vrot.lane.b32.xlu0 %v1030_v46, %s5549_s28  ;;  %v1037_v43 = vsel %vm1006_vm7, %v1035_v42, 0.0  ;;  %v1049_v56 = vsel %vm797_vm0, %v1029_v55, %v1039_v54 }
 0x3f2   : > { %1046 = vrot.lane.b32.xlu1 %v1037_v43, %s5546_s23 }
 0x463   : > { %v1032_v49 = vpop.permute.xlu0 %1031 }
 0x464   : > { %v1034_v51 = vsel %vm821_vm2, 0.0, %v1032_v49  ;;  %v1047_v59 = vpop.permute.xlu1 %1046 }
 0x465   : > { %1042 = vrot.lane.b32.xlu0 %v1034_v51, %s5547_s24 }
 0x4d7   : > { %v1043_v57 = vpop.permute.xlu0 %1042 }
 0x4d8   : > { %v1050_v58 = vsel %vm834_vm3, %v1049_v56, %v1043_v57  ;;  %v1423_v56 = vld [vmem:[#allocation2 + $0x18] sm:$0xff] }
 0x4d9   : > { %v1051_v45 = vsel %vm836_vm4, %v1050_v58, %v6176_v44 }
 0x4da   : > { %v1052_v47 = vsel %vm838_vm5, %v1051_v45, %v1047_v59 }
 0x4db   : > { %4924 = vmatmul.mubr.msk.f32.vlgmr.msra.gmra.mxu1 %vm846_vm6, %v1052_v47 }
 0x4dc   : > { %4950 = vmatpush3.msra.mxu1 %v6005_v17  ;;  %4969 = vmatprep.mubr.msk.f32.mxu1 %vm5545_vm1, %v5543_v16 }
 0x4dd   : > { %4951 = vmatprep.subr.mxu1 %v5543_v16 }
 0x4de   : > { %4952 = vmatpush3.msra.mxu1 %v6010_v18 }
 0x4df   : > { %4953 = vmatprep.subr.mxu1 %v5543_v16 }
 0x4e0   : > { %4954 = vmatpush3.msra.mxu1 %v6018_v19 }
 0x4e1   : > { %4955 = vmatprep.subr.mxu1 %v5543_v16 }
 0x4e2   : > { %4956 = vmatpush3.msra.mxu1 %v6027_v20 }
 0x4e3   : > { %4957 = vmatprep.subr.mxu1 %v5543_v16 }
 0x4e4   : > { %4958 = vmatpush3.msra.mxu1 %v6036_v21 }
 0x4e5   : > { %4959 = vmatprep.subr.mxu1 %v5543_v16 }
 0x4e6   : > { %4960 = vmatpush3.msra.mxu1 %v6045_v22 }
 0x4e7   : > { %4961 = vmatprep.subr.mxu1 %v5543_v16 }
 0x4e8   : > { %4962 = vmatpush3.msra.mxu1 %v6054_v23 }
 0x4e9   : > { %4963 = vmatprep.subr.mxu1 %v5543_v16 }
 0x4ea   : > { %4964 = vmatpush3.msra.mxu1 %v6063_v24 }
 0x4eb   : > { %4965 = vmatprep.subr.mxu1 %v5543_v16 }
 0x4ec   : > { %4966 = vmatpush3.msra.mxu1 %v6091_v60 }
 0x4ed   : > { %4967 = vmatprep.subr.mxu1 %v5543_v16 }
 0x4ee   : > { %4968 = vmatpush3.msra.mxu1 %v6103_v9 }
 0x4ef   : > { %4995 = vmatprep.subr.mxu1 %v5543_v16 }
 0x59b   : > { %v1122_v61 = vpop.f32.mrf.mxu1 }
 0x59c   : > { %v1123_v62 = vadd.f32 %v6169_v26, %v1122_v61 }
 0x59d   : > { %v4925_v63 = vpop.f32.mrf.mxu1 }
 0x59e   : > { %v4441_v0 = vmul.f32 -1.442695, %v1123_v62  ;;  %v1425_v63 = vrot.slane %v1423_v56, 7 }
 0x5a0   : > { %5347 = vpow2.f32 %v4441_v0 }
 0x5ad   : > { %v5348_v1 = vpop.eup %5347 }
 0x5ae   : > { %v1129_v2 = vadd.f32 1.0, %v5348_v1  ;;  %v1427_v1 = vsel %vm821_vm2, 0.0, %v1425_v63 }
 0x5b0   : > { %5349 = vrcp.f32 %v1129_v2 }
 0x5bd   : > { %v5350_v3 = vpop.eup %5349 }
 0x5be   : > { %1134 = vrot.lane.b32.xlu0 %v5350_v3, %s5548_s26  ;;  %v1132_v6 = vmul.f32 %v5350_v3, %v936_v38 }
 0x630   : > { %v1135_v4 = vpop.permute.xlu0 %1134 }
 0x631   : > { %v1137_v5 = vmul.f32 %v5350_v3, %v1135_v4 }
 0x633   : > { %1139 = vrot.lane.b32.xlu1 %v1137_v5, %s5547_s24 }
 0x6a5   : > { %v1140_v7 = vpop.permute.xlu1 %1139 }
 0x6a6   : > { %v1142_v50 = vadd.f32 %v1140_v7, %v1132_v6 }
 0x6a8   : > { %5351 = vtanh.f32 %v1142_v50 }
 0x6b5   : > { %v5352_v53 = vpop.eup %5351 }
 0x6b6   : > { %1145 = vrot.lane.b32.xlu0 %v5352_v53, %s5546_s23 }
 0x6ba   : > { %1237 = vrot.lane.b32.xlu0 %v1224_v8, %s5546_s23 }
 0x728   : > { %v1146_v10 = vpop.permute.xlu0 %1145 }
 0x729   : > { %v6219_v48 = vmul.f32 %v5350_v3, %v1146_v10 }
 0x72b   : > { %v1229_v11 = vrot.slane %v6219_v48, 7  ;;  %v1234_v14 = vrot.slane %v6219_v48, 1 }
 0x72c   : > { %v1238_v29 = vpop.permute.xlu0 %1237 }
 0x72d   : > { %1230 = vrot.lane.b32.xlu1 %v1229_v11, %s5549_s28  ;;  %v1236_v15 = vsel %vm1006_vm7, %v1234_v14, 0.0  ;;  %v1248_v31 = vsel %vm797_vm0, %v1228_v30, %v1238_v29 }
 0x72e   : > { %1245 = vrot.lane.b32.xlu0 %v1236_v15, %s5546_s23 }
 0x79f   : > { %v1231_v25 = vpop.permute.xlu1 %1230 }
 0x7a0   : > { %v1233_v27 = vsel %vm821_vm2, 0.0, %v1231_v25  ;;  %v1246_v34 = vpop.permute.xlu0 %1245 }
 0x7a1   : > { %1241 = vrot.lane.b32.xlu1 %v1233_v27, %s5547_s24 }
 0x813   : > { %v1242_v32 = vpop.permute.xlu1 %1241 }
 0x814   : > { %v1249_v33 = vsel %vm834_vm3, %v1248_v31, %v1242_v32  ;;  %v1622_v32 = vld [vmem:[#allocation2 + $0x20] sm:$0xff] }
 0x815   : > { %v1250_v35 = vsel %vm836_vm4, %v1249_v33, %v6219_v48 }
 0x816   : > { %v1251_v36 = vsel %vm838_vm5, %v1250_v35, %v1246_v34 }
 0x817   : > { %4947 = vmatmul.mubr.msk.f32.vlgmr.msra.gmra.mxu0 %vm846_vm6, %v1251_v36 }
 0x818   : > { %4973 = vmatpush3.msra.mxu0 %v6005_v17  ;;  %4992 = vmatprep.mubr.msk.f32.mxu0 %vm5545_vm1, %v5543_v16 }
 0x819   : > { %4974 = vmatprep.subr.mxu0 %v5543_v16 }
 0x81a   : > { %4975 = vmatpush3.msra.mxu0 %v6010_v18 }
 0x81b   : > { %4976 = vmatprep.subr.mxu0 %v5543_v16 }
 0x81c   : > { %4977 = vmatpush3.msra.mxu0 %v6018_v19 }
 0x81d   : > { %4978 = vmatprep.subr.mxu0 %v5543_v16 }
 0x81e   : > { %4979 = vmatpush3.msra.mxu0 %v6027_v20 }
 0x81f   : > { %4980 = vmatprep.subr.mxu0 %v5543_v16 }
 0x820   : > { %4981 = vmatpush3.msra.mxu0 %v6036_v21 }
 0x821   : > { %4982 = vmatprep.subr.mxu0 %v5543_v16 }
 0x822   : > { %4983 = vmatpush3.msra.mxu0 %v6045_v22 }
 0x823   : > { %4984 = vmatprep.subr.mxu0 %v5543_v16 }
 0x824   : > { %4985 = vmatpush3.msra.mxu0 %v6054_v23 }
 0x825   : > { %4986 = vmatprep.subr.mxu0 %v5543_v16 }
 0x826   : > { %4987 = vmatpush3.msra.mxu0 %v6063_v24 }
 0x827   : > { %4988 = vmatprep.subr.mxu0 %v5543_v16 }
 0x828   : > { %4989 = vmatpush3.msra.mxu0 %v6091_v60 }
 0x829   : > { %4990 = vmatprep.subr.mxu0 %v5543_v16 }
 0x82a   : > { %4991 = vmatpush3.msra.mxu0 %v6103_v9 }
 0x82b   : > { %5018 = vmatprep.subr.mxu0 %v5543_v16 }
 0x8d7   : > { %v1321_v37 = vpop.f32.mrf.mxu0 }
 0x8d8   : > { %v1322_v38 = vadd.f32 %v6169_v26, %v1321_v37 }
 0x8d9   : > { %v4948_v39 = vpop.f32.mrf.mxu0 }
 0x8da   : > { %v4443_v40 = vmul.f32 -1.442695, %v1322_v38 }
 0x8dc   : > { %5353 = vpow2.f32 %v4443_v40  ;;  %v1624_v40 = vrot.slane %v1622_v32, 7 }
 0x8e9   : > { %v5354_v41 = vpop.eup %5353 }
 0x8ea   : > { %v1328_v46 = vadd.f32 1.0, %v5354_v41 }
 0x8ec   : > { %5355 = vrcp.f32 %v1328_v46  ;;  %v1626_v46 = vsel %vm821_vm2, 0.0, %v1624_v40 }
 0x8f9   : > { %v5356_v42 = vpop.eup %5355 }
 0x8fa   : > { %1333 = vrot.lane.b32.xlu1 %v5356_v42, %s5548_s26  ;;  %v1331_v51 = vmul.f32 %v5356_v42, %v1142_v50 }
 0x96c   : > { %v1334_v43 = vpop.permute.xlu1 %1333 }
 0x96d   : > { %v1336_v49 = vmul.f32 %v5356_v42, %v1334_v43 }
 0x96f   : > { %1338 = vrot.lane.b32.xlu0 %v1336_v49, %s5547_s24 }
 0x9e1   : > { %v1339_v52 = vpop.permute.xlu0 %1338 }
 0x9e2   : > { %v1341_v54 = vadd.f32 %v1339_v52, %v1331_v51 }
 0x9e4   : > { %5357 = vtanh.f32 %v1341_v54 }
 0x9f1   : > { %v5358_v55 = vpop.eup %5357 }
 0x9f2   : > { %1344 = vrot.lane.b32.xlu1 %v5358_v55, %s5546_s23 }
 0x9f6   : > { %1436 = vrot.lane.b32.xlu1 %v1423_v56, %s5546_s23 }
 0xa64   : > { %v1345_v57 = vpop.permute.xlu1 %1344 }
 0xa65   : > { %v6262_v58 = vmul.f32 %v5356_v42, %v1345_v57 }
 0xa67   : > { %v1428_v59 = vrot.slane %v6262_v58, 7  ;;  %v1433_v45 = vrot.slane %v6262_v58, 1 }
 0xa68   : > { %v1437_v0 = vpop.permute.xlu1 %1436 }
 0xa69   : > { %1429 = vrot.lane.b32.xlu0 %v1428_v59, %s5549_s28  ;;  %v1435_v47 = vsel %vm1006_vm7, %v1433_v45, 0.0  ;;  %v1447_v2 = vsel %vm797_vm0, %v1427_v1, %v1437_v0 }
 0xa6a   : > { %1444 = vrot.lane.b32.xlu1 %v1435_v47, %s5546_s23 }
 0xadb   : > { %v1430_v61 = vpop.permute.xlu0 %1429 }
 0xadc   : > { %v1432_v62 = vsel %vm821_vm2, 0.0, %v1430_v61  ;;  %v1445_v5 = vpop.permute.xlu1 %1444 }
 0xadd   : > { %1440 = vrot.lane.b32.xlu0 %v1432_v62, %s5547_s24 }
 0xb4f   : > { %v1441_v3 = vpop.permute.xlu0 %1440 }
 0xb50   : > { %v1448_v4 = vsel %vm834_vm3, %v1447_v2, %v1441_v3 }
 0xb51   : > { %v1449_v6 = vsel %vm836_vm4, %v1448_v4, %v6262_v58  ;;  %v1821_v4 = vld [vmem:[#allocation2 + $0x28] sm:$0xff] }
 0xb52   : > { %v1450_v7 = vsel %vm838_vm5, %v1449_v6, %v1445_v5 }
 0xb53   : > { %4970 = vmatmul.mubr.msk.f32.vlgmr.msra.gmra.mxu1 %vm846_vm6, %v1450_v7 }
 0xb54   : > { %4996 = vmatpush3.msra.mxu1 %v6005_v17  ;;  %5015 = vmatprep.mubr.msk.f32.mxu1 %vm5545_vm1, %v5543_v16 }
 0xb55   : > { %4997 = vmatprep.subr.mxu1 %v5543_v16 }
 0xb56   : > { %4998 = vmatpush3.msra.mxu1 %v6010_v18 }
 0xb57   : > { %4999 = vmatprep.subr.mxu1 %v5543_v16 }
 0xb58   : > { %5000 = vmatpush3.msra.mxu1 %v6018_v19 }
 0xb59   : > { %5001 = vmatprep.subr.mxu1 %v5543_v16 }
 0xb5a   : > { %5002 = vmatpush3.msra.mxu1 %v6027_v20 }
 0xb5b   : > { %5003 = vmatprep.subr.mxu1 %v5543_v16 }
 0xb5c   : > { %5004 = vmatpush3.msra.mxu1 %v6036_v21 }
 0xb5d   : > { %5005 = vmatprep.subr.mxu1 %v5543_v16 }
 0xb5e   : > { %5006 = vmatpush3.msra.mxu1 %v6045_v22 }
 0xb5f   : > { %5007 = vmatprep.subr.mxu1 %v5543_v16 }
 0xb60   : > { %5008 = vmatpush3.msra.mxu1 %v6054_v23 }
 0xb61   : > { %5009 = vmatprep.subr.mxu1 %v5543_v16 }
 0xb62   : > { %5010 = vmatpush3.msra.mxu1 %v6063_v24 }
 0xb63   : > { %5011 = vmatprep.subr.mxu1 %v5543_v16 }
 0xb64   : > { %5012 = vmatpush3.msra.mxu1 %v6091_v60 }
 0xb65   : > { %5013 = vmatprep.subr.mxu1 %v5543_v16 }
 0xb66   : > { %5014 = vmatpush3.msra.mxu1 %v6103_v9 }
 0xb67   : > { %5041 = vmatprep.subr.mxu1 %v5543_v16 }
 0xc13   : > { %v1520_v50 = vpop.f32.mrf.mxu1 }
 0xc14   : > { %v1521_v53 = vadd.f32 %v6169_v26, %v1520_v50 }
 0xc15   : > { %v4971_v8 = vpop.f32.mrf.mxu1 }
 0xc16   : > { %v4445_v10 = vmul.f32 -1.442695, %v1521_v53 }
 0xc18   : > { %5359 = vpow2.f32 %v4445_v10 }
 0xc25   : > { %v5360_v11 = vpop.eup %5359 }
 0xc26   : > { %v1527_v14 = vadd.f32 1.0, %v5360_v11  ;;  %v1823_v11 = vrot.slane %v1821_v4, 7 }
 0xc28   : > { %5361 = vrcp.f32 %v1527_v14 }
 0xc35   : > { %v5362_v15 = vpop.eup %5361 }
 0xc36   : > { %1532 = vrot.lane.b32.xlu0 %v5362_v15, %s5548_s26  ;;  %v1530_v28 = vmul.f32 %v5362_v15, %v1341_v54 }
 0xca8   : > { %v1533_v25 = vpop.permute.xlu0 %1532 }
 0xca9   : > { %v1535_v27 = vmul.f32 %v5362_v15, %v1533_v25 }
 0xcab   : > { %1537 = vrot.lane.b32.xlu1 %v1535_v27, %s5547_s24 }
 0xd1d   : > { %v1538_v29 = vpop.permute.xlu1 %1537 }
 0xd1e   : > { %v1540_v30 = vadd.f32 %v1538_v29, %v1530_v28 }
 0xd20   : > { %5363 = vtanh.f32 %v1540_v30 }
 0xd2d   : > { %v5364_v31 = vpop.eup %5363 }
 0xd2e   : > { %1543 = vrot.lane.b32.xlu0 %v5364_v31, %s5546_s23 }
 0xd32   : > { %1635 = vrot.lane.b32.xlu0 %v1622_v32, %s5546_s23 }
 0xda0   : > { %v1544_v33 = vpop.permute.xlu0 %1543 }
 0xda1   : > { %v6305_v34 = vmul.f32 %v5362_v15, %v1544_v33  ;;  %v1825_v15 = vsel %vm821_vm2, 0.0, %v1823_v11 }
 0xda3   : > { %v1627_v35 = vrot.slane %v6305_v34, 7  ;;  %v1632_v36 = vrot.slane %v6305_v34, 1 }
 0xda4   : > { %v1636_v41 = vpop.permute.xlu0 %1635 }
 0xda5   : > { %1628 = vrot.lane.b32.xlu1 %v1627_v35, %s5549_s28  ;;  %v1634_v37 = vsel %vm1006_vm7, %v1632_v36, 0.0  ;;  %v1646_v42 = vsel %vm797_vm0, %v1626_v46, %v1636_v41 }
 0xda6   : > { %1643 = vrot.lane.b32.xlu0 %v1634_v37, %s5546_s23 }
 0xe17   : > { %v1629_v38 = vpop.permute.xlu1 %1628 }
 0xe18   : > { %v1631_v39 = vsel %vm821_vm2, 0.0, %v1629_v38  ;;  %v1644_v51 = vpop.permute.xlu0 %1643 }
 0xe19   : > { %1639 = vrot.lane.b32.xlu1 %v1631_v39, %s5547_s24 }
 0xe8b   : > { %v1640_v43 = vpop.permute.xlu1 %1639 }
 0xe8c   : > { %v1647_v49 = vsel %vm834_vm3, %v1646_v42, %v1640_v43 }
 0xe8d   : > { %v1648_v52 = vsel %vm836_vm4, %v1647_v49, %v6305_v34 }
 0xe8e   : > { %v1649_v54 = vsel %vm838_vm5, %v1648_v52, %v1644_v51 }
 0xe8f   : > { %4993 = vmatmul.mubr.msk.f32.vlgmr.msra.gmra.mxu0 %vm846_vm6, %v1649_v54 }
 0xe90   : > { %5019 = vmatpush3.msra.mxu0 %v6005_v17  ;;  %5038 = vmatprep.mubr.msk.f32.mxu0 %vm5545_vm1, %v5543_v16 }
 0xe91   : > { %5020 = vmatprep.subr.mxu0 %v5543_v16 }
 0xe92   : > { %5021 = vmatpush3.msra.mxu0 %v6010_v18 }
 0xe93   : > { %5022 = vmatprep.subr.mxu0 %v5543_v16 }
 0xe94   : > { %5023 = vmatpush3.msra.mxu0 %v6018_v19 }
 0xe95   : > { %5024 = vmatprep.subr.mxu0 %v5543_v16 }
 0xe96   : > { %5025 = vmatpush3.msra.mxu0 %v6027_v20 }
 0xe97   : > { %5026 = vmatprep.subr.mxu0 %v5543_v16 }
 0xe98   : > { %5027 = vmatpush3.msra.mxu0 %v6036_v21 }
 0xe99   : > { %5028 = vmatprep.subr.mxu0 %v5543_v16 }
 0xe9a   : > { %5029 = vmatpush3.msra.mxu0 %v6045_v22 }
 0xe9b   : > { %5030 = vmatprep.subr.mxu0 %v5543_v16 }
 0xe9c   : > { %5031 = vmatpush3.msra.mxu0 %v6054_v23 }
 0xe9d   : > { %5032 = vmatprep.subr.mxu0 %v5543_v16 }
 0xe9e   : > { %5033 = vmatpush3.msra.mxu0 %v6063_v24 }
 0xe9f   : > { %5034 = vmatprep.subr.mxu0 %v5543_v16 }
 0xea0   : > { %5035 = vmatpush3.msra.mxu0 %v6091_v60 }
 0xea1   : > { %5036 = vmatprep.subr.mxu0 %v5543_v16 }
 0xea2   : > { %5037 = vmatpush3.msra.mxu0 %v6103_v9 }
 0xea3   : > { %5064 = vmatprep.subr.mxu0 %v5543_v16 }
 0xf4f   : > { %v1719_v55 = vpop.f32.mrf.mxu0 }
 0xf50   : > { %v1720_v56 = vadd.f32 %v6169_v26, %v1719_v55 }
 0xf51   : > { %v4994_v57 = vpop.f32.mrf.mxu0 }
 0xf52   : > { %v4447_v59 = vmul.f32 -1.442695, %v1720_v56 }
 0xf54   : > { %5365 = vpow2.f32 %v4447_v59 }
 0xf61   : > { %v5366_v45 = vpop.eup %5365 }
 0xf62   : > { %v1726_v47 = vadd.f32 1.0, %v5366_v45 }
 0xf64   : > { %5367 = vrcp.f32 %v1726_v47 }
 0xf71   : > { %v5368_v61 = vpop.eup %5367 }
 0xf72   : > { %1731 = vrot.lane.b32.xlu1 %v5368_v61, %s5548_s26  ;;  %v1729_v0 = vmul.f32 %v5368_v61, %v1540_v30 }
 0xfe4   : > { %v1732_v62 = vpop.permute.xlu1 %1731 }
 0xfe5   : > { %v1734_v63 = vmul.f32 %v5368_v61, %v1732_v62 }
 0xfe7   : > { %1736 = vrot.lane.b32.xlu0 %v1734_v63, %s5547_s24 }
0x1059   : > { %v1737_v1 = vpop.permute.xlu0 %1736 }
0x105a   : > { %v6346_v2 = vadd.f32 %v1737_v1, %v1729_v0 }
0x105c   : > { %5369 = vtanh.f32 %v6346_v2 }
0x1069   : > { %v5370_v3 = vpop.eup %5369 }
0x106a   : > { %1742 = vrot.lane.b32.xlu1 %v5370_v3, %s5546_s23 }
0x106e   : > { %1834 = vrot.lane.b32.xlu1 %v1821_v4, %s5546_s23 }
0x10dc   : > { %v1743_v5 = vpop.permute.xlu1 %1742 }
0x10dd   : > { %v6351_v6 = vmul.f32 %v5368_v61, %v1743_v5  ;;  %v2020_v5 = vld [vmem:[#allocation2 + $0x30] sm:$0xff] }
0x10df   : > { %v1826_v7 = vrot.slane %v6351_v6, 7  ;;  %v1831_v50 = vrot.slane %v6351_v6, 1 }
0x10e0   : > { %v1835_v14 = vpop.permute.xlu1 %1834 }
0x10e1   : > { %1827 = vrot.lane.b32.xlu0 %v1826_v7, %s5549_s28  ;;  %v1833_v53 = vsel %vm1006_vm7, %v1831_v50, 0.0  ;;  %v1845_v25 = vsel %vm797_vm0, %v1825_v15, %v1835_v14  ;;  %v2022_v15 = vrot.slane %v2020_v5, 7 }
0x10e2   : > { %1842 = vrot.lane.b32.xlu1 %v1833_v53, %s5546_s23 }
0x1153   : > { %v1828_v8 = vpop.permute.xlu0 %1827 }
0x1154   : > { %v1830_v10 = vsel %vm821_vm2, 0.0, %v1828_v8  ;;  %v1843_v29 = vpop.permute.xlu1 %1842 }
0x1155   : > { %1838 = vrot.lane.b32.xlu0 %v1830_v10, %s5547_s24 }
0x11c7   : > { %v1839_v27 = vpop.permute.xlu0 %1838 }
0x11c8   : > { %v1846_v28 = vsel %vm834_vm3, %v1845_v25, %v1839_v27  ;;  %v2024_v27 = vsel %vm821_vm2, 0.0, %v2022_v15 }
0x11c9   : > { %v1847_v30 = vsel %vm836_vm4, %v1846_v28, %v6351_v6 }
0x11ca   : > { %v1848_v31 = vsel %vm838_vm5, %v1847_v30, %v1843_v29 }
0x11cb   : > { %5016 = vmatmul.mubr.msk.f32.vlgmr.msra.gmra.mxu1 %vm846_vm6, %v1848_v31 }
0x11cc   : > { %5042 = vmatpush3.msra.mxu1 %v6005_v17  ;;  %5061 = vmatprep.mubr.msk.f32.mxu1 %vm5545_vm1, %v5543_v16 }
0x11cd   : > { %5043 = vmatprep.subr.mxu1 %v5543_v16 }
0x11ce   : > { %5044 = vmatpush3.msra.mxu1 %v6010_v18 }
0x11cf   : > { %5045 = vmatprep.subr.mxu1 %v5543_v16 }
0x11d0   : > { %5046 = vmatpush3.msra.mxu1 %v6018_v19 }
0x11d1   : > { %5047 = vmatprep.subr.mxu1 %v5543_v16 }
0x11d2   : > { %5048 = vmatpush3.msra.mxu1 %v6027_v20 }
0x11d3   : > { %5049 = vmatprep.subr.mxu1 %v5543_v16 }
0x11d4   : > { %5050 = vmatpush3.msra.mxu1 %v6036_v21 }
0x11d5   : > { %5051 = vmatprep.subr.mxu1 %v5543_v16 }
0x11d6   : > { %5052 = vmatpush3.msra.mxu1 %v6045_v22 }
0x11d7   : > { %5053 = vmatprep.subr.mxu1 %v5543_v16 }
0x11d8   : > { %5054 = vmatpush3.msra.mxu1 %v6054_v23 }
0x11d9   : > { %5055 = vmatprep.subr.mxu1 %v5543_v16 }
0x11da   : > { %5056 = vmatpush3.msra.mxu1 %v6063_v24 }
0x11db   : > { %5057 = vmatprep.subr.mxu1 %v5543_v16 }
0x11dc   : > { %5058 = vmatpush3.msra.mxu1 %v6091_v60 }
0x11dd   : > { %5059 = vmatprep.subr.mxu1 %v5543_v16 }
0x11de   : > { %5060 = vmatpush3.msra.mxu1 %v6103_v9 }
0x11df   : > { %5087 = vmatprep.subr.mxu1 %v5543_v16 }
0x128b   : > { %v1918_v17 = vpop.f32.mrf.mxu1 }
0x128c   : > { %v1919_v18 = vadd.f32 %v6169_v26, %v1918_v17 }
0x128d   : > { %v5017_v19 = vpop.f32.mrf.mxu1 }
0x128e   : > { %v4449_v20 = vmul.f32 -1.442695, %v1919_v18  ;;  %v6435_v18 = vld [vmem:[%s7396_s3 + $0x98] sm:$0xff] }
0x1290   : > { %5371 = vpow2.f32 %v4449_v20  ;;  %v6442_v20 = vld [vmem:[%s7396_s3 + $0x90] sm:$0xff] }
0x129d   : > { %v5372_v21 = vpop.eup %5371 }
0x129e   : > { %v1925_v22 = vadd.f32 1.0, %v5372_v21  ;;  %v6451_v21 = vld [vmem:[%s7396_s3 + $0x88] sm:$0xff] }
0x12a0   : > { %5373 = vrcp.f32 %v1925_v22  ;;  %v6458_v22 = vld [vmem:[%s7396_s3 + $0x80] sm:$0xff] }
0x12ad   : > { %v5374_v23 = vpop.eup %5373 }
0x12ae   : > { %1930 = vrot.lane.b32.xlu0 %v5374_v23, %s5548_s26  ;;  %v1928_v32 = vmul.f32 %v5374_v23, %v6346_v2 }
0x12b2   : > { %944 = vrot.lane.b32.xlu0 %v6176_v44, %s5549_s28 }
0x1320   : > { %v1931_v24 = vpop.permute.xlu0 %1930 }
0x1321   : > { %v1933_v60 = vmul.f32 %v5374_v23, %v1931_v24  ;;  %v6465_v24 = vld [vmem:[%s7396_s3 + $0x78] sm:$0xff] }
0x1323   : > { %1935 = vrot.lane.b32.xlu1 %v1933_v60, %s5547_s24 }
0x1324   : > { %v945_v9 = vpop.permute.xlu0 %944 }
0x1325   : > { %947 = vxpose.xlu0.b32.start.end [1/1] (short) (narrow) %v945_v9, 16  ;;  %v6472_v9 = vld [vmem:[%s7396_s3 + $0x70] sm:$0xff] }
0x1395   : > { %v1936_v33 = vpop.permute.xlu1 %1935 }
0x1396   : > { %v6395_v35 = vadd.f32 %v1936_v33, %v1928_v32 }
0x1398   : > { %5375 = vtanh.f32 %v6395_v35 }
0x13a1   : > { %v963_v36 = vpop.trf.xlu0 }
0x13a2   : > { %v980_v37 = vrot.slane %v963_v36, 1  ;;  %v982_v38 = vrot.slane %v963_v36, 2  ;;  %v984_v40 = vrot.slane %v963_v36, 3  ;;  %v1008_v45 = vrot.slane %v963_v36, 4 }
0x13a4   : > { %v995_v39 = vsel %vm821_vm2, %v963_v36, %v980_v37  ;;  %v1010_v59 = vsel %vm821_vm2, %v980_v37, %v982_v38  ;;  %v6481_v36 = vld [vmem:[%s7396_s3 + $0x68] sm:$0xff]  ;;  %v6488_v37 = vld [vmem:[%s7396_s3 + $0x60] sm:$0xff] }
0x13a5   : > { %v5376_v44 = vpop.eup %5375  ;;  %v997_v41 = vsel %vm996_vm8, %v995_v39, %v982_v38  ;;  %v964_v46 = vpop.trf.xlu0  ;;  %v1011_v47 = vsel %vm996_vm8, %v1010_v59, %v984_v40  ;;  %v6497_v39 = vld [vmem:[%s7396_s3 + $0x58] sm:$0xff] }
0x13a6   : > { %1941 = vrot.lane.b32.xlu1 %v5376_v44, %s5546_s23  ;;  %v987_v42 = vrot.slane %v964_v46, 4  ;;  %v989_v43 = vrot.slane %v964_v46, 5  ;;  %v999_v49 = vsel %vm998_vm9, %v997_v41, %v984_v40  ;;  %v991_v51 = vrot.slane %v964_v46, 6  ;;  %v6505_v40 = vld [vmem:[%s7396_s3 + $0x50] sm:$0xff] }
0x13a7   : > { %v993_v54 = vrot.slane %v964_v46, 7  ;;  %v1012_v61 = vsel %vm998_vm9, %v1011_v47, %v1008_v45 }
0x13a8   : > { %v1001_v52 = vsel %vm1000_vm10, %v999_v49, %v987_v42  ;;  %v1013_v62 = vsel %vm1000_vm10, %v1012_v61, %v989_v43  ;;  %v6540_v49 = vld [vmem:[%s7397_s4 + $0x1] ss:$0 sm:$0xff] }
0x13a9   : > { %v1003_v55 = vsel %vm1002_vm11, %v1001_v52, %v989_v43  ;;  %v1014_v0 = vsel %vm1002_vm11, %v1013_v62, %v991_v51 }
0x13aa   : > { %v1005_v56 = vsel %vm1004_vm12, %v1003_v55, %v991_v51  ;;  %v1015_v3 = vsel %vm1004_vm12, %v1014_v0, %v993_v54 }
0x13ab   : > { %v1007_v57 = vsel %vm1006_vm7, %v1005_v56, %v993_v54  ;;  %v1016_v4 = vsel %vm1006_vm7, %v1015_v3, %v964_v46 }
0x1418   : > { %v1942_v63 = vpop.permute.xlu1 %1941 }
0x1419   : > { %v6411_v1 = vmul.f32 %v5374_v23, %v1942_v63 }
0x141b   : > { %v2025_v2 = vrot.slane %v6411_v1, 7  ;;  %v2030_v53 = vrot.slane %v6411_v1, 1 }
0x141d   : > { %2026 = vrot.lane.b32.xlu1 %v2025_v2, %s5549_s28  ;;  %v2032_v11 = vsel %vm1006_vm7, %v2030_v53, 0.0 }
0x1421   : > { %1018 = vrot.lane.b32.xlu1 %v1016_v4, %s7403_s14 }
0x1425   : > { %2033 = vrot.lane.b32.xlu1 %v2020_v5, %s5546_s23 }
0x148f   : > { %v2027_v7 = vpop.permute.xlu1 %2026 }
0x1490   : > { %v2029_v50 = vsel %vm821_vm2, 0.0, %v2027_v7 }
0x1491   : > { %2037 = vrot.lane.b32.xlu1 %v2029_v50, %s5547_s24 }
0x1493   : > { %v1019_v8 = vpop.permute.xlu1 %1018 }
0x1494   : > { %v1022_v10 = vsel %vm1021_vm13, %v1007_v57, %v1019_v8 }
0x1495   : > { %1023 = vst.msk [vmem:[#allocation2] sm:$0xff] %vm797_vm0, %v1022_v10  ;;  %2041 = vrot.lane.b32.xlu1 %v2032_v11, %s5546_s23 }
0x1497   : > { %v2034_v25 = vpop.permute.xlu1 %2033 }
0x1498   : > { %v2044_v28 = vsel %vm797_vm0, %v2024_v27, %v2034_v25 }
0x149c   : > { %v2430_v14 = vld [vmem:[#allocation2] sm:$0xff] }
0x149d   : > { %2435 = vrot.lane.b32.xlu1 %v2430_v14, %s5546_s23  ;;  %v2432_v23 = vrot.slane %v2430_v14, 7 }
0x149f   : > { %v2434_v32 = vsel %vm821_vm2, 0.0, %v2432_v23 }
0x1503   : > { %v2038_v29 = vpop.permute.xlu1 %2037 }
0x1504   : > { %v2045_v30 = vsel %vm834_vm3, %v2044_v28, %v2038_v29 }
0x1505   : > { %v2046_v31 = vsel %vm836_vm4, %v2045_v30, %v6411_v1 }
0x1507   : > { %v2042_v17 = vpop.permute.xlu1 %2041 }
0x1508   : > { %v2047_v19 = vsel %vm838_vm5, %v2046_v31, %v2042_v17 }
0x1509   : > { %5039 = vmatmul.mubr.msk.f32.vlgmr.msra.gmra.mxu0 %vm846_vm6, %v2047_v19 }
0x150a   : > { %5065 = vmatpush3.msra.mxu0 %v6435_v18  ;;  %5084 = vmatprep.mubr.msk.f32.mxu0 %vm5545_vm1, %v5543_v16 }
0x150b   : > { %5066 = vmatprep.subr.mxu0 %v5543_v16 }
0x150c   : > { %5067 = vmatpush3.msra.mxu0 %v6442_v20 }
0x150d   : > { %5068 = vmatprep.subr.mxu0 %v5543_v16 }
0x150e   : > { %5069 = vmatpush3.msra.mxu0 %v6451_v21 }
0x150f   : > { %5070 = vmatprep.subr.mxu0 %v5543_v16  ;;  %v2436_v60 = vpop.permute.xlu1 %2435 }
0x1510   : > { %5071 = vmatpush3.msra.mxu0 %v6458_v22  ;;  %v2438_v33 = vsel %vm797_vm0, %v2434_v32, %v2436_v60 }
0x1511   : > { %5072 = vmatprep.subr.mxu0 %v5543_v16  ;;  %v2439_v38 = vsel %vm834_vm3, %v2438_v33, %v6134_v12 }
0x1512   : > { %5073 = vmatpush3.msra.mxu0 %v6465_v24  ;;  %v2440_v44 = vsel %vm836_vm4, %v2439_v38, 0.0 }
0x1513   : > { %5074 = vmatprep.subr.mxu0 %v5543_v16  ;;  %v2441_v12 = vsel %vm838_vm5, %v2440_v44, %v6136_v13 }
0x1514   : > { %5075 = vmatpush3.msra.mxu0 %v6472_v9 }
0x1515   : > { %5076 = vmatprep.subr.mxu0 %v5543_v16 }
0x1516   : > { %5077 = vmatpush3.msra.mxu0 %v6481_v36 }
0x1517   : > { %5078 = vmatprep.subr.mxu0 %v5543_v16 }
0x1518   : > { %5079 = vmatpush3.msra.mxu0 %v6488_v37 }
0x1519   : > { %5080 = vmatprep.subr.mxu0 %v5543_v16 }
0x151a   : > { %5081 = vmatpush3.msra.mxu0 %v6497_v39 }
0x151b   : > { %5082 = vmatprep.subr.mxu0 %v5543_v16 }
0x151c   : > { %5083 = vmatpush3.msra.mxu0 %v6505_v40 }
0x151d   : > { %5085 = vmatmul.mubr.msk.f32.vlgmr.msra.gmra.mxu0 %vm846_vm6, %v2441_v12  ;;  %5110 = vmatprep.subr.mxu0 %v5543_v16 }
0x151e   : > { %5111 = vmatpush3.msra.mxu0 %v6435_v18  ;;  %5130 = vmatprep.mubr.msk.f32.mxu0 %vm5545_vm1, %v5543_v16 }
0x151f   : > { %5112 = vmatprep.subr.mxu0 %v5543_v16 }
0x1520   : > { %5113 = vmatpush3.msra.mxu0 %v6442_v20 }
0x1521   : > { %5114 = vmatprep.subr.mxu0 %v5543_v16 }
0x1522   : > { %5115 = vmatpush3.msra.mxu0 %v6451_v21 }
0x1523   : > { %5116 = vmatprep.subr.mxu0 %v5543_v16 }
0x1524   : > { %5117 = vmatpush3.msra.mxu0 %v6458_v22 }
0x1525   : > { %5118 = vmatprep.subr.mxu0 %v5543_v16 }
0x1526   : > { %5119 = vmatpush3.msra.mxu0 %v6465_v24 }
0x1527   : > { %5120 = vmatprep.subr.mxu0 %v5543_v16 }
0x1528   : > { %5121 = vmatpush3.msra.mxu0 %v6472_v9 }
0x1529   : > { %5122 = vmatprep.subr.mxu0 %v5543_v16 }
0x152a   : > { %5123 = vmatpush3.msra.mxu0 %v6481_v36 }
0x152b   : > { %5124 = vmatprep.subr.mxu0 %v5543_v16 }
0x152c   : > { %5125 = vmatpush3.msra.mxu0 %v6488_v37 }
0x152d   : > { %5126 = vmatprep.subr.mxu0 %v5543_v16 }
0x152e   : > { %5127 = vmatpush3.msra.mxu0 %v6497_v39 }
0x152f   : > { %5128 = vmatprep.subr.mxu0 %v5543_v16 }
0x1530   : > { %5129 = vmatpush3.msra.mxu0 %v6505_v40 }
0x1531   : > { %5156 = vmatprep.subr.mxu0 %v5543_v16 }
0x15c9   : > { %v2117_v13 = vpop.f32.mrf.mxu0 }
0x15ca   : > { %v2118_v41 = vadd.f32 %v6169_v26, %v2117_v13 }
0x15cb   : > { %v5040_v46 = vpop.f32.mrf.mxu0 }
0x15cc   : > { %v4451_v42 = vmul.f32 -1.442695, %v2118_v41 }
0x15ce   : > { %5377 = vpow2.f32 %v4451_v42 }
0x15db   : > { %v5378_v43 = vpop.eup %5377 }
0x15dc   : > { %v2124_v51 = vadd.f32 1.0, %v5378_v43 }
0x15dd   : > { %v2517_v52 = vpop.f32.mrf.mxu0 }
0x15de   : > { %5379 = vrcp.f32 %v2124_v51  ;;  %v2518_v54 = vadd.f32 %v6540_v49, %v2517_v52 }
0x15df   : > { %v5086_v55 = vpop.f32.mrf.mxu0 }
0x15e0   : > { %v4467_v56 = vmul.f32 -1.442695, %v2518_v54 }
0x15e2   : > { %5381 = vpow2.f32 %v4467_v56  ;;  %v2219_v56 = vld [vmem:[#allocation2 + $0x38] sm:$0xff] }
0x15eb   : > { %v5380_v57 = vpop.eup %5379 }
0x15ec   : > { %2129 = vrot.lane.b32.xlu1 %v5380_v57, %s5548_s26  ;;  %v2127_v0 = vmul.f32 %v5380_v57, %v6395_v35 }
0x15ef   : > { %v5382_v26 = vpop.eup %5381 }
0x15f0   : > { %v2524_v59 = vadd.f32 1.0, %v5382_v26 }
0x15f2   : > { %5383 = vrcp.f32 %v2524_v59 }
0x15ff   : > { %v5384_v45 = vpop.eup %5383 }
0x1600   : > { %2529 = vrot.lane.b32.xlu1 %v5384_v45, %s5548_s26  ;;  %v2527_v5 = vmul.f32 0.0, %v5384_v45 }
0x165e   : > { %v2130_v47 = vpop.permute.xlu1 %2129 }
0x165f   : > { %v2132_v61 = vmul.f32 %v5380_v57, %v2130_v47 }
0x1661   : > { %2134 = vrot.lane.b32.xlu0 %v2132_v61, %s5547_s24 }
0x1672   : > { %v2530_v62 = vpop.permute.xlu1 %2529 }
0x1673   : > { %v2532_v63 = vmul.f32 %v5384_v45, %v2530_v62 }
0x1675   : > { %2534 = vrot.lane.b32.xlu1 %v2532_v63, %s5547_s24 }
0x1679   : > { %1150 = vrot.lane.b32.xlu1 %v6219_v48, %s5549_s28 }
0x16d3   : > { %v2135_v2 = vpop.permute.xlu0 %2134 }
0x16d4   : > { %v6550_v3 = vadd.f32 %v2135_v2, %v2127_v0 }
0x16d6   : > { %5385 = vtanh.f32 %v6550_v3 }
0x16e3   : > { %v5386_v4 = vpop.eup %5385 }
0x16e4   : > { %2140 = vrot.lane.b32.xlu1 %v5386_v4, %s5546_s23 }
0x16e7   : > { %v2535_v7 = vpop.permute.xlu1 %2534 }
0x16e8   : > { %v6554_v50 = vadd.f32 %v2535_v7, %v2527_v5  ;;  %v2221_v5 = vrot.slane %v2219_v56, 7 }
0x16ea   : > { %5387 = vtanh.f32 %v6554_v50 }
0x16eb   : > { %v1151_v48 = vpop.permute.xlu1 %1150 }
0x16f7   : > { %v5388_v53 = vpop.eup %5387 }
0x16f8   : > { %2540 = vrot.lane.b32.xlu1 %v5388_v53, %s5546_s23  ;;  %v2223_v53 = vsel %vm821_vm2, 0.0, %v2221_v5 }
0x1721   : > { %1153 = vxpose.xlu1.b32.start.end [1/1] (short) (narrow) %v1151_v48, 16 }
0x1756   : > { %v2141_v35 = vpop.permute.xlu1 %2140 }
0x1757   : > { %v6558_v8 = vmul.f32 %v5380_v57, %v2141_v35 }
0x1759   : > { %v2224_v10 = vrot.slane %v6558_v8, 7  ;;  %v2229_v57 = vrot.slane %v6558_v8, 1 }
0x175b   : > { %2225 = vrot.lane.b32.xlu0 %v2224_v10, %s5549_s28  ;;  %v2231_v26 = vsel %vm1006_vm7, %v2229_v57, 0.0 }
0x176a   : > { %v2541_v11 = vpop.permute.xlu1 %2540 }
0x176b   : > { %v6572_v42 = vmul.f32 %v5384_v45, %v2541_v11 }
0x176d   : > { %v2623_v55 = vrot.slane %v6572_v42, 7  ;;  %v2628_v2 = vrot.slane %v6572_v42, 1 }
0x176f   : > { %v2630_v4 = vsel %vm1006_vm7, %v2628_v2, 0.0 }
0x179d   : > { %v1169_v14 = vpop.trf.xlu1 }
0x179e   : > { %v1186_v15 = vrot.slane %v1169_v14, 1  ;;  %v1188_v25 = vrot.slane %v1169_v14, 2  ;;  %v1190_v27 = vrot.slane %v1169_v14, 3  ;;  %v1208_v31 = vrot.slane %v1169_v14, 4 }
0x17a0   : > { %v1201_v28 = vsel %vm821_vm2, %v1169_v14, %v1186_v15  ;;  %v1210_v29 = vsel %vm821_vm2, %v1186_v15, %v1188_v25 }
0x17a1   : > { %v1202_v30 = vsel %vm996_vm8, %v1201_v28, %v1188_v25  ;;  %v1170_v17 = vpop.trf.xlu1  ;;  %v1211_v19 = vsel %vm996_vm8, %v1210_v29, %v1190_v27 }
0x17a2   : > { %v1193_v23 = vrot.slane %v1170_v17, 4  ;;  %v1195_v60 = vrot.slane %v1170_v17, 5  ;;  %v1197_v32 = vrot.slane %v1170_v17, 6  ;;  %v1212_v33 = vsel %vm998_vm9, %v1211_v19, %v1208_v31 }
0x17a3   : > { %v1203_v38 = vsel %vm998_vm9, %v1202_v30, %v1190_v27  ;;  %v1199_v44 = vrot.slane %v1170_v17, 7 }
0x17a4   : > { %v1213_v12 = vsel %vm1000_vm10, %v1212_v33, %v1195_v60  ;;  %v1204_v13 = vsel %vm1000_vm10, %v1203_v38, %v1193_v23 }
0x17a5   : > { %v1214_v41 = vsel %vm1002_vm11, %v1213_v12, %v1197_v32  ;;  %v1205_v46 = vsel %vm1002_vm11, %v1204_v13, %v1195_v60 }
0x17a6   : > { %v1215_v43 = vsel %vm1004_vm12, %v1214_v41, %v1199_v44  ;;  %v1206_v51 = vsel %vm1004_vm12, %v1205_v46, %v1197_v32 }
0x17a7   : > { %v1216_v52 = vsel %vm1006_vm7, %v1215_v43, %v1170_v17  ;;  %v1207_v54 = vsel %vm1006_vm7, %v1206_v51, %v1199_v44 }
0x17a8   : > { %1218 = vrot.lane.b32.xlu0 %v1216_v52, %s7403_s14 }
0x17ac   : > { %2624 = vrot.lane.b32.xlu0 %v2623_v55, %s5549_s28 }
0x17b0   : > { %2232 = vrot.lane.b32.xlu0 %v2219_v56, %s5546_s23 }
0x17b4   : > { %2240 = vrot.lane.b32.xlu0 %v2231_v26, %s5546_s23 }
0x17cd   : > { %v2226_v59 = vpop.permute.xlu0 %2225 }
0x17ce   : > { %v2228_v45 = vsel %vm821_vm2, 0.0, %v2226_v59 }
0x17cf   : > { %2236 = vrot.lane.b32.xlu1 %v2228_v45, %s5547_s24 }
0x181a   : > { %v1219_v47 = vpop.permute.xlu0 %1218 }
0x181b   : > { %v1221_v61 = vsel %vm1021_vm13, %v1207_v54, %v1219_v47 }
0x181c   : > { %1222 = vst.msk [vmem:[#allocation2 + $0x8] sm:$0xff] %vm797_vm0, %v1221_v61 }
0x181e   : > { %v2625_v63 = vpop.permute.xlu0 %2624 }
0x181f   : > { %v2627_v0 = vsel %vm821_vm2, 0.0, %v2625_v63 }
0x1822   : > { %v2233_v7 = vpop.permute.xlu0 %2232 }
0x1823   : > { %v2618_v62 = vld [vmem:[#allocation2 + $0x8] sm:$0xff]  ;;  %v2243_v48 = vsel %vm797_vm0, %v2223_v53, %v2233_v7 }
0x1824   : > { %2631 = vrot.lane.b32.xlu0 %v2618_v62, %s5546_s23  ;;  %v2620_v25 = vrot.slane %v2618_v62, 7 }
0x1826   : > { %v2241_v11 = vpop.permute.xlu0 %2240  ;;  %v2622_v28 = vsel %vm821_vm2, 0.0, %v2620_v25 }
0x1828   : > { %2635 = vrot.lane.b32.xlu0 %v2627_v0, %s5547_s24 }
0x182c   : > { %2639 = vrot.lane.b32.xlu0 %v2630_v4, %s5546_s23 }
0x1841   : > { %v2237_v35 = vpop.permute.xlu1 %2236 }
0x1842   : > { %v2244_v10 = vsel %vm834_vm3, %v2243_v48, %v2237_v35 }
0x1843   : > { %v2245_v14 = vsel %vm836_vm4, %v2244_v10, %v6558_v8 }
0x1844   : > { %v2246_v15 = vsel %vm838_vm5, %v2245_v14, %v2241_v11 }
0x1845   : > { %5062 = vmatmul.mubr.msk.f32.vlgmr.msra.gmra.mxu1 %vm846_vm6, %v2246_v15 }
0x1846   : > { %5088 = vmatpush3.msra.mxu1 %v6435_v18  ;;  %5107 = vmatprep.mubr.msk.f32.mxu1 %vm5545_vm1, %v5543_v16 }
0x1847   : > { %5089 = vmatprep.subr.mxu1 %v5543_v16 }
0x1848   : > { %5090 = vmatpush3.msra.mxu1 %v6442_v20 }
0x1849   : > { %5091 = vmatprep.subr.mxu1 %v5543_v16 }
0x184a   : > { %5092 = vmatpush3.msra.mxu1 %v6451_v21 }
0x184b   : > { %5093 = vmatprep.subr.mxu1 %v5543_v16 }
0x184c   : > { %5094 = vmatpush3.msra.mxu1 %v6458_v22 }
0x184d   : > { %5095 = vmatprep.subr.mxu1 %v5543_v16 }
0x184e   : > { %5096 = vmatpush3.msra.mxu1 %v6465_v24 }
0x184f   : > { %5097 = vmatprep.subr.mxu1 %v5543_v16 }
0x1850   : > { %5098 = vmatpush3.msra.mxu1 %v6472_v9 }
0x1851   : > { %5099 = vmatprep.subr.mxu1 %v5543_v16 }
0x1852   : > { %5100 = vmatpush3.msra.mxu1 %v6481_v36 }
0x1853   : > { %5101 = vmatprep.subr.mxu1 %v5543_v16 }
0x1854   : > { %5102 = vmatpush3.msra.mxu1 %v6488_v37 }
0x1855   : > { %5103 = vmatprep.subr.mxu1 %v5543_v16 }
0x1856   : > { %5104 = vmatpush3.msra.mxu1 %v6497_v39 }
0x1857   : > { %5105 = vmatprep.subr.mxu1 %v5543_v16 }
0x1858   : > { %5106 = vmatpush3.msra.mxu1 %v6505_v40 }
0x1859   : > { %5133 = vmatprep.subr.mxu1 %v5543_v16 }
0x1896   : > { %v2632_v27 = vpop.permute.xlu0 %2631 }
0x1897   : > { %v2642_v29 = vsel %vm797_vm0, %v2622_v28, %v2632_v27 }
0x189a   : > { %v2636_v30 = vpop.permute.xlu0 %2635 }
0x189b   : > { %v2643_v31 = vsel %vm834_vm3, %v2642_v29, %v2636_v30 }
0x189c   : > { %v2644_v19 = vsel %vm836_vm4, %v2643_v31, %v6572_v42 }
0x189e   : > { %v2640_v17 = vpop.permute.xlu0 %2639 }
0x189f   : > { %v2645_v23 = vsel %vm838_vm5, %v2644_v19, %v2640_v17 }
0x18a0   : > { %5108 = vmatmul.mubr.msk.f32.vlgmr.msra.gmra.mxu1 %vm846_vm6, %v2645_v23 }
0x18a1   : > { %5134 = vmatpush3.msra.mxu1 %v6435_v18  ;;  %5153 = vmatprep.mubr.msk.f32.mxu1 %vm5545_vm1, %v5543_v16 }
0x18a2   : > { %5135 = vmatprep.subr.mxu1 %v5543_v16 }
0x18a3   : > { %5136 = vmatpush3.msra.mxu1 %v6442_v20 }
0x18a4   : > { %5137 = vmatprep.subr.mxu1 %v5543_v16 }
0x18a5   : > { %5138 = vmatpush3.msra.mxu1 %v6451_v21 }
0x18a6   : > { %5139 = vmatprep.subr.mxu1 %v5543_v16 }
0x18a7   : > { %5140 = vmatpush3.msra.mxu1 %v6458_v22 }
0x18a8   : > { %5141 = vmatprep.subr.mxu1 %v5543_v16 }
0x18a9   : > { %5142 = vmatpush3.msra.mxu1 %v6465_v24 }
0x18aa   : > { %5143 = vmatprep.subr.mxu1 %v5543_v16 }
0x18ab   : > { %5144 = vmatpush3.msra.mxu1 %v6472_v9 }
0x18ac   : > { %5145 = vmatprep.subr.mxu1 %v5543_v16 }
0x18ad   : > { %5146 = vmatpush3.msra.mxu1 %v6481_v36 }
0x18ae   : > { %5147 = vmatprep.subr.mxu1 %v5543_v16 }
0x18af   : > { %5148 = vmatpush3.msra.mxu1 %v6488_v37 }
0x18b0   : > { %5149 = vmatprep.subr.mxu1 %v5543_v16 }
0x18b1   : > { %5150 = vmatpush3.msra.mxu1 %v6497_v39 }
0x18b2   : > { %5151 = vmatprep.subr.mxu1 %v5543_v16 }
0x18b3   : > { %5152 = vmatpush3.msra.mxu1 %v6505_v40 }
0x18b4   : > { %5179 = vmatprep.subr.mxu1 %v5543_v16 }
0x1905   : > { %v6653_v60 = vpop.f32.mrf.mxu1 }
0x1907   : > { %v5063_v32 = vpop.f32.mrf.mxu1 }
0x1960   : > { %v2715_v33 = vpop.f32.mrf.mxu1 }
0x1961   : > { %v2716_v38 = vadd.f32 %v6540_v49, %v2715_v33 }
0x1962   : > { %v5109_v44 = vpop.f32.mrf.mxu1 }
0x1963   : > { %v4469_v12 = vmul.f32 -1.442695, %v2716_v38 }
0x1965   : > { %5389 = vpow2.f32 %v4469_v12 }
0x1972   : > { %v5390_v13 = vpop.eup %5389 }
0x1973   : > { %v2722_v41 = vadd.f32 1.0, %v5390_v13 }
0x1975   : > { %5391 = vrcp.f32 %v2722_v41 }
0x1982   : > { %v5392_v46 = vpop.eup %5391 }
0x1983   : > { %2727 = vrot.lane.b32.xlu0 %v5392_v46, %s5548_s26  ;;  %v2725_v52 = vmul.f32 %v5392_v46, %v6554_v50 }
0x19f5   : > { %v2728_v43 = vpop.permute.xlu0 %2727 }
0x19f6   : > { %v2730_v51 = vmul.f32 %v5392_v46, %v2728_v43 }
0x19f8   : > { %2732 = vrot.lane.b32.xlu0 %v2730_v51, %s5547_s24 }
0x19fc   : > { %1349 = vrot.lane.b32.xlu0 %v6262_v58, %s5549_s28 }
0x1a6a   : > { %v2733_v54 = vpop.permute.xlu0 %2732 }
0x1a6b   : > { %v6661_v55 = vadd.f32 %v2733_v54, %v2725_v52 }
0x1a6d   : > { %5393 = vtanh.f32 %v6661_v55 }
0x1a6e   : > { %v1350_v57 = vpop.permute.xlu0 %1349 }
0x1a7a   : > { %v5394_v56 = vpop.eup %5393 }
0x1a7b   : > { %2738 = vrot.lane.b32.xlu0 %v5394_v56, %s5546_s23 }
0x1a99   : > { %1352 = vxpose.xlu0.b32.start.end [1/1] (short) (narrow) %v1350_v57, 16 }
0x1aed   : > { %v2739_v26 = vpop.permute.xlu0 %2738 }
0x1aee   : > { %v6675_v25 = vmul.f32 %v5392_v46, %v2739_v26 }
0x1af0   : > { %v2821_v31 = vrot.slane %v6675_v25, 7  ;;  %v2826_v38 = vrot.slane %v6675_v25, 1 }
0x1af2   : > { %v2828_v44 = vsel %vm1006_vm7, %v2826_v38, 0.0 }
0x1b15   : > { %v1368_v59 = vpop.trf.xlu0 }
0x1b16   : > { %v1385_v45 = vrot.slane %v1368_v59, 1  ;;  %v1387_v47 = vrot.slane %v1368_v59, 2  ;;  %v1389_v61 = vrot.slane %v1368_v59, 3  ;;  %v1407_v63 = vrot.slane %v1368_v59, 4 }
0x1b18   : > { %v1400_v62 = vsel %vm821_vm2, %v1368_v59, %v1385_v45  ;;  %v1409_v58 = vsel %vm821_vm2, %v1385_v45, %v1387_v47 }
0x1b19   : > { %v1401_v50 = vsel %vm996_vm8, %v1400_v62, %v1387_v47  ;;  %v1369_v0 = vpop.trf.xlu0  ;;  %v1410_v2 = vsel %vm996_vm8, %v1409_v58, %v1389_v61 }
0x1b1a   : > { %v1392_v4 = vrot.slane %v1369_v0, 4  ;;  %v1394_v5 = vrot.slane %v1369_v0, 5  ;;  %v1396_v7 = vrot.slane %v1369_v0, 6  ;;  %v1411_v53 = vsel %vm998_vm9, %v1410_v2, %v1407_v63 }
0x1b1b   : > { %v1402_v48 = vsel %vm998_vm9, %v1401_v50, %v1389_v61  ;;  %v1398_v35 = vrot.slane %v1369_v0, 7 }
0x1b1c   : > { %v1412_v10 = vsel %vm1000_vm10, %v1411_v53, %v1394_v5  ;;  %v1403_v11 = vsel %vm1000_vm10, %v1402_v48, %v1392_v4 }
0x1b1d   : > { %v1413_v14 = vsel %vm1002_vm11, %v1412_v10, %v1396_v7  ;;  %v1404_v15 = vsel %vm1002_vm11, %v1403_v11, %v1394_v5 }
0x1b1e   : > { %v1414_v27 = vsel %vm1004_vm12, %v1413_v14, %v1398_v35  ;;  %v1405_v28 = vsel %vm1004_vm12, %v1404_v15, %v1396_v7 }
0x1b1f   : > { %v1415_v29 = vsel %vm1006_vm7, %v1414_v27, %v1369_v0  ;;  %v1406_v30 = vsel %vm1006_vm7, %v1405_v28, %v1398_v35 }
0x1b20   : > { %1417 = vrot.lane.b32.xlu1 %v1415_v29, %s7403_s14 }
0x1b24   : > { %2822 = vrot.lane.b32.xlu1 %v2821_v31, %s5549_s28 }
0x1b92   : > { %v1418_v17 = vpop.permute.xlu1 %1417 }
0x1b93   : > { %v1420_v19 = vsel %vm1021_vm13, %v1406_v30, %v1418_v17 }
0x1b94   : > { %1421 = vst.msk [vmem:[#allocation2 + $0x10] sm:$0xff] %vm797_vm0, %v1420_v19 }
0x1b96   : > { %v2823_v32 = vpop.permute.xlu1 %2822 }
0x1b97   : > { %v2825_v33 = vsel %vm821_vm2, 0.0, %v2823_v32 }
0x1b9b   : > { %v2816_v23 = vld [vmem:[#allocation2 + $0x10] sm:$0xff] }
0x1b9c   : > { %2829 = vrot.lane.b32.xlu1 %v2816_v23, %s5546_s23  ;;  %v2818_v12 = vrot.slane %v2816_v23, 7 }
0x1b9e   : > { %v2820_v41 = vsel %vm821_vm2, 0.0, %v2818_v12 }
0x1ba0   : > { %2833 = vrot.lane.b32.xlu1 %v2825_v33, %s5547_s24 }
0x1ba4   : > { %2837 = vrot.lane.b32.xlu1 %v2828_v44, %s5546_s23 }
0x1c0e   : > { %v2830_v13 = vpop.permute.xlu1 %2829 }
0x1c0f   : > { %v2840_v46 = vsel %vm797_vm0, %v2820_v41, %v2830_v13 }
0x1c12   : > { %v2834_v43 = vpop.permute.xlu1 %2833 }
0x1c13   : > { %v2841_v51 = vsel %vm834_vm3, %v2840_v46, %v2834_v43 }
0x1c14   : > { %v2842_v54 = vsel %vm836_vm4, %v2841_v51, %v6675_v25 }
0x1c16   : > { %v2838_v52 = vpop.permute.xlu1 %2837 }
0x1c17   : > { %v2843_v56 = vsel %vm838_vm5, %v2842_v54, %v2838_v52 }
0x1c18   : > { %5131 = vmatmul.mubr.msk.f32.vlgmr.msra.gmra.mxu0 %vm846_vm6, %v2843_v56 }
0x1c19   : > { %5157 = vmatpush3.msra.mxu0 %v6435_v18  ;;  %5176 = vmatprep.mubr.msk.f32.mxu0 %vm5545_vm1, %v5543_v16 }
0x1c1a   : > { %5158 = vmatprep.subr.mxu0 %v5543_v16 }
0x1c1b   : > { %5159 = vmatpush3.msra.mxu0 %v6442_v20 }
0x1c1c   : > { %5160 = vmatprep.subr.mxu0 %v5543_v16 }
0x1c1d   : > { %5161 = vmatpush3.msra.mxu0 %v6451_v21 }
0x1c1e   : > { %5162 = vmatprep.subr.mxu0 %v5543_v16 }
0x1c1f   : > { %5163 = vmatpush3.msra.mxu0 %v6458_v22 }
0x1c20   : > { %5164 = vmatprep.subr.mxu0 %v5543_v16 }
0x1c21   : > { %5165 = vmatpush3.msra.mxu0 %v6465_v24 }
0x1c22   : > { %5166 = vmatprep.subr.mxu0 %v5543_v16 }
0x1c23   : > { %5167 = vmatpush3.msra.mxu0 %v6472_v9 }
0x1c24   : > { %5168 = vmatprep.subr.mxu0 %v5543_v16 }
0x1c25   : > { %5169 = vmatpush3.msra.mxu0 %v6481_v36 }
0x1c26   : > { %5170 = vmatprep.subr.mxu0 %v5543_v16 }
0x1c27   : > { %5171 = vmatpush3.msra.mxu0 %v6488_v37 }
0x1c28   : > { %5172 = vmatprep.subr.mxu0 %v5543_v16 }
0x1c29   : > { %5173 = vmatpush3.msra.mxu0 %v6497_v39 }
0x1c2a   : > { %5174 = vmatprep.subr.mxu0 %v5543_v16 }
0x1c2b   : > { %5175 = vmatpush3.msra.mxu0 %v6505_v40 }
0x1c2c   : > { %5202 = vmatprep.subr.mxu0 %v5543_v16 }
0x1cd8   : > { %v2913_v57 = vpop.f32.mrf.mxu0 }
0x1cd9   : > { %v2914_v26 = vadd.f32 %v6540_v49, %v2913_v57 }
0x1cda   : > { %v5132_v59 = vpop.f32.mrf.mxu0 }
0x1cdb   : > { %v4471_v45 = vmul.f32 -1.442695, %v2914_v26 }
0x1cdd   : > { %5395 = vpow2.f32 %v4471_v45 }
0x1cea   : > { %v5396_v47 = vpop.eup %5395 }
0x1ceb   : > { %v2920_v61 = vadd.f32 1.0, %v5396_v47 }
0x1ced   : > { %5397 = vrcp.f32 %v2920_v61 }
0x1cfa   : > { %v5398_v62 = vpop.eup %5397 }
0x1cfb   : > { %2925 = vrot.lane.b32.xlu1 %v5398_v62, %s5548_s26  ;;  %v2923_v63 = vmul.f32 %v5398_v62, %v6661_v55 }
0x1d6d   : > { %v2926_v58 = vpop.permute.xlu1 %2925 }
0x1d6e   : > { %v2928_v50 = vmul.f32 %v5398_v62, %v2926_v58 }
0x1d70   : > { %2930 = vrot.lane.b32.xlu1 %v2928_v50, %s5547_s24 }
0x1d74   : > { %1548 = vrot.lane.b32.xlu1 %v6305_v34, %s5549_s28 }
0x1de2   : > { %v2931_v0 = vpop.permute.xlu1 %2930 }
0x1de3   : > { %v6727_v2 = vadd.f32 %v2931_v0, %v2923_v63 }
0x1de5   : > { %5399 = vtanh.f32 %v6727_v2 }
0x1de6   : > { %v1549_v4 = vpop.permute.xlu1 %1548 }
0x1de7   : > { %1551 = vxpose.xlu1.b32.start.end [1/1] (short) (narrow) %v1549_v4, 16 }
0x1df2   : > { %v5400_v5 = vpop.eup %5399 }
0x1df3   : > { %2936 = vrot.lane.b32.xlu0 %v5400_v5, %s5546_s23 }
0x1e63   : > { %v1567_v7 = vpop.trf.xlu1 }
0x1e64   : > { %v1584_v53 = vrot.slane %v1567_v7, 1  ;;  %v1586_v48 = vrot.slane %v1567_v7, 2  ;;  %v1588_v35 = vrot.slane %v1567_v7, 3  ;;  %v1606_v15 = vrot.slane %v1567_v7, 4 }
0x1e65   : > { %v2937_v10 = vpop.permute.xlu0 %2936 }
0x1e66   : > { %v1599_v11 = vsel %vm821_vm2, %v1567_v7, %v1584_v53  ;;  %v1608_v34 = vsel %vm821_vm2, %v1584_v53, %v1586_v48  ;;  %v6733_v55 = vmul.f32 %v5398_v62, %v2937_v10 }
0x1e67   : > { %v1600_v14 = vsel %vm996_vm8, %v1599_v11, %v1586_v48  ;;  %v1568_v27 = vpop.trf.xlu1  ;;  %v1609_v28 = vsel %vm996_vm8, %v1608_v34, %v1588_v35 }
0x1e68   : > { %v1591_v29 = vrot.slane %v1568_v27, 4  ;;  %v1593_v30 = vrot.slane %v1568_v27, 5  ;;  %v1595_v31 = vrot.slane %v1568_v27, 6  ;;  %v3019_v17 = vrot.slane %v6733_v55, 7 }
0x1e69   : > { %v1610_v19 = vsel %vm998_vm9, %v1609_v28, %v1606_v15  ;;  %v1601_v23 = vsel %vm998_vm9, %v1600_v14, %v1588_v35  ;;  %v1597_v32 = vrot.slane %v1568_v27, 7  ;;  %v3024_v26 = vrot.slane %v6733_v55, 1 }
0x1e6a   : > { %3020 = vrot.lane.b32.xlu0 %v3019_v17, %s5549_s28  ;;  %v1611_v33 = vsel %vm1000_vm10, %v1610_v19, %v1593_v30  ;;  %v1602_v38 = vsel %vm1000_vm10, %v1601_v23, %v1591_v29 }
0x1e6b   : > { %v1612_v44 = vsel %vm1002_vm11, %v1611_v33, %v1595_v31  ;;  %v1603_v12 = vsel %vm1002_vm11, %v1602_v38, %v1593_v30  ;;  %v3026_v59 = vsel %vm1006_vm7, %v3024_v26, 0.0 }
0x1e6c   : > { %v1613_v13 = vsel %vm1004_vm12, %v1612_v44, %v1597_v32  ;;  %v1604_v41 = vsel %vm1004_vm12, %v1603_v12, %v1595_v31 }
0x1e6d   : > { %v1614_v46 = vsel %vm1006_vm7, %v1613_v13, %v1568_v27  ;;  %v1605_v43 = vsel %vm1006_vm7, %v1604_v41, %v1597_v32 }
0x1e6e   : > { %1616 = vrot.lane.b32.xlu1 %v1614_v46, %s7403_s14 }
0x1edc   : > { %v3021_v56 = vpop.permute.xlu0 %3020 }
0x1edd   : > { %v3023_v57 = vsel %vm821_vm2, 0.0, %v3021_v56 }
0x1ee0   : > { %v1617_v51 = vpop.permute.xlu1 %1616 }
0x1ee1   : > { %v1619_v52 = vsel %vm1021_vm13, %v1605_v43, %v1617_v51 }
0x1ee2   : > { %1620 = vst.msk [vmem:[#allocation2 + $0x18] sm:$0xff] %vm797_vm0, %v1619_v52 }
0x1ee9   : > { %v3014_v54 = vld [vmem:[#allocation2 + $0x18] sm:$0xff] }
0x1eea   : > { %3027 = vrot.lane.b32.xlu0 %v3014_v54, %s5546_s23  ;;  %v3016_v45 = vrot.slane %v3014_v54, 7 }
0x1eec   : > { %v3018_v61 = vsel %vm821_vm2, 0.0, %v3016_v45 }
0x1eee   : > { %3031 = vrot.lane.b32.xlu0 %v3023_v57, %s5547_s24 }
0x1ef2   : > { %3035 = vrot.lane.b32.xlu0 %v3026_v59, %s5546_s23 }
0x1f5c   : > { %v3028_v47 = vpop.permute.xlu0 %3027 }
0x1f5d   : > { %v3038_v62 = vsel %vm797_vm0, %v3018_v61, %v3028_v47 }
0x1f60   : > { %v3032_v58 = vpop.permute.xlu0 %3031 }
0x1f61   : > { %v3039_v50 = vsel %vm834_vm3, %v3038_v62, %v3032_v58 }
0x1f62   : > { %v3040_v63 = vsel %vm836_vm4, %v3039_v50, %v6733_v55 }
0x1f64   : > { %v3036_v0 = vpop.permute.xlu0 %3035 }
0x1f65   : > { %v3041_v4 = vsel %vm838_vm5, %v3040_v63, %v3036_v0 }
0x1f66   : > { %5154 = vmatmul.mubr.msk.f32.vlgmr.msra.gmra.mxu1 %vm846_vm6, %v3041_v4 }
0x1f67   : > { %5180 = vmatpush3.msra.mxu1 %v6435_v18  ;;  %5199 = vmatprep.mubr.msk.f32.mxu1 %vm5545_vm1, %v5543_v16 }
0x1f68   : > { %5181 = vmatprep.subr.mxu1 %v5543_v16 }
0x1f69   : > { %5182 = vmatpush3.msra.mxu1 %v6442_v20 }
0x1f6a   : > { %5183 = vmatprep.subr.mxu1 %v5543_v16 }
0x1f6b   : > { %5184 = vmatpush3.msra.mxu1 %v6451_v21 }
0x1f6c   : > { %5185 = vmatprep.subr.mxu1 %v5543_v16 }
0x1f6d   : > { %5186 = vmatpush3.msra.mxu1 %v6458_v22 }
0x1f6e   : > { %5187 = vmatprep.subr.mxu1 %v5543_v16 }
0x1f6f   : > { %5188 = vmatpush3.msra.mxu1 %v6465_v24 }
0x1f70   : > { %5189 = vmatprep.subr.mxu1 %v5543_v16 }
0x1f71   : > { %5190 = vmatpush3.msra.mxu1 %v6472_v9 }
0x1f72   : > { %5191 = vmatprep.subr.mxu1 %v5543_v16 }
0x1f73   : > { %5192 = vmatpush3.msra.mxu1 %v6481_v36 }
0x1f74   : > { %5193 = vmatprep.subr.mxu1 %v5543_v16 }
0x1f75   : > { %5194 = vmatpush3.msra.mxu1 %v6488_v37 }
0x1f76   : > { %5195 = vmatprep.subr.mxu1 %v5543_v16 }
0x1f77   : > { %5196 = vmatpush3.msra.mxu1 %v6497_v39 }
0x1f78   : > { %5197 = vmatprep.subr.mxu1 %v5543_v16 }
0x1f79   : > { %5198 = vmatpush3.msra.mxu1 %v6505_v40 }
0x1f7a   : > { %5225 = vmatprep.subr.mxu1 %v5543_v16 }
0x2026   : > { %v3111_v5 = vpop.f32.mrf.mxu1 }
0x2027   : > { %v3112_v7 = vadd.f32 %v6540_v49, %v3111_v5 }
0x2028   : > { %v5155_v53 = vpop.f32.mrf.mxu1 }
0x2029   : > { %v4473_v48 = vmul.f32 -1.442695, %v3112_v7 }
0x202b   : > { %5401 = vpow2.f32 %v4473_v48 }
0x2038   : > { %v5402_v35 = vpop.eup %5401 }
0x2039   : > { %v3118_v10 = vadd.f32 1.0, %v5402_v35 }
0x203b   : > { %5403 = vrcp.f32 %v3118_v10 }
0x2048   : > { %v5404_v11 = vpop.eup %5403 }
0x2049   : > { %3123 = vrot.lane.b32.xlu0 %v5404_v11, %s5548_s26  ;;  %v3121_v15 = vmul.f32 %v5404_v11, %v6727_v2 }
0x20bb   : > { %v3124_v34 = vpop.permute.xlu0 %3123 }
0x20bc   : > { %v3126_v14 = vmul.f32 %v5404_v11, %v3124_v34 }
0x20be   : > { %3128 = vrot.lane.b32.xlu0 %v3126_v14, %s5547_s24 }
0x20c2   : > { %1747 = vrot.lane.b32.xlu0 %v6351_v6, %s5549_s28 }
0x2130   : > { %v3129_v27 = vpop.permute.xlu0 %3128 }
0x2131   : > { %v6793_v28 = vadd.f32 %v3129_v27, %v3121_v15 }
0x2133   : > { %5405 = vtanh.f32 %v6793_v28 }
0x2134   : > { %v1748_v30 = vpop.permute.xlu0 %1747 }
0x2140   : > { %v5406_v29 = vpop.eup %5405 }
0x2141   : > { %3134 = vrot.lane.b32.xlu0 %v5406_v29, %s5546_s23 }
0x215f   : > { %1750 = vxpose.xlu0.b32.start.end [1/1] (short) (narrow) %v1748_v30, 16 }
0x21b3   : > { %v3135_v31 = vpop.permute.xlu0 %3134 }
0x21b4   : > { %v6807_v59 = vmul.f32 %v5404_v11, %v3135_v31 }
0x21b6   : > { %v3217_v58 = vrot.slane %v6807_v59, 7  ;;  %v3222_v7 = vrot.slane %v6807_v59, 1 }
0x21b8   : > { %v3224_v53 = vsel %vm1006_vm7, %v3222_v7, 0.0 }
0x21db   : > { %v1766_v17 = vpop.trf.xlu0 }
0x21dc   : > { %v1783_v19 = vrot.slane %v1766_v17, 1  ;;  %v1785_v23 = vrot.slane %v1766_v17, 2  ;;  %v1787_v32 = vrot.slane %v1766_v17, 3  ;;  %v1805_v38 = vrot.slane %v1766_v17, 4 }
0x21de   : > { %v1798_v33 = vsel %vm821_vm2, %v1766_v17, %v1783_v19  ;;  %v1807_v6 = vsel %vm821_vm2, %v1783_v19, %v1785_v23 }
0x21df   : > { %v1799_v2 = vsel %vm996_vm8, %v1798_v33, %v1785_v23  ;;  %v1767_v44 = vpop.trf.xlu0  ;;  %v1808_v12 = vsel %vm996_vm8, %v1807_v6, %v1787_v32 }
0x21e0   : > { %v1790_v13 = vrot.slane %v1767_v44, 4  ;;  %v1792_v41 = vrot.slane %v1767_v44, 5  ;;  %v1794_v46 = vrot.slane %v1767_v44, 6  ;;  %v1809_v43 = vsel %vm998_vm9, %v1808_v12, %v1805_v38 }
0x21e1   : > { %v1800_v51 = vsel %vm998_vm9, %v1799_v2, %v1787_v32  ;;  %v1796_v52 = vrot.slane %v1767_v44, 7 }
0x21e2   : > { %v1810_v54 = vsel %vm1000_vm10, %v1809_v43, %v1792_v41  ;;  %v1801_v56 = vsel %vm1000_vm10, %v1800_v51, %v1790_v13 }
0x21e3   : > { %v1811_v57 = vsel %vm1002_vm11, %v1810_v54, %v1794_v46  ;;  %v1802_v26 = vsel %vm1002_vm11, %v1801_v56, %v1792_v41 }
0x21e4   : > { %v1812_v45 = vsel %vm1004_vm12, %v1811_v57, %v1796_v52  ;;  %v1803_v47 = vsel %vm1004_vm12, %v1802_v26, %v1794_v46 }
0x21e5   : > { %v1813_v61 = vsel %vm1006_vm7, %v1812_v45, %v1767_v44  ;;  %v1804_v62 = vsel %vm1006_vm7, %v1803_v47, %v1796_v52 }
0x21e6   : > { %1815 = vrot.lane.b32.xlu1 %v1813_v61, %s7403_s14 }
0x21ea   : > { %3218 = vrot.lane.b32.xlu1 %v3217_v58, %s5549_s28 }
0x2258   : > { %v1816_v50 = vpop.permute.xlu1 %1815 }
0x2259   : > { %v1818_v63 = vsel %vm1021_vm13, %v1804_v62, %v1816_v50 }
0x225a   : > { %1819 = vst.msk [vmem:[#allocation2 + $0x20] sm:$0xff] %vm797_vm0, %v1818_v63 }
0x225c   : > { %v3219_v4 = vpop.permute.xlu1 %3218 }
0x225d   : > { %v3221_v5 = vsel %vm821_vm2, 0.0, %v3219_v4 }
0x2261   : > { %v3212_v0 = vld [vmem:[#allocation2 + $0x20] sm:$0xff] }
0x2262   : > { %3225 = vrot.lane.b32.xlu1 %v3212_v0, %s5546_s23  ;;  %v3214_v48 = vrot.slane %v3212_v0, 7 }
0x2264   : > { %v3216_v10 = vsel %vm821_vm2, 0.0, %v3214_v48 }
0x2266   : > { %3229 = vrot.lane.b32.xlu1 %v3221_v5, %s5547_s24 }
0x226a   : > { %3233 = vrot.lane.b32.xlu1 %v3224_v53, %s5546_s23 }
0x22d4   : > { %v3226_v35 = vpop.permute.xlu1 %3225 }
0x22d5   : > { %v3236_v11 = vsel %vm797_vm0, %v3216_v10, %v3226_v35 }
0x22d8   : > { %v3230_v34 = vpop.permute.xlu1 %3229 }
0x22d9   : > { %v3237_v14 = vsel %vm834_vm3, %v3236_v11, %v3230_v34 }
0x22da   : > { %v3238_v27 = vsel %vm836_vm4, %v3237_v14, %v6807_v59 }
0x22dc   : > { %v3234_v15 = vpop.permute.xlu1 %3233 }
0x22dd   : > { %v3239_v29 = vsel %vm838_vm5, %v3238_v27, %v3234_v15 }
0x22de   : > { %5177 = vmatmul.mubr.msk.f32.vlgmr.msra.gmra.mxu0 %vm846_vm6, %v3239_v29 }
0x22df   : > { %5203 = vmatpush3.msra.mxu0 %v6435_v18  ;;  %5222 = vmatprep.mubr.msk.f32.mxu0 %vm5545_vm1, %v5543_v16 }
0x22e0   : > { %5204 = vmatprep.subr.mxu0 %v5543_v16 }
0x22e1   : > { %5205 = vmatpush3.msra.mxu0 %v6442_v20 }
0x22e2   : > { %5206 = vmatprep.subr.mxu0 %v5543_v16 }
0x22e3   : > { %5207 = vmatpush3.msra.mxu0 %v6451_v21 }
0x22e4   : > { %5208 = vmatprep.subr.mxu0 %v5543_v16 }
0x22e5   : > { %5209 = vmatpush3.msra.mxu0 %v6458_v22 }
0x22e6   : > { %5210 = vmatprep.subr.mxu0 %v5543_v16 }
0x22e7   : > { %5211 = vmatpush3.msra.mxu0 %v6465_v24 }
0x22e8   : > { %5212 = vmatprep.subr.mxu0 %v5543_v16 }
0x22e9   : > { %5213 = vmatpush3.msra.mxu0 %v6472_v9 }
0x22ea   : > { %5214 = vmatprep.subr.mxu0 %v5543_v16 }
0x22eb   : > { %5215 = vmatpush3.msra.mxu0 %v6481_v36 }
0x22ec   : > { %5216 = vmatprep.subr.mxu0 %v5543_v16 }
0x22ed   : > { %5217 = vmatpush3.msra.mxu0 %v6488_v37 }
0x22ee   : > { %5218 = vmatprep.subr.mxu0 %v5543_v16 }
0x22ef   : > { %5219 = vmatpush3.msra.mxu0 %v6497_v39 }
0x22f0   : > { %5220 = vmatprep.subr.mxu0 %v5543_v16 }
0x22f1   : > { %5221 = vmatpush3.msra.mxu0 %v6505_v40 }
0x239e   : > { %v3309_v18 = vpop.f32.mrf.mxu0 }
0x239f   : > { %v3310_v20 = vadd.f32 %v6540_v49, %v3309_v18 }
0x23a0   : > { %v5178_v21 = vpop.f32.mrf.mxu0 }
0x23a1   : > { %v4475_v22 = vmul.f32 -1.442695, %v3310_v20  ;;  %v5469_v20 = vld [vmem:[%s7396_s3 + $0x98] sm:$0xff]  ;;  %v5470_v21 = vld [vmem:[%s7396_s3 + $0x90] sm:$0xff] }
0x23a3   : > { %5407 = vpow2.f32 %v4475_v22  ;;  %v5471_v22 = vld [vmem:[%s7396_s3 + $0x88] sm:$0xff] }
0x23b0   : > { %v5408_v24 = vpop.eup %5407 }
0x23b1   : > { %v3316_v9 = vadd.f32 1.0, %v5408_v24  ;;  %v5472_v24 = vld [vmem:[%s7396_s3 + $0x80] sm:$0xff] }
0x23b3   : > { %5409 = vrcp.f32 %v3316_v9  ;;  %v5473_v9 = vld [vmem:[%s7396_s3 + $0x78] sm:$0xff] }
0x23c0   : > { %v5410_v36 = vpop.eup %5409 }
0x23c1   : > { %3321 = vrot.lane.b32.xlu1 %v5410_v36, %s5548_s26  ;;  %v3319_v39 = vmul.f32 %v5410_v36, %v6793_v28 }
0x2433   : > { %v3322_v37 = vpop.permute.xlu1 %3321 }
0x2434   : > { %v3324_v30 = vmul.f32 %v5410_v36, %v3322_v37  ;;  %v5475_v37 = vld [vmem:[%s7396_s3 + $0x68] sm:$0xff] }
0x2436   : > { %3326 = vrot.lane.b32.xlu1 %v3324_v30, %s5547_s24  ;;  %v5476_v30 = vld [vmem:[%s7396_s3 + $0x60] sm:$0xff] }
0x243a   : > { %1946 = vrot.lane.b32.xlu1 %v6411_v1, %s5549_s28 }
0x24a8   : > { %v3327_v40 = vpop.permute.xlu1 %3326 }
0x24a9   : > { %v6858_v49 = vadd.f32 %v3327_v40, %v3319_v39  ;;  %v5477_v39 = vld [vmem:[%s7396_s3 + $0x58] sm:$0xff]  ;;  %v5478_v40 = vld [vmem:[%s7396_s3 + $0x50] sm:$0xff] }
0x24ab   : > { %5411 = vtanh.f32 %v6858_v49 }
0x24ac   : > { %v1947_v31 = vpop.permute.xlu1 %1946 }
0x24ad   : > { %1949 = vxpose.xlu1.b32.start.end [1/1] (short) (narrow) %v1947_v31, 16 }
0x24b8   : > { %v5412_v17 = vpop.eup %5411 }
0x24b9   : > { %3332 = vrot.lane.b32.xlu0 %v5412_v17, %s5546_s23  ;;  %v6940_v17 = vld [vmem:[%s7397_s4 + $0x1] ss:$0 sm:$0xff] }
0x2529   : > { %v1965_v19 = vpop.trf.xlu1 }
0x252a   : > { %v1982_v23 = vrot.slane %v1965_v19, 1  ;;  %v1984_v32 = vrot.slane %v1965_v19, 2  ;;  %v1986_v33 = vrot.slane %v1965_v19, 3  ;;  %v2004_v44 = vrot.slane %v1965_v19, 4 }
0x252b   : > { %v3333_v6 = vpop.permute.xlu0 %3332 }
0x252c   : > { %v1997_v2 = vsel %vm821_vm2, %v1965_v19, %v1982_v23  ;;  %v2006_v1 = vsel %vm821_vm2, %v1982_v23, %v1984_v32  ;;  %v6864_v28 = vmul.f32 %v5410_v36, %v3333_v6  ;;  %v5474_v36 = vld [vmem:[%s7396_s3 + $0x70] sm:$0xff] }
0x252d   : > { %v1998_v38 = vsel %vm996_vm8, %v1997_v2, %v1984_v32  ;;  %v2007_v12 = vsel %vm996_vm8, %v2006_v1, %v1986_v33  ;;  %v1966_v13 = vpop.trf.xlu1 }
0x252e   : > { %v1989_v41 = vrot.slane %v1966_v13, 4  ;;  %v1991_v46 = vrot.slane %v1966_v13, 5  ;;  %v1993_v43 = vrot.slane %v1966_v13, 6  ;;  %v3415_v51 = vrot.slane %v6864_v28, 7 }
0x252f   : > { %v2008_v52 = vsel %vm998_vm9, %v2007_v12, %v2004_v44  ;;  %v1999_v54 = vsel %vm998_vm9, %v1998_v38, %v1986_v33  ;;  %v1995_v56 = vrot.slane %v1966_v13, 7  ;;  %v3420_v53 = vrot.slane %v6864_v28, 1 }
0x2530   : > { %v2009_v57 = vsel %vm1000_vm10, %v2008_v52, %v1991_v46  ;;  %v2000_v26 = vsel %vm1000_vm10, %v1999_v54, %v1989_v41  ;;  %3416 = vrot.lane.b32.xlu0 %v3415_v51, %s5549_s28 }
0x2531   : > { %v2010_v45 = vsel %vm1002_vm11, %v2009_v57, %v1993_v43  ;;  %v2001_v47 = vsel %vm1002_vm11, %v2000_v26, %v1991_v46  ;;  %v3422_v48 = vsel %vm1006_vm7, %v3420_v53, 0.0 }
0x2532   : > { %v2011_v61 = vsel %vm1004_vm12, %v2010_v45, %v1995_v56  ;;  %v2002_v62 = vsel %vm1004_vm12, %v2001_v47, %v1993_v43 }
0x2533   : > { %v2012_v58 = vsel %vm1006_vm7, %v2011_v61, %v1966_v13  ;;  %v2003_v50 = vsel %vm1006_vm7, %v2002_v62, %v1995_v56 }
0x2534   : > { %2014 = vrot.lane.b32.xlu1 %v2012_v58, %s7403_s14  ;;  %s7407_s14 = smov 8  }
0x25a2   : > { %v3417_v5 = vpop.permute.xlu0 %3416 }
0x25a3   : > { %v3419_v7 = vsel %vm821_vm2, 0.0, %v3417_v5 }
0x25a6   : > { %v2015_v63 = vpop.permute.xlu1 %2014 }
0x25a7   : > { %v2017_v0 = vsel %vm1021_vm13, %v2003_v50, %v2015_v63 }
0x25a8   : > { %2018 = vst.msk [vmem:[#allocation2 + $0x28] sm:$0xff] %vm797_vm0, %v2017_v0 }
0x25af   : > { %v3410_v4 = vld [vmem:[#allocation2 + $0x28] sm:$0xff] }
0x25b0   : > { %3423 = vrot.lane.b32.xlu0 %v3410_v4, %s5546_s23  ;;  %v3412_v35 = vrot.slane %v3410_v4, 7 }
0x25b2   : > { %v3414_v11 = vsel %vm821_vm2, 0.0, %v3412_v35 }
0x25b4   : > { %3427 = vrot.lane.b32.xlu0 %v3419_v7, %s5547_s24 }
0x25b8   : > { %3431 = vrot.lane.b32.xlu0 %v3422_v48, %s5546_s23 }
0x2622   : > { %v3424_v10 = vpop.permute.xlu0 %3423 }
0x2623   : > { %v3434_v34 = vsel %vm797_vm0, %v3414_v11, %v3424_v10 }
0x2626   : > { %v3428_v14 = vpop.permute.xlu0 %3427 }
0x2627   : > { %v3435_v15 = vsel %vm834_vm3, %v3434_v34, %v3428_v14  ;;  %v5480_v14 = vld [vmem:[%s7397_s4] ss:$0 sm:$0xff] }
0x2628   : > { %v3436_v27 = vsel %vm836_vm4, %v3435_v15, %v6864_v28  ;;  %v2317_v15 = vadd.f32 %v5480_v14, %v6653_v60 }
0x262a   : > { %v3432_v29 = vpop.permute.xlu0 %3431 }
0x262b   : > { %v3437_v18 = vsel %vm838_vm5, %v3436_v27, %v3432_v29  ;;  %v4453_v27 = vmul.f32 -1.442695, %v2317_v15 }
0x262c   : > { %5200 = vmatmul.mubr.msk.f32.vlgmr.msra.gmra.mxu1 %vm846_vm6, %v3437_v18 }
0x262d   : > { %5226 = vmatpush3.msra.mxu1 %v5469_v20  ;;  %5245 = vmatprep.mubr.msk.f32.mxu1 %vm5545_vm1, %v5543_v16 }
0x262e   : > { %5227 = vmatprep.subr.mxu1 %v5543_v16 }
0x262f   : > { %5228 = vmatpush3.msra.mxu1 %v5470_v21 }
0x2630   : > { %5229 = vmatprep.subr.mxu1 %v5543_v16 }
0x2631   : > { %5230 = vmatpush3.msra.mxu1 %v5471_v22 }
0x2632   : > { %5231 = vmatprep.subr.mxu1 %v5543_v16 }
0x2633   : > { %5232 = vmatpush3.msra.mxu1 %v5472_v24 }
0x2634   : > { %5233 = vmatprep.subr.mxu1 %v5543_v16 }
0x2635   : > { %5234 = vmatpush3.msra.mxu1 %v5473_v9 }
0x2636   : > { %5235 = vmatprep.subr.mxu1 %v5543_v16 }
0x2637   : > { %5236 = vmatpush3.msra.mxu1 %v5474_v36 }
0x2638   : > { %5237 = vmatprep.subr.mxu1 %v5543_v16 }
0x2639   : > { %5238 = vmatpush3.msra.mxu1 %v5475_v37 }
0x263a   : > { %5239 = vmatprep.subr.mxu1 %v5543_v16 }
0x263b   : > { %5240 = vmatpush3.msra.mxu1 %v5476_v30 }
0x263c   : > { %5241 = vmatprep.subr.mxu1 %v5543_v16 }
0x263d   : > { %5242 = vmatpush3.msra.mxu1 %v5477_v39 }
0x263e   : > { %5243 = vmatprep.subr.mxu1 %v5543_v16 }
0x263f   : > { %5244 = vmatpush3.msra.mxu1 %v5478_v40 }
0x26ec   : > { %v3507_v31 = vpop.f32.mrf.mxu1 }
0x26ed   : > { %v3508_v19 = vadd.f32 %v6940_v17, %v3507_v31 }
0x26ee   : > { %v5201_v23 = vpop.f32.mrf.mxu1 }
0x26ef   : > { %v4477_v32 = vmul.f32 -1.442695, %v3508_v19 }
0x26f1   : > { %5413 = vpow2.f32 %v4477_v32 }
0x26fe   : > { %v5414_v33 = vpop.eup %5413 }
0x26ff   : > { %v3514_v6 = vadd.f32 1.0, %v5414_v33 }
0x2701   : > { %5415 = vrcp.f32 %v3514_v6 }
0x270e   : > { %v5416_v16 = vpop.eup %5415 }
0x270f   : > { %3519 = vrot.lane.b32.xlu0 %v5416_v16, %s5548_s26  ;;  %v3517_v38 = vmul.f32 %v5416_v16, %v6858_v49 }
0x2781   : > { %v3520_v2 = vpop.permute.xlu0 %3519 }
0x2782   : > { %v3522_v1 = vmul.f32 %v5416_v16, %v3520_v2 }
0x2784   : > { %3524 = vrot.lane.b32.xlu0 %v3522_v1, %s5547_s24 }
0x2788   : > { %2145 = vrot.lane.b32.xlu0 %v6558_v8, %s5549_s28 }
0x27f6   : > { %v3525_v44 = vpop.permute.xlu0 %3524 }
0x27f7   : > { %v6948_v12 = vadd.f32 %v3525_v44, %v3517_v38 }
0x27f9   : > { %5417 = vtanh.f32 %v6948_v12 }
0x27fa   : > { %v2146_v41 = vpop.permute.xlu0 %2145  ;;  %5419 = vpow2.f32 %v4453_v27 }
0x2806   : > { %v5418_v13 = vpop.eup %5417 }
0x2807   : > { %3530 = vrot.lane.b32.xlu0 %v5418_v13, %s5546_s23  ;;  %v5420_v18 = vpop.eup %5419 }
0x2808   : > { %v2323_v21 = vadd.f32 1.0, %v5420_v18 }
0x280a   : > { %5421 = vrcp.f32 %v2323_v21 }
0x2817   : > { %v5422_v37 = vpop.eup %5421 }
0x2818   : > { %v2326_v1 = vmul.f32 %v5422_v37, %v6550_v3 }
0x2825   : > { %2148 = vxpose.xlu0.b32.start.end [1/1] (short) (narrow) %v2146_v41, 16 }
0x2879   : > { %v3531_v46 = vpop.permute.xlu0 %3530 }
0x287a   : > { %v6962_v53 = vmul.f32 %v5416_v16, %v3531_v46 }
0x287c   : > { %v3613_v34 = vrot.slane %v6962_v53, 7  ;;  %v3618_v36 = vrot.slane %v6962_v53, 1 }
0x287e   : > { %v3620_v60 = vsel %vm1006_vm7, %v3618_v36, 0.0 }
0x28a1   : > { %v2164_v43 = vpop.trf.xlu0 }
0x28a2   : > { %v2181_v51 = vrot.slane %v2164_v43, 1  ;;  %v2183_v52 = vrot.slane %v2164_v43, 2  ;;  %v2185_v54 = vrot.slane %v2164_v43, 3  ;;  %v2203_v57 = vrot.slane %v2164_v43, 4 }
0x28a4   : > { %v2196_v56 = vsel %vm821_vm2, %v2164_v43, %v2181_v51  ;;  %v2205_v8 = vsel %vm821_vm2, %v2181_v51, %v2183_v52 }
0x28a5   : > { %v2197_v49 = vsel %vm996_vm8, %v2196_v56, %v2183_v52  ;;  %v2206_v26 = vsel %vm996_vm8, %v2205_v8, %v2185_v54  ;;  %v2165_v45 = vpop.trf.xlu0 }
0x28a6   : > { %v2188_v47 = vrot.slane %v2165_v45, 4  ;;  %v2190_v61 = vrot.slane %v2165_v45, 5  ;;  %v2192_v62 = vrot.slane %v2165_v45, 6  ;;  %v2207_v58 = vsel %vm998_vm9, %v2206_v26, %v2203_v57 }
0x28a7   : > { %v2198_v50 = vsel %vm998_vm9, %v2197_v49, %v2185_v54  ;;  %v2194_v63 = vrot.slane %v2165_v45, 7 }
0x28a8   : > { %v2208_v0 = vsel %vm1000_vm10, %v2207_v58, %v2190_v61  ;;  %v2199_v4 = vsel %vm1000_vm10, %v2198_v50, %v2188_v47 }
0x28a9   : > { %v2209_v5 = vsel %vm1002_vm11, %v2208_v0, %v2192_v62  ;;  %v2200_v7 = vsel %vm1002_vm11, %v2199_v4, %v2190_v61 }
0x28aa   : > { %v2210_v48 = vsel %vm1004_vm12, %v2209_v5, %v2194_v63  ;;  %v2201_v35 = vsel %vm1004_vm12, %v2200_v7, %v2192_v62 }
0x28ab   : > { %v2211_v10 = vsel %vm1006_vm7, %v2210_v48, %v2165_v45  ;;  %v2202_v11 = vsel %vm1006_vm7, %v2201_v35, %v2194_v63 }
0x28ac   : > { %2213 = vrot.lane.b32.xlu1 %v2211_v10, %s7407_s14 }
0x28b0   : > { %3614 = vrot.lane.b32.xlu1 %v3613_v34, %s5549_s28 }
0x291e   : > { %v2214_v29 = vpop.permute.xlu1 %2213 }
0x291f   : > { %v2216_v20 = vsel %vm1021_vm13, %v2202_v11, %v2214_v29 }
0x2920   : > { %2217 = vst.msk [vmem:[#allocation2 + $0x30] sm:$0xff] %vm797_vm0, %v2216_v20 }
0x2922   : > { %v3615_v24 = vpop.permute.xlu1 %3614 }
0x2923   : > { %v3617_v9 = vsel %vm821_vm2, 0.0, %v3615_v24 }
0x2927   : > { %v3608_v22 = vld [vmem:[#allocation2 + $0x30] sm:$0xff] }
0x2928   : > { %3621 = vrot.lane.b32.xlu1 %v3608_v22, %s5546_s23  ;;  %v3610_v30 = vrot.slane %v3608_v22, 7 }
0x292a   : > { %v3612_v40 = vsel %vm821_vm2, 0.0, %v3610_v30 }
0x292c   : > { %3625 = vrot.lane.b32.xlu1 %v3617_v9, %s5547_s24 }
0x2930   : > { %3629 = vrot.lane.b32.xlu1 %v3620_v60, %s5546_s23 }
0x2934   : > { %2328 = vrot.lane.b32.xlu1 %v5422_v37, %s5548_s26 }
0x299a   : > { %v3622_v39 = vpop.permute.xlu1 %3621 }
0x299b   : > { %v3632_v31 = vsel %vm797_vm0, %v3612_v40, %v3622_v39 }
0x299e   : > { %v3626_v19 = vpop.permute.xlu1 %3625 }
0x299f   : > { %v3633_v23 = vsel %vm834_vm3, %v3632_v31, %v3626_v19 }
0x29a0   : > { %v3634_v33 = vsel %vm836_vm4, %v3633_v23, %v6962_v53 }
0x29a2   : > { %v3630_v32 = vpop.permute.xlu1 %3629 }
0x29a3   : > { %v3635_v6 = vsel %vm838_vm5, %v3634_v33, %v3630_v32 }
0x29a4   : > { %5223 = vmatmul.mubr.msk.f32.vlgmr.msra.gmra.mxu0 %vm846_vm6, %v3635_v6 }
0x29a6   : > { %v2329_v16 = vpop.permute.xlu1 %2328 }
0x29a7   : > { %v2331_v2 = vmul.f32 %v5422_v37, %v2329_v16 }
0x29a9   : > { %2333 = vrot.lane.b32.xlu1 %v2331_v2, %s5547_s24 }
0x2a1b   : > { %v2334_v38 = vpop.permute.xlu1 %2333 }
0x2a1c   : > { %v2336_v44 = vadd.f32 %v2334_v38, %v2326_v1 }
0x2a1e   : > { %5423 = vtanh.f32 %v2336_v44 }
0x2a2b   : > { %v5424_v13 = vpop.eup %5423 }
0x2a2c   : > { %2339 = vrot.lane.b32.xlu0 %v5424_v13, %s5546_s23 }
0x2a64   : > { %v3705_v41 = vpop.f32.mrf.mxu0 }
0x2a65   : > { %v3706_v46 = vadd.f32 %v6940_v17, %v3705_v41 }
0x2a66   : > { %v5224_v43 = vpop.f32.mrf.mxu0 }
0x2a67   : > { %v4479_v51 = vmul.f32 -1.442695, %v3706_v46 }
0x2a69   : > { %5425 = vpow2.f32 %v4479_v51 }
0x2a76   : > { %v5426_v52 = vpop.eup %5425 }
0x2a77   : > { %v3712_v54 = vadd.f32 1.0, %v5426_v52 }
0x2a79   : > { %5427 = vrcp.f32 %v3712_v54 }
0x2a86   : > { %v5428_v56 = vpop.eup %5427 }
0x2a87   : > { %3717 = vrot.lane.b32.xlu1 %v5428_v56, %s5548_s26  ;;  %v3715_v26 = vmul.f32 %v5428_v56, %v6948_v12 }
0x2a9e   : > { %v2340_v49 = vpop.permute.xlu0 %2339 }
0x2a9f   : > { %v2342_v57 = vmul.f32 %v5422_v37, %v2340_v49 }
0x2af9   : > { %v3718_v8 = vpop.permute.xlu1 %3717 }
0x2afa   : > { %v3720_v3 = vmul.f32 %v5428_v56, %v3718_v8 }
0x2afc   : > { %3722 = vrot.lane.b32.xlu1 %v3720_v3, %s5547_s24 }
0x2b00   : > { %2344 = vrot.lane.b32.xlu1 %v2342_v57, %s5549_s28 }
0x2b6e   : > { %v3723_v45 = vpop.permute.xlu1 %3722 }
0x2b6f   : > { %v6999_v47 = vadd.f32 %v3723_v45, %v3715_v26 }
0x2b71   : > { %5429 = vtanh.f32 %v6999_v47 }
0x2b72   : > { %v2345_v62 = vpop.permute.xlu1 %2344 }
0x2b7e   : > { %v5430_v61 = vpop.eup %5429 }
0x2b7f   : > { %3728 = vrot.lane.b32.xlu1 %v5430_v61, %s5546_s23 }
0x2ba8   : > { %2347 = vxpose.xlu1.b32.start.end [1/1] (short) (narrow) %v2345_v62, 16 }
0x2bf1   : > { %v3729_v58 = vpop.permute.xlu1 %3728 }
0x2bf2   : > { %v3731_v24 = vmul.f32 %v5428_v56, %v3729_v58 }
0x2bf4   : > { %v3811_v30 = vrot.slane %v3731_v24, 7  ;;  %v3816_v32 = vrot.slane %v3731_v24, 1 }
0x2bf6   : > { %v3818_v33 = vsel %vm1006_vm7, %v3816_v32, 0.0 }
0x2c24   : > { %v2363_v50 = vpop.trf.xlu1 }
0x2c25   : > { %v2380_v63 = vrot.slane %v2363_v50, 1  ;;  %v2382_v0 = vrot.slane %v2363_v50, 2  ;;  %v2384_v4 = vrot.slane %v2363_v50, 3  ;;  %v2402_v48 = vrot.slane %v2363_v50, 4 }
0x2c27   : > { %v2395_v5 = vsel %vm821_vm2, %v2363_v50, %v2380_v63  ;;  %v2404_v7 = vsel %vm821_vm2, %v2380_v63, %v2382_v0 }
0x2c28   : > { %v2396_v12 = vsel %vm996_vm8, %v2395_v5, %v2382_v0  ;;  %v2405_v35 = vsel %vm996_vm8, %v2404_v7, %v2384_v4  ;;  %v2364_v10 = vpop.trf.xlu1 }
0x2c29   : > { %v2387_v11 = vrot.slane %v2364_v10, 4  ;;  %v2389_v34 = vrot.slane %v2364_v10, 5  ;;  %v2391_v14 = vrot.slane %v2364_v10, 6  ;;  %v2406_v15 = vsel %vm998_vm9, %v2405_v35, %v2402_v48 }
0x2c2a   : > { %v2397_v27 = vsel %vm998_vm9, %v2396_v12, %v2384_v4  ;;  %v2393_v29 = vrot.slane %v2364_v10, 7 }
0x2c2b   : > { %v2407_v18 = vsel %vm1000_vm10, %v2406_v15, %v2389_v34  ;;  %v2398_v20 = vsel %vm1000_vm10, %v2397_v27, %v2387_v11 }
0x2c2c   : > { %v2408_v21 = vsel %vm1002_vm11, %v2407_v18, %v2391_v14  ;;  %v2399_v22 = vsel %vm1002_vm11, %v2398_v20, %v2389_v34 }
0x2c2d   : > { %v2409_v9 = vsel %vm1004_vm12, %v2408_v21, %v2393_v29  ;;  %v2400_v36 = vsel %vm1004_vm12, %v2399_v22, %v2391_v14 }
0x2c2e   : > { %v2410_v60 = vsel %vm1006_vm7, %v2409_v9, %v2364_v10  ;;  %v2401_v37 = vsel %vm1006_vm7, %v2400_v36, %v2393_v29 }
0x2c2f   : > { %2412 = vrot.lane.b32.xlu0 %v2410_v60, %s7407_s14 }
0x2c33   : > { %3812 = vrot.lane.b32.xlu0 %v3811_v30, %s5549_s28 }
0x2ca1   : > { %v2413_v39 = vpop.permute.xlu0 %2412 }
0x2ca2   : > { %v2415_v40 = vsel %vm1021_vm13, %v2401_v37, %v2413_v39 }
0x2ca3   : > { %2416 = vst.msk [vmem:[#allocation2 + $0x38] sm:$0xff] %vm797_vm0, %v2415_v40 }
0x2ca5   : > { %v3813_v31 = vpop.permute.xlu0 %3812 }
0x2ca6   : > { %v3815_v19 = vsel %vm821_vm2, 0.0, %v3813_v31 }
0x2ca7   : > { %3823 = vrot.lane.b32.xlu1 %v3815_v19, %s5547_s24 }
0x2caa   : > { %v3806_v23 = vld [vmem:[#allocation2 + $0x38] sm:$0xff] }
0x2cab   : > { %3535 = vrot.lane.b32.xlu1 %v6962_v53, %s5549_s28  ;;  %3819 = vrot.lane.b32.xlu0 %v3806_v23, %s5546_s23  ;;  %v3808_v6 = vrot.slane %v3806_v23, 7 }
0x2cad   : > { %v3810_v2 = vsel %vm821_vm2, 0.0, %v3808_v6 }
0x2caf   : > { %3827 = vrot.lane.b32.xlu0 %v3818_v33, %s5546_s23 }
0x2d19   : > { %v3824_v1 = vpop.permute.xlu1 %3823 }
0x2d1d   : > { %v3820_v16 = vpop.permute.xlu0 %3819 }
0x2d1e   : > { %v3830_v38 = vsel %vm797_vm0, %v3810_v2, %v3820_v16 }
0x2d1f   : > { %v3831_v44 = vsel %vm834_vm3, %v3830_v38, %v3824_v1 }
0x2d20   : > { %v3832_v13 = vsel %vm836_vm4, %v3831_v44, %v3731_v24 }
0x2d21   : > { %v3828_v41 = vpop.permute.xlu0 %3827 }
0x2d22   : > { %v3833_v53 = vsel %vm838_vm5, %v3832_v13, %v3828_v41 }
0x2d23   : > { %5246 = vmatmul.mubr.msk.f32.vlgmr.msra.gmra.mxu1 %vm846_vm6, %v3833_v53 }
0x2de3   : > { %v3903_v46 = vpop.f32.mrf.mxu1 }
0x2de4   : > { %v3904_v43 = vadd.f32 %v6940_v17, %v3903_v46 }
0x2de5   : > { %v5247_v51 = vpop.f32.mrf.mxu1 }
0x2de6   : > { %v4481_v52 = vmul.f32 -1.442695, %v3904_v43 }
0x2de8   : > { %5431 = vpow2.f32 %v4481_v52 }
0x2df5   : > { %v5432_v54 = vpop.eup %5431 }
0x2df6   : > { %v3910_v56 = vadd.f32 1.0, %v5432_v54 }
0x2df8   : > { %5433 = vrcp.f32 %v3910_v56 }
0x2e05   : > { %v5434_v8 = vpop.eup %5433 }
0x2e06   : > { %3915 = vrot.lane.b32.xlu0 %v5434_v8, %s5548_s26  ;;  %v3913_v57 = vmul.f32 %v5434_v8, %v6999_v47  ;;  %s7352_s26 = scalar_lea.sflag [#allocation4], %s323_s22 }
0x2e78   : > { %v3916_v3 = vpop.permute.xlu0 %3915 }
0x2e79   : > { %v3918_v49 = vmul.f32 %v5434_v8, %v3916_v3 }
0x2e7b   : > { %3920 = vrot.lane.b32.xlu0 %v3918_v49, %s5547_s24  ;;  %s7342_s24 = scalar_lea.hbm %s7402_s9, %s4513_s29 }
0x2eed   : > { %v3921_v26 = vpop.permute.xlu0 %3920 }
0x2eee   : > { %v3923_v45 = vadd.f32 %v3921_v26, %v3913_v57  ;;  %v3536_v57 = vpop.permute.xlu1 %3535 }
0x2ef0   : > { %5435 = vtanh.f32 %v3923_v45 }
0x2efd   : > { %v5436_v61 = vpop.eup %5435 }
0x2efe   : > { %3926 = vrot.lane.b32.xlu0 %v5436_v61, %s5546_s23 }
0x2f02   : > { %2545 = vrot.lane.b32.xlu0 %v6572_v42, %s5549_s28 }
0x2f06   : > { %2743 = vrot.lane.b32.xlu0 %v6675_v25, %s5549_s28 }
0x2f0a   : > { %2941 = vrot.lane.b32.xlu0 %v6733_v55, %s5549_s28 }
0x2f0e   : > { %3139 = vrot.lane.b32.xlu0 %v6807_v59, %s5549_s28 }
0x2f12   : > { %3337 = vrot.lane.b32.xlu0 %v6864_v28, %s5549_s28 }
0x2f16   : > { %3733 = vrot.lane.b32.xlu0 %v3731_v24, %s5549_s28 }
0x2f70   : > { %v3927_v17 = vpop.permute.xlu0 %3926 }
0x2f71   : > { %v3929_v47 = vmul.f32 %v5434_v8, %v3927_v17 }
0x2f73   : > { %3931 = vrot.lane.b32.xlu1 %v3929_v47, %s5549_s28  ;;  %s5551_s28 = smov [#allocation3]  }
0x2f74   : > { %v2546_v62 = vpop.permute.xlu0 %2545  ;;  %s5485_s17 = sshll.u32 %s5551_s28, 4  ;;  %s5486_s17 = int_to_ptr.vmem [resolvable:$false] %s5485_s17 }
0x2f75   : > { %2548 = vxpose.xlu0.b32.start.end [1/1] (short) (narrow) %v2546_v62, 16  ;;  %s5487_s21 = scalar_lea.vmem %s5486_s17, 2048  ;;  %p5488_p0 = scmp.lt.s32.totalorder %s7346_s27, %s5486_s17 }
0x2f76   : > { %p5489_p1 = scmp.lt.s32.totalorder %s5487_s21, %s5481_s13 }
0x2f78   : > { %v2744_v42 = vpop.permute.xlu0 %2743  ;;  %p5490_p2 = por %p5489_p1, %p5488_p0 }
0x2f7a   : > { %p5491_p3 = pnand %p5490_p2, %p5484_p13 }
0x2f7c   : > { %v2942_v58 = vpop.permute.xlu0 %2941 }
0x2f7d   : > { %2944 = vxpose.xlu0.b32.start.end [1/1] (short) (narrow) %v2942_v58, 16 }
0x2f80   : > { %v3140_v25 = vpop.permute.xlu0 %3139 }
0x2f82   : > { %3142 = vxpose.xlu0.b32.start.end [1/1] (short) (narrow) %v3140_v25, 16 }
0x2f84   : > { %v3338_v55 = vpop.permute.xlu0 %3337 }
0x2f87   : > { %3340 = vxpose.xlu0.b32.start.end [1/1] (short) (narrow) %v3338_v55, 16 }
0x2f88   : > { %v3734_v50 = vpop.permute.xlu0 %3733 }
0x2f8c   : > { %3736 = vxpose.xlu0.b32.start.end [1/1] (short) (narrow) %v3734_v50, 16 }
0x2f9c   : > { %2746 = vxpose.xlu1.b32.start.end [1/1] (short) (narrow) %v2744_v42, 16 }
0x2fe5   : > { %v7115_v17 = vpop.permute.xlu1 %3931 }
0x2ff1   : > { %v2564_v59 = vpop.trf.xlu0 }
0x2ff2   : > { %v2581_v28 = vrot.slane %v2564_v59, 1  ;;  %v2583_v63 = vrot.slane %v2564_v59, 2  ;;  %v2585_v0 = vrot.slane %v2564_v59, 3  ;;  %v2603_v4 = vrot.slane %v2564_v59, 4 }
0x2ff4   : > { %v2596_v5 = vsel %vm821_vm2, %v2564_v59, %v2581_v28  ;;  %v2605_v7 = vsel %vm821_vm2, %v2581_v28, %v2583_v63 }
0x2ff5   : > { %v2597_v12 = vsel %vm996_vm8, %v2596_v5, %v2583_v63  ;;  %v2606_v48 = vsel %vm996_vm8, %v2605_v7, %v2585_v0  ;;  %v2565_v35 = vpop.trf.xlu0  ;;  %v4013_v5 = vld [vmem:[%s7398_s5 + $0x8] sm:$0xff]  ;;  %v4012_v7 = vld [vmem:[%s7398_s5] sm:$0xff] }
0x2ff6   : > { %v2588_v10 = vrot.slane %v2565_v35, 4  ;;  %v2590_v11 = vrot.slane %v2565_v35, 5  ;;  %v2592_v34 = vrot.slane %v2565_v35, 6  ;;  %v2594_v14 = vrot.slane %v2565_v35, 7  ;;  %5248 = vmatprep.subr.mxu0 %v4013_v5 }
0x2ff7   : > { %v2607_v15 = vsel %vm998_vm9, %v2606_v48, %v2603_v4  ;;  %v2598_v27 = vsel %vm998_vm9, %v2597_v12, %v2585_v0  ;;  %5249 = vmatpush3.msra.mxu0 %v4013_v5 }
0x2ff8   : > { %v2608_v29 = vsel %vm1000_vm10, %v2607_v15, %v2590_v11  ;;  %v2599_v18 = vsel %vm1000_vm10, %v2598_v27, %v2588_v10  ;;  %5250 = vmatprep.subr.mxu0 %v4012_v7 }
0x2ff9   : > { %v2609_v20 = vsel %vm1002_vm11, %v2608_v29, %v2592_v34  ;;  %v2960_v21 = vpop.trf.xlu0  ;;  %v2600_v22 = vsel %vm1002_vm11, %v2599_v18, %v2590_v11  ;;  %5251 = vmatpush3.msra.mxu0 %v4012_v7 }
0x2ffa   : > { %v2610_v24 = vsel %vm1004_vm12, %v2609_v20, %v2594_v14  ;;  %v2977_v9 = vrot.slane %v2960_v21, 1  ;;  %v2979_v60 = vrot.slane %v2960_v21, 2  ;;  %v2601_v37 = vsel %vm1004_vm12, %v2600_v22, %v2592_v34 }
0x2ffb   : > { %v2611_v36 = vsel %vm1006_vm7, %v2610_v24, %v2565_v35  ;;  %v7067_v39 = vsel %vm1006_vm7, %v2601_v37, %v2594_v14  ;;  %v2981_v40 = vrot.slane %v2960_v21, 3  ;;  %v2999_v58 = vrot.slane %v2960_v21, 4 }
0x2ffc   : > { %2613 = vrot.lane.b32.xlu0 %v2611_v36, %s7407_s14  ;;  %v2992_v30 = vsel %vm821_vm2, %v2960_v21, %v2977_v9  ;;  %v3001_v47 = vsel %vm821_vm2, %v2977_v9, %v2979_v60 }
0x2ffd   : > { %v2993_v31 = vsel %vm996_vm8, %v2992_v30, %v2979_v60  ;;  %v7070_v19 = vpop.trf.xlu0  ;;  %v3002_v25 = vsel %vm996_vm8, %v3001_v47, %v2981_v40 }
0x2ffe   : > { %v2984_v23 = vrot.slane %v7070_v19, 4  ;;  %v2986_v32 = vrot.slane %v7070_v19, 5  ;;  %v2994_v33 = vsel %vm998_vm9, %v2993_v31, %v2981_v40  ;;  %v2988_v16 = vrot.slane %v7070_v19, 6 }
0x2fff   : > { %v2990_v38 = vrot.slane %v7070_v19, 7  ;;  %v3003_v63 = vsel %vm998_vm9, %v3002_v25, %v2999_v58 }
0x3000   : > { %v2995_v6 = vsel %vm1000_vm10, %v2994_v33, %v2984_v23  ;;  %v3004_v15 = vsel %vm1000_vm10, %v3003_v63, %v2986_v32 }
0x3001   : > { %v7077_v2 = vpop.trf.xlu0  ;;  %v2996_v1 = vsel %vm1002_vm11, %v2995_v6, %v2986_v32  ;;  %v3005_v24 = vsel %vm1002_vm11, %v3004_v15, %v2988_v16 }
0x3002   : > { %v3175_v44 = vrot.slane %v7077_v2, 1  ;;  %v3177_v13 = vrot.slane %v7077_v2, 2  ;;  %v2997_v41 = vsel %vm1004_vm12, %v2996_v1, %v2988_v16  ;;  %v3006_v40 = vsel %vm1004_vm12, %v3005_v24, %v2990_v38 }
0x3003   : > { %v7089_v46 = vsel %vm1006_vm7, %v2997_v41, %v2990_v38  ;;  %v3007_v31 = vsel %vm1006_vm7, %v3006_v40, %v7070_v19  ;;  %v3179_v32 = vrot.slane %v7077_v2, 3 }
0x3004   : > { %v3190_v53 = vsel %vm821_vm2, %v7077_v2, %v3175_v44 }
0x3005   : > { %v3191_v43 = vsel %vm996_vm8, %v3190_v53, %v3177_v13  ;;  %v7094_v51 = vpop.trf.xlu0 }
0x3006   : > { %v3182_v23 = vrot.slane %v7094_v51, 4  ;;  %v3184_v33 = vrot.slane %v7094_v51, 5  ;;  %v3192_v6 = vsel %vm998_vm9, %v3191_v43, %v3179_v32  ;;  %v3186_v16 = vrot.slane %v7094_v51, 6 }
0x3007   : > { %v3188_v41 = vrot.slane %v7094_v51, 7 }
0x3008   : > { %v3193_v1 = vsel %vm1000_vm10, %v3192_v6, %v3182_v23 }
0x3009   : > { %v7096_v52 = vpop.trf.xlu0  ;;  %v3194_v38 = vsel %vm1002_vm11, %v3193_v1, %v3184_v33 }
0x300a   : > { %v3373_v54 = vrot.slane %v7096_v52, 1  ;;  %v3375_v56 = vrot.slane %v7096_v52, 2  ;;  %v3195_v19 = vsel %vm1004_vm12, %v3194_v38, %v3186_v16  ;;  %v3377_v47 = vrot.slane %v7096_v52, 3 }
0x300b   : > { %v7168_v53 = vsel %vm1006_vm7, %v3195_v19, %v3188_v41 }
0x300c   : > { %v3388_v8 = vsel %vm821_vm2, %v7096_v52, %v3373_v54 }
0x300d   : > { %v7107_v3 = vsel %vm996_vm8, %v3388_v8, %v3375_v56  ;;  %v7109_v49 = vpop.trf.xlu0 }
0x300e   : > { %v3380_v8 = vrot.slane %v7109_v49, 4  ;;  %v3390_v43 = vsel %vm998_vm9, %v7107_v3, %v3377_v47  ;;  %v3384_v58 = vrot.slane %v7109_v49, 6 }
0x3010   : > { %v3391_v25 = vsel %vm1000_vm10, %v3390_v43, %v3380_v8 }
0x3011   : > { %v7111_v26 = vpop.trf.xlu0 }
0x3012   : > { %v3769_v45 = vrot.slane %v7111_v26, 1  ;;  %v3771_v61 = vrot.slane %v7111_v26, 2  ;;  %v3773_v3 = vrot.slane %v7111_v26, 3 }
0x3014   : > { %v3784_v62 = vsel %vm821_vm2, %v7111_v26, %v3769_v45 }
0x3015   : > { %v7125_v42 = vsel %vm996_vm8, %v3784_v62, %v3771_v61  ;;  %v3382_v62 = vrot.slane %v7109_v49, 5 }
0x3018   : > { %v2762_v55 = vpop.trf.xlu1 }
0x3019   : > { %v2779_v50 = vrot.slane %v2762_v55, 1  ;;  %v2781_v59 = vrot.slane %v2762_v55, 2  ;;  %v2783_v28 = vrot.slane %v2762_v55, 3  ;;  %v2801_v48 = vrot.slane %v2762_v55, 4 }
0x301b   : > { %v2794_v0 = vsel %vm821_vm2, %v2762_v55, %v2779_v50  ;;  %v2803_v4 = vsel %vm821_vm2, %v2779_v50, %v2781_v59  ;;  %v3386_v55 = vrot.slane %v7109_v49, 7  ;;  %v3392_v50 = vsel %vm1002_vm11, %v3391_v25, %v3382_v62 }
0x301c   : > { %v2795_v12 = vsel %vm996_vm8, %v2794_v0, %v2781_v59  ;;  %v2804_v35 = vsel %vm996_vm8, %v2803_v4, %v2783_v28  ;;  %v2763_v10 = vpop.trf.xlu1  ;;  %v3393_v59 = vsel %vm1004_vm12, %v3392_v50, %v3384_v58  ;;  %v3786_v4 = vsel %vm998_vm9, %v7125_v42, %v3773_v3 }
0x301d   : > { %v2786_v11 = vrot.slane %v2763_v10, 4  ;;  %v2788_v34 = vrot.slane %v2763_v10, 5  ;;  %v2790_v14 = vrot.slane %v2763_v10, 6  ;;  %v2805_v27 = vsel %vm998_vm9, %v2804_v35, %v2801_v48 }
0x301e   : > { %v2796_v29 = vsel %vm998_vm9, %v2795_v12, %v2783_v28  ;;  %v2792_v18 = vrot.slane %v2763_v10, 7  ;;  %v3753_v28 = vpop.trf.xlu0  ;;  %v7181_v63 = vsel %vm1006_vm7, %v3393_v59, %v3386_v55 }
0x301f   : > { %v2806_v20 = vsel %vm1000_vm10, %v2805_v27, %v2788_v34  ;;  %v2797_v21 = vsel %vm1000_vm10, %v2796_v29, %v2786_v11  ;;  %v3776_v0 = vrot.slane %v3753_v28, 4  ;;  %v3780_v5 = vrot.slane %v3753_v28, 6 }
0x3020   : > { %v2807_v22 = vsel %vm1002_vm11, %v2806_v20, %v2790_v14  ;;  %v2798_v9 = vsel %vm1002_vm11, %v2797_v21, %v2788_v34  ;;  %v3782_v12 = vrot.slane %v3753_v28, 7  ;;  %v3197_v11 = vrot.slane %v7077_v2, 4 }
0x3021   : > { %v2808_v36 = vsel %vm1004_vm12, %v2807_v22, %v2792_v18  ;;  %v2799_v60 = vsel %vm1004_vm12, %v2798_v9, %v2790_v14  ;;  %v3787_v7 = vsel %vm1000_vm10, %v3786_v4, %v3776_v0  ;;  %v3397_v34 = vsel %vm821_vm2, %v3373_v54, %v3375_v56 }
0x3022   : > { %v2809_v37 = vsel %vm1006_vm7, %v2808_v36, %v2763_v10  ;;  %v7151_v30 = vsel %vm1006_vm7, %v2799_v60, %v2792_v18  ;;  %v3395_v14 = vrot.slane %v7096_v52, 4  ;;  %v3398_v27 = vsel %vm996_vm8, %v3397_v34, %v3377_v47 }
0x3023   : > { %2811 = vrot.lane.b32.xlu1 %v2809_v37, %s7407_s14  ;;  %v3793_v2 = vsel %vm821_vm2, %v3769_v45, %v3771_v61 }
0x3024   : > { %v3399_v29 = vsel %vm998_vm9, %v3398_v27, %v3395_v14  ;;  %v3794_v54 = vsel %vm996_vm8, %v3793_v2, %v3773_v3 }
0x3025   : > { %v3400_v20 = vsel %vm1000_vm10, %v3399_v29, %v3382_v62 }
0x3027   : > { %3009 = vrot.lane.b32.xlu1 %v3007_v31, %s7407_s14 }
0x3050   : > { %3538 = vxpose.xlu1.b32.start.end [1/1] (short) (narrow) %v3536_v57, 16  ;;  %v3778_v57 = vrot.slane %v3753_v28, 5 }
0x3052   : > { %v3788_v48 = vsel %vm1002_vm11, %v3787_v7, %v3778_v57 }
0x3053   : > { %v3789_v35 = vsel %vm1004_vm12, %v3788_v48, %v3780_v5 }
0x3054   : > { %v7191_v10 = vsel %vm1006_vm7, %v3789_v35, %v3782_v12 }
0x3055   : > { %3934 = vxpose.xlu1.b32.start.end [1/1] (short) (narrow) %v7115_v17, 16  ;;  %v3199_v17 = vsel %vm821_vm2, %v3175_v44, %v3177_v13  ;;  %v3791_v13 = vrot.slane %v7111_v26, 4  ;;  %v3401_v26 = vsel %vm1002_vm11, %v3400_v20, %v3384_v58 }
0x3056   : > { %v3200_v42 = vsel %vm996_vm8, %v3199_v17, %v3179_v32  ;;  %v3402_v24 = vsel %vm1004_vm12, %v3401_v26, %v3386_v55 }
0x3057   : > { %v3201_v15 = vsel %vm998_vm9, %v3200_v42, %v3197_v11  ;;  %v3795_v45 = vsel %vm998_vm9, %v3794_v54, %v3791_v13  ;;  %v3403_v36 = vsel %vm1006_vm7, %v3402_v24, %v7109_v49  ;;  %v4160_v24 = vld [vmem:[%s7400_s7 + $0x10] sm:$0xff] }
0x3058   : > { %v3202_v44 = vsel %vm1000_vm10, %v3201_v15, %v3184_v33  ;;  %v3796_v21 = vsel %vm1000_vm10, %v3795_v45, %v3778_v57 }
0x3059   : > { %v3203_v52 = vsel %vm1002_vm11, %v3202_v44, %v3186_v16  ;;  %v3797_v9 = vsel %vm1002_vm11, %v3796_v21, %v3780_v5 }
0x305a   : > { %v3204_v61 = vsel %vm1004_vm12, %v3203_v52, %v3188_v41  ;;  %v3798_v60 = vsel %vm1004_vm12, %v3797_v9, %v3782_v12  ;;  %v4159_v9 = vld [vmem:[%s7400_s7 + $0x8] sm:$0xff] }
0x305b   : > { %v3205_v22 = vsel %vm1006_vm7, %v3204_v61, %v7094_v51  ;;  %v3799_v37 = vsel %vm1006_vm7, %v3798_v60, %v3753_v28 }
0x306e   : > { %v2614_v56 = vpop.permute.xlu0 %2613 }
0x306f   : > { %v2616_v18 = vsel %vm1021_vm13, %v7067_v39, %v2614_v56 }
0x3070   : > { %2617 = vst.msk [vmem:[#allocation2] sm:$0xff] %vm797_vm0, %v2616_v18 }
0x3077   : > { %3207 = vrot.lane.b32.xlu1 %v3205_v22, %s7407_s14  ;;  %v4004_v39 = vld [vmem:[#allocation2] sm:$0xff]  ;;  %v4161_v22 = vld [vmem:[%s7400_s7 + $0x18] sm:$0xff] }
0x3078   : > { %5252 = vmatprep.mubr.msk.f32.mxu0 %vm797_vm0, %v4004_v39  ;;  %5264 = vmatprep.subr.mxu0 %v4161_v22  ;;  %v4158_v39 = vld [vmem:[%s7400_s7] sm:$0xff] }
0x3079   : > { %5284 = vmatprep.subr.mxu1 %v4161_v22 }
0x307a   : > { %5288 = vmatpush3.msra.mxu1 %v4161_v22 }
0x307b   : > { %3405 = vrot.lane.b32.xlu1 %v3403_v36, %s7407_s14  ;;  %5285 = vmatprep.subr.mxu1 %v4160_v24 }
0x307c   : > { %5289 = vmatpush3.msra.mxu1 %v4160_v24 }
0x307d   : > { %5286 = vmatprep.subr.mxu1 %v4159_v9 }
0x307e   : > { %5290 = vmatpush3.msra.mxu1 %v4159_v9 }
0x307f   : > { %3801 = vrot.lane.b32.xlu1 %v3799_v37, %s7407_s14  ;;  %5287 = vmatprep.subr.mxu1 %v4158_v39 }
0x3080   : > { %5291 = vmatpush3.msra.mxu1 %v4158_v39 }
0x3095   : > { %v2812_v51 = vpop.permute.xlu1 %2811 }
0x3096   : > { %v2814_v40 = vsel %vm1021_vm13, %v7151_v30, %v2812_v51 }
0x3097   : > { %2815 = vst.msk [vmem:[#allocation2 + $0x8] sm:$0xff] %vm797_vm0, %v2814_v40 }
0x3099   : > { %v3010_v31 = vpop.permute.xlu1 %3009 }
0x309a   : > { %v3012_v23 = vsel %vm1021_vm13, %v7089_v46, %v3010_v31 }
0x309b   : > { %3013 = vst.msk [vmem:[#allocation2 + $0x10] sm:$0xff] %vm797_vm0, %v3012_v23 }
0x309e   : > { %v4005_v49 = vld [vmem:[#allocation2 + $0x8] sm:$0xff] }
0x309f   : > { %5253 = vmatmul.mubr.msk.f32.vlgmr.msra.gmra.mxu0 %vm797_vm0, %v4005_v49 }
0x30a0   : > { %5265 = vmatpush3.msra.mxu0 %v4161_v22 }
0x30a1   : > { %5266 = vmatprep.subr.mxu0 %v4160_v24 }
0x30a2   : > { %v4006_v32 = vld [vmem:[#allocation2 + $0x10] sm:$0xff]  ;;  %5267 = vmatpush3.msra.mxu0 %v4160_v24 }
0x30a3   : > { %5255 = vmatprep.mubr.msk.f32.mxu0 %vm797_vm0, %v4006_v32  ;;  %5268 = vmatprep.subr.mxu0 %v4159_v9 }
0x30a4   : > { %5269 = vmatpush3.msra.mxu0 %v4159_v9 }
0x30a5   : > { %5270 = vmatprep.subr.mxu0 %v4158_v39 }
0x30a6   : > { %5271 = vmatpush3.msra.mxu0 %v4158_v39 }
0x30cc   : > { %v3554_v33 = vpop.trf.xlu1 }
0x30cd   : > { %v3571_v6 = vrot.slane %v3554_v33, 1  ;;  %v3573_v16 = vrot.slane %v3554_v33, 2  ;;  %v3575_v1 = vrot.slane %v3554_v33, 3  ;;  %v3593_v19 = vrot.slane %v3554_v33, 4 }
0x30cf   : > { %v3586_v30 = vsel %vm821_vm2, %v3554_v33, %v3571_v6  ;;  %v3595_v41 = vsel %vm821_vm2, %v3571_v6, %v3573_v16 }
0x30d0   : > { %v3587_v38 = vsel %vm996_vm8, %v3586_v30, %v3573_v16  ;;  %v3596_v46 = vsel %vm996_vm8, %v3595_v41, %v3575_v1  ;;  %v3555_v8 = vpop.trf.xlu1 }
0x30d1   : > { %v3578_v47 = vrot.slane %v3555_v8, 4  ;;  %v3580_v62 = vrot.slane %v3555_v8, 5  ;;  %v3582_v43 = vrot.slane %v3555_v8, 6  ;;  %v3597_v58 = vsel %vm998_vm9, %v3596_v46, %v3593_v19 }
0x30d2   : > { %v3588_v25 = vsel %vm998_vm9, %v3587_v38, %v3575_v1  ;;  %v3584_v59 = vrot.slane %v3555_v8, 7  ;;  %v4482_v1 = vld [vmem:[%s7399_s6] ss:$0 sm:$0xff] }
0x30d3   : > { %v3598_v55 = vsel %vm1000_vm10, %v3597_v58, %v3580_v62  ;;  %v3589_v50 = vsel %vm1000_vm10, %v3588_v25, %v3578_v47 }
0x30d4   : > { %v3950_v28 = vpop.trf.xlu1  ;;  %v3599_v0 = vsel %vm1002_vm11, %v3598_v55, %v3582_v43  ;;  %v3590_v3 = vsel %vm1002_vm11, %v3589_v50, %v3580_v62 }
0x30d5   : > { %v3967_v57 = vrot.slane %v3950_v28, 1  ;;  %v3969_v4 = vrot.slane %v3950_v28, 2  ;;  %v3971_v5 = vrot.slane %v3950_v28, 3  ;;  %v3600_v7 = vsel %vm1004_vm12, %v3599_v0, %v3584_v59 }
0x30d6   : > { %v3591_v12 = vsel %vm1004_vm12, %v3590_v3, %v3582_v43  ;;  %v3601_v17 = vsel %vm1006_vm7, %v3600_v7, %v3555_v8  ;;  %v3989_v34 = vrot.slane %v3950_v28, 4 }
0x30d7   : > { %v3982_v48 = vsel %vm821_vm2, %v3950_v28, %v3967_v57  ;;  %v3991_v35 = vsel %vm821_vm2, %v3967_v57, %v3969_v4  ;;  %v3592_v11 = vsel %vm1006_vm7, %v3591_v12, %v3584_v59  ;;  %3603 = vrot.lane.b32.xlu0 %v3601_v17, %s7407_s14  ;;  %v4491_v17 = vld [vmem:[%s7401_s8] ss:$0 sm:$0xff] }
0x30d8   : > { %v3983_v42 = vsel %vm996_vm8, %v3982_v48, %v3969_v4  ;;  %v3992_v14 = vsel %vm996_vm8, %v3991_v35, %v3971_v5  ;;  %v3951_v15 = vpop.trf.xlu1 }
0x30d9   : > { %v3974_v27 = vrot.slane %v3951_v15, 4  ;;  %v3976_v2 = vrot.slane %v3951_v15, 5  ;;  %v3978_v44 = vrot.slane %v3951_v15, 6  ;;  %v3993_v13 = vsel %vm998_vm9, %v3992_v14, %v3989_v34 }
0x30da   : > { %v3984_v29 = vsel %vm998_vm9, %v3983_v42, %v3971_v5  ;;  %v3980_v54 = vrot.slane %v3951_v15, 7 }
0x30db   : > { %v3994_v56 = vsel %vm1000_vm10, %v3993_v13, %v3976_v2  ;;  %v3985_v52 = vsel %vm1000_vm10, %v3984_v29, %v3974_v27 }
0x30dc   : > { %v3995_v18 = vsel %vm1002_vm11, %v3994_v56, %v3978_v44  ;;  %v3986_v20 = vsel %vm1002_vm11, %v3985_v52, %v3976_v2 }
0x30dd   : > { %v3996_v45 = vsel %vm1004_vm12, %v3995_v18, %v3980_v54  ;;  %v3987_v61 = vsel %vm1004_vm12, %v3986_v20, %v3978_v44 }
0x30de   : > { %v3997_v26 = vsel %vm1006_vm7, %v3996_v45, %v3951_v15  ;;  %v3988_v21 = vsel %vm1006_vm7, %v3987_v61, %v3980_v54 }
0x30df   : > { %3999 = vrot.lane.b32.xlu0 %v3997_v26, %s7407_s14 }
0x30e9   : > { %v3208_v36 = vpop.permute.xlu1 %3207 }
0x30ea   : > { %v3210_v60 = vsel %vm1021_vm13, %v7168_v53, %v3208_v36 }
0x30eb   : > { %3211 = vst.msk [vmem:[#allocation2 + $0x18] sm:$0xff] %vm797_vm0, %v3210_v60 }
0x30ed   : > { %v3406_v37 = vpop.permute.xlu1 %3405 }
0x30ee   : > { %v3408_v51 = vsel %vm1021_vm13, %v7181_v63, %v3406_v37 }
0x30ef   : > { %3409 = vst.msk [vmem:[#allocation2 + $0x20] sm:$0xff] %vm797_vm0, %v3408_v51 }
0x30f1   : > { %v3802_v40 = vpop.permute.xlu1 %3801 }
0x30f2   : > { %v3804_v31 = vsel %vm1021_vm13, %v7191_v10, %v3802_v40  ;;  %v4007_v23 = vld [vmem:[#allocation2 + $0x18] sm:$0xff] }
0x30f3   : > { %3805 = vst.msk [vmem:[#allocation2 + $0x30] sm:$0xff] %vm797_vm0, %v3804_v31  ;;  %5256 = vmatmul.mubr.msk.f32.gmra.mxu0 %vm797_vm0, %v4007_v23 }
0x30f6   : > { %v4008_v49 = vld [vmem:[#allocation2 + $0x20] sm:$0xff] }
0x30f7   : > { %5258 = vmatprep.mubr.msk.f32.mxu0 %vm797_vm0, %v4008_v49 }
0x30fa   : > { %v4010_v10 = vld [vmem:[#allocation2 + $0x30] sm:$0xff] }
0x3149   : > { %v3604_v53 = vpop.permute.xlu0 %3603 }
0x314a   : > { %v3606_v32 = vsel %vm1021_vm13, %v3592_v11, %v3604_v53 }
0x314b   : > { %3607 = vst.msk [vmem:[#allocation2 + $0x28] sm:$0xff] %vm797_vm0, %v3606_v32 }
0x3151   : > { %v4000_v63 = vpop.permute.xlu0 %3999 }
0x3152   : > { %v4002_v33 = vsel %vm1021_vm13, %v3988_v21, %v4000_v63  ;;  %v4009_v6 = vld [vmem:[#allocation2 + $0x28] sm:$0xff] }
0x3153   : > { %4003 = vst.msk [vmem:[#allocation2 + $0x38] sm:$0xff] %vm797_vm0, %v4002_v33  ;;  %5259 = vmatmul.mubr.msk.f32.gmra.mxu0 %vm797_vm0, %v4009_v6 }
0x3154   : > { %5261 = vmatprep.mubr.msk.f32.mxu0 %vm797_vm0, %v4010_v10 }
0x315a   : > { %v4011_v16 = vld [vmem:[#allocation2 + $0x38] sm:$0xff] }
0x315b   : > { %5262 = vmatmul.mubr.msk.f32.gmra.mxu0 %vm797_vm0, %v4011_v16 }
0x315f   : > { %v5254_v30 = vpop.f32.mrf.mxu0 }
0x3160   : > { %v4117_v41 = vadd.f32 %v5254_v30, %v4482_v1 }
0x3161   : > { %v4111_v38 = vpop.f32.mrf.mxu0 }
0x3162   : > { %v4112_v19 = vadd.f32 %v4482_v1, %v4111_v38  ;;  %v4151_v8 = vmax.f32 %v4117_v41, 0.0 }
0x3164   : > { %v4150_v46 = vmax.f32 %v4112_v19, 0.0 }
0x3166   : > { %5272 = vmatprep.mubr.msk.f32.mxu0 %vm834_vm3, %v4150_v46 }
0x3167   : > { %5273 = vmatmul.mubr.msk.f32.vlgmr.msra.gmra.mxu0 %vm834_vm3, %v4151_v8 }
0x31b3   : > { %v5257_v47 = vpop.f32.mrf.mxu0 }
0x31b4   : > { %v4127_v62 = vadd.f32 %v5257_v47, %v4482_v1 }
0x31b5   : > { %v4121_v43 = vpop.f32.mrf.mxu0 }
0x31b6   : > { %v4122_v58 = vadd.f32 %v4482_v1, %v4121_v43  ;;  %v4153_v55 = vmax.f32 %v4127_v62, 0.0 }
0x31b8   : > { %v4152_v25 = vmax.f32 %v4122_v58, 0.0 }
0x31ba   : > { %5275 = vmatprep.mubr.msk.f32.mxu1 %vm834_vm3, %v4152_v25 }
0x31bb   : > { %5276 = vmatmul.mubr.msk.f32.vlgmr.msra.gmra.mxu1 %vm834_vm3, %v4153_v55 }
0x3213   : > { %v5260_v50 = vpop.f32.mrf.mxu0 }
0x3214   : > { %v4137_v59 = vadd.f32 %v5260_v50, %v4482_v1 }
0x3215   : > { %v4131_v28 = vpop.f32.mrf.mxu0 }
0x3216   : > { %v4132_v0 = vadd.f32 %v4482_v1, %v4131_v28  ;;  %v4155_v57 = vmax.f32 %v4137_v59, 0.0 }
0x3218   : > { %v4154_v3 = vmax.f32 %v4132_v0, 0.0 }
0x321a   : > { %5278 = vmatprep.mubr.msk.f32.mxu1 %vm834_vm3, %v4154_v3 }
0x321b   : > { %v5263_v4 = vpop.f32.mrf.mxu0  ;;  %5279 = vmatmul.mubr.msk.f32.gmra.mxu1 %vm834_vm3, %v4155_v57 }
0x321c   : > { %v4147_v5 = vadd.f32 %v5263_v4, %v4482_v1 }
0x321d   : > { %v4141_v7 = vpop.f32.mrf.mxu0 }
0x321e   : > { %v4142_v12 = vadd.f32 %v4482_v1, %v4141_v7  ;;  %v4157_v35 = vmax.f32 %v4147_v5, 0.0 }
0x3220   : > { %v4156_v48 = vmax.f32 %v4142_v12, 0.0 }
0x3222   : > { %5281 = vmatprep.mubr.msk.f32.mxu1 %vm834_vm3, %v4156_v48 }
0x3223   : > { %5282 = vmatmul.mubr.msk.f32.gmra.mxu1 %vm834_vm3, %v4157_v35 }
0x3227   : > { %v5274_v11 = vpop.f32.mrf.mxu0 }
0x3228   : > { %v4265_v42 = vadd.f32 %v5274_v11, %v4491_v17 }
0x3229   : > { %v4259_v34 = vpop.f32.mrf.mxu0 }
0x322a   : > { %v4501_v14 = vmul.f32 -1.442695, %v4265_v42  ;;  %v4260_v15 = vadd.f32 %v4491_v17, %v4259_v34 }
0x322c   : > { %5437 = vpow2.f32 %v4501_v14  ;;  %v4500_v27 = vmul.f32 -1.442695, %v4260_v15 }
0x322e   : > { %5439 = vpow2.f32 %v4500_v27 }
0x3239   : > { %v5438_v2 = vpop.eup %5437 }
0x323a   : > { %v4323_v44 = vadd.f32 1.0, %v5438_v2 }
0x323b   : > { %v5440_v13 = vpop.eup %5439 }
0x323c   : > { %5441 = vrcp.f32 %v4323_v44  ;;  %v4322_v29 = vadd.f32 1.0, %v5440_v13 }
0x323e   : > { %5443 = vrcp.f32 %v4322_v29 }
0x3249   : > { %v5442_v54 = vpop.eup %5441 }
0x324a   : > { %4347 = vst.msk [vmem:[%s7323_s25 + $0x8] sm:$0xff] %vm834_vm3, %v5442_v54 }
0x324b   : > { %v5444_v56 = vpop.eup %5443 }
0x324c   : > { %4346 = vst.msk [vmem:[%s7323_s25] sm:$0xff] %vm834_vm3, %v5444_v56 }
0x327b   : > { %v5277_v52 = vpop.f32.mrf.mxu1 }
0x327c   : > { %v4275_v18 = vadd.f32 %v5277_v52, %v4491_v17 }
0x327d   : > { %v4269_v20 = vpop.f32.mrf.mxu1 }
0x327e   : > { %v4503_v45 = vmul.f32 -1.442695, %v4275_v18  ;;  %v4270_v61 = vadd.f32 %v4491_v17, %v4269_v20 }
0x3280   : > { %5445 = vpow2.f32 %v4503_v45  ;;  %v4502_v26 = vmul.f32 -1.442695, %v4270_v61 }
0x3282   : > { %5447 = vpow2.f32 %v4502_v26 }
0x328d   : > { %v5446_v21 = vpop.eup %5445 }
0x328e   : > { %v4325_v22 = vadd.f32 1.0, %v5446_v21 }
0x328f   : > { %v5448_v24 = vpop.eup %5447 }
0x3290   : > { %5449 = vrcp.f32 %v4325_v22  ;;  %v4324_v9 = vadd.f32 1.0, %v5448_v24 }
0x3292   : > { %5451 = vrcp.f32 %v4324_v9 }
0x329d   : > { %v5450_v39 = vpop.eup %5449 }
0x329e   : > { %4349 = vst.msk [vmem:[%s7323_s25 + $0x18] sm:$0xff] %vm834_vm3, %v5450_v39 }
0x329f   : > { %v5452_v36 = vpop.eup %5451 }
0x32a0   : > { %4348 = vst.msk [vmem:[%s7323_s25 + $0x10] sm:$0xff] %vm834_vm3, %v5452_v36 }
0x32db   : > { %v5280_v60 = vpop.f32.mrf.mxu1 }
0x32dc   : > { %v4285_v37 = vadd.f32 %v5280_v60, %v4491_v17 }
0x32dd   : > { %v4279_v51 = vpop.f32.mrf.mxu1 }
0x32de   : > { %v4505_v40 = vmul.f32 -1.442695, %v4285_v37  ;;  %v4280_v31 = vadd.f32 %v4491_v17, %v4279_v51 }
0x32e0   : > { %5453 = vpow2.f32 %v4505_v40  ;;  %v4504_v23 = vmul.f32 -1.442695, %v4280_v31 }
0x32e2   : > { %5455 = vpow2.f32 %v4504_v23 }
0x32e3   : > { %v5283_v49 = vpop.f32.mrf.mxu1 }
0x32e4   : > { %v4295_v53 = vadd.f32 %v5283_v49, %v4491_v17 }
0x32e5   : > { %v4289_v32 = vpop.f32.mrf.mxu1 }
0x32e6   : > { %v4507_v63 = vmul.f32 -1.442695, %v4295_v53  ;;  %v4290_v33 = vadd.f32 %v4491_v17, %v4289_v32 }
0x32e8   : > { %5457 = vpow2.f32 %v4507_v63  ;;  %v4506_v6 = vmul.f32 -1.442695, %v4290_v33 }
0x32ea   : > { %5459 = vpow2.f32 %v4506_v6 }
0x32ed   : > { %v5454_v10 = vpop.eup %5453 }
0x32ee   : > { %v4327_v16 = vadd.f32 1.0, %v5454_v10 }
0x32ef   : > { %v5456_v1 = vpop.eup %5455 }
0x32f0   : > { %5461 = vrcp.f32 %v4327_v16  ;;  %v4326_v30 = vadd.f32 1.0, %v5456_v1 }
0x32f2   : > { %5463 = vrcp.f32 %v4326_v30 }
0x32f5   : > { %v5458_v41 = vpop.eup %5457 }
0x32f6   : > { %v4329_v38 = vadd.f32 1.0, %v5458_v41 }
0x32f7   : > { %v5460_v19 = vpop.eup %5459 }
0x32f8   : > { %5465 = vrcp.f32 %v4329_v38  ;;  %v4328_v46 = vadd.f32 1.0, %v5460_v19 }
0x32fa   : > { %5467 = vrcp.f32 %v4328_v46 }
0x32fd   : > { %v5462_v8 = vpop.eup %5461 }
0x32fe   : > { %4351 = vst.msk [vmem:[%s7323_s25 + $0x28] sm:$0xff] %vm834_vm3, %v5462_v8 }
0x32ff   : > { %v5464_v47 = vpop.eup %5463 }
0x3300   : > { %4350 = vst.msk [vmem:[%s7323_s25 + $0x20] sm:$0xff] %vm834_vm3, %v5464_v47 }
0x3305   : > { %v5466_v62 = vpop.eup %5465 }
0x3306   : > { %4353 = vst.msk [vmem:[%s7323_s25 + $0x38] sm:$0xff] %vm834_vm3, %v5466_v62 }
0x3307   : > { %v5468_v43 = vpop.eup %5467 }
0x3308   : > { %4352 = vst.msk [vmem:[%s7323_s25 + $0x30] sm:$0xff] %vm834_vm3, %v5468_v43 }
0x3309   : > { %5494 = shalt.err (!%p5491_p3)
}
0x330a   : > { %s5495_s22 = scalar_lea.hbm %s7342_s24, 1024  ;;  %s5499_s16 = scalar_lea.hbm %s7402_s9, 2048 }
0x330b   : > { %p5496_p4 = scmp.ne.s32.totalorder %s7342_s24, %s5495_s22  ;;  %p5500_p9 = scmp.lt.s32.totalorder %s7342_s24, %s7402_s9 }
0x330c   : > { %p5501_p10 = scmp.lt.s32.totalorder %s5499_s16, %s5495_s22 }
0x330d   : > { %p5497_p7 = pnand %p5496_p4, %p5641_p5 }
0x330e   : > { %p5502_p11 = por %p5501_p10, %p5500_p9 }
0x330f   : > { %p5498_p8 = pneg %p5497_p7 }
0x3311   : > { %p5503_p12 = pnand %p5502_p11, %p5498_p8 }
0x3313   : > { %5506 = shalt.err (!%p5503_p12)
}
0x3314   : > { %s5552_s13 = smov 128  }
0x3315   : > { %5293 = dma.vmem_to_hbm [thread:$0]  (%p5641_p5), %s7346_s27, 1024, %s7342_s24, %s7352_s26, %s5552_s13, %s5552_s13, %s7407_s14  }
0x3316 PF: > { %p5299_p13 = scmp.ge.s32.totalorder %s5541_s12, 2  ;;  %s4383_s17 = sand.u32 1, %s5529_s30  }
0x3317   : > { %s4384_s21 = scalar_lea.sflag [#allocation4], %s4383_s17 }
0x3318   : > { %p5296_p0 = pnand %p5299_p13, %p5645_p6 }
0x331a   : > { %p5297_p1 = pneg %p5296_p0 }
0x331c   : > { %5524 = dma.done.wait (%p5297_p1), %s4384_s21, 1024  }
0x331d   : > { %5526 = vsyncadd (%p5297_p1), %s4384_s21, 4294966272  ;;  %p19_p2 = scmp.ge.s32.totalorder %s5628_s15, 4   ;;  %s7408_s30 = smov %s5533_s10 }
0x331e   : > { %s7409_s10 = smov %s5537_s11  ;;  %s7410_s11 = smov %s5639_s18 }
0x331f   : > { %s7411_s12 = smov %s5628_s15  ;;  %21 = sbr.rel (!%p19_p2) target bundleno = 3 (0x3), region = 100 }
0x3324   :  { %4389 = vsyncpa [#allocation4], 1 }
0x3325   :  { %4391 = vsyncpa [#allocation4 + $0x1], 1 }

</bundles_post_ra>
